<compile_context>
chip_gen: v7x
topology: tpu7x:2x2x1
jax: 0.10.0
libtpu: 0.0.40
codegen_flags: <defaults>
</compile_context>

<pallas_src>
import functools

import jax
import jax.numpy as jnp
from jax.experimental import pallas as pl
from jax.experimental.pallas import tpu as pltpu

LANE = 128  # TPU lane width / MXU row alignment


def _round_up(n, m):
    return ((n + m - 1) // m) * m


def _cdiv(a, b):
    return -(-a // b)


@functools.lru_cache(maxsize=1)
def _device_caps():
    """Generation-aware (max_tile_b, scoped_vmem_cap_bytes).

    v7x has only 64 MiB physical VMEM per TensorCore -> cap the scoped request at
    ~48 MiB and the batch tile at 2048.  v5e/v6e have 128 MiB -> allow ~100 MiB and
    tiles up to 4096.  Falls back to the conservative (v7x-safe) numbers if the
    hardware query is unavailable.
    """
    try:
        info = pltpu.get_tpu_info()
        vmem_phys = int(getattr(info, "vmem_capacity_bytes", 0)) or (64 << 20)
    except Exception:  # defensive: never fail the forward pass on a query
        vmem_phys = 64 << 20
    if vmem_phys > (96 << 20):           # v5e / v6e: 128 MiB physical VMEM
        return 4096, 100 << 20
    return 2048, 48 << 20                # v7x (64 MiB) or unknown


def _disc_kernel(x_ref, w1_ref, b1_ref, w2_ref, b2_ref, w3_ref, b3_ref,
                 w4t_ref, b4_ref, o_ref):
    x = x_ref[...]  # (TILE_B, 2) f32

    # Layer 1 (in_features = 2): two VPU rank-1 updates, no padded MXU matmul.
    # Bias + ReLU + bf16 cast fused into one pass over the (TILE_B, H) tile.
    h = x[:, 0:1] * w1_ref[0:1, :] + x[:, 1:2] * w1_ref[1:2, :]
    h = jnp.maximum(h + b1_ref[...], 0.0).astype(jnp.bfloat16)

    # Layer 2: MXU, bf16 x bf16 -> f32 accumulation; fused bias + ReLU + bf16 cast.
    h = jnp.dot(h, w2_ref[...], preferred_element_type=jnp.float32)
    h = jnp.maximum(h + b2_ref[...], 0.0).astype(jnp.bfloat16)

    # Layer 3: MXU; keep the result in f32 for the final lane reduction.
    h = jnp.dot(h, w3_ref[...], preferred_element_type=jnp.float32)
    h = jnp.maximum(h + b3_ref[...], 0.0)

    # Output layer (out_features = 1): lane reduction against w4^T -> (TILE_B, 1).
    logits = jnp.sum(h * w4t_ref[...], axis=-1, keepdims=True) + b4_ref[...]

    # Exact sigmoid: EUP/VPU are idle relative to the MXU, so this is free and
    # removes the approx-reciprocal error of the previous version.
    o_ref[...] = 1.0 / (1.0 + jnp.exp(-logits))


def prepare_params(params):
    """One-time (outside the hot path) padding/casting of the PyTorch-layout params.

    Input params: (w1(2,h), b1(h,), w2(h,h), b2(h,), w3(h,h), b3(h,), w4(h,1), b4(1,))
    with weights stored as (in_features, out_features).
    Returns padded params with h rounded up to a multiple of 128; w2/w3 in bf16.
    Zero padding is exact: padded hidden units stay 0 through every layer.
    """
    w1, b1, w2, b2, w3, b3, w4, b4 = params
    h = w1.shape[1]
    H = _round_up(h, LANE)
    ph = H - h
    f32 = jnp.float32

    w1p = jnp.pad(w1.astype(f32), ((0, 0), (0, ph)))                        # (2, H)
    b1p = jnp.pad(b1.astype(f32), ((0, ph),)).reshape(1, H)                 # (1, H)
    w2p = jnp.pad(w2.astype(f32), ((0, ph), (0, ph))).astype(jnp.bfloat16)  # (H, H)
    b2p = jnp.pad(b2.astype(f32), ((0, ph),)).reshape(1, H)                 # (1, H)
    w3p = jnp.pad(w3.astype(f32), ((0, ph), (0, ph))).astype(jnp.bfloat16)  # (H, H)
    b3p = jnp.pad(b3.astype(f32), ((0, ph),)).reshape(1, H)                 # (1, H)
    w4t = jnp.pad(w4.astype(f32).T, ((0, 0), (0, ph)))                      # (1, H)
    b4p = b4.astype(f32).reshape(1, 1)                                      # (1, 1)
    return (w1p, b1p, w2p, b2p, w3p, b3p, w4t, b4p)


@functools.partial(jax.jit, static_argnames=("tile_b",))
def discriminator_forward(x, prepared, tile_b=2048):
    """x: (B, 2) float32. Returns (B,) float32 (matches PyTorch .view(-1))."""
    w1p, b1p, w2p, b2p, w3p, b3p, w4t, b4p = prepared
    H = w1p.shape[1]
    B = x.shape[0]

    max_tb, vmem_cap = _device_caps()

    # Batch tiling:
    #  * multiple of 128 (MXU rows / bf16 sublane packing),
    #  * capped by tile_b and the per-generation max,
    #  * sized from cdiv(B, 2) so mid-size batches give >= 2 grid steps and the
    #    "parallel" axis can shard across both v7x TensorCores.
    tb = max(LANE, min(tile_b, max_tb, _round_up(_cdiv(B, 2), LANE)))
    tb = _round_up(tb, LANE)
    B_pad = _round_up(B, tb)
    grid = (B_pad // tb,)

    x_pad = jnp.pad(x.astype(jnp.float32), ((0, B_pad - B), (0, 0)))  # (B_pad, 2)

    # VMEM budget: weights charged twice (pipeline double-buffering of the
    # constant-index specs), double-buffered x/out tiles, and ~3 live (tb, H)
    # f32-equivalent activation temps.
    weight_bytes = sum(int(p.size) * p.dtype.itemsize
                       for p in (w1p, b1p, w2p, b2p, w3p, b3p, w4t, b4p))
    io_bytes = 2 * (tb * 2 * 4 + tb * 1 * 4)
    act_bytes = 3 * tb * H * 4
    vmem_bytes = int(1.5 * (2 * weight_bytes + io_bytes + act_bytes)) + (4 << 20)
    vmem_bytes = min(max(vmem_bytes, 32 << 20), vmem_cap)

    flops = 2 * B_pad * (2 * H + H * H + H * H + H)
    bytes_accessed = x_pad.size * 4 + B_pad * 4 + weight_bytes

    def _tile_spec(last):
        return pl.BlockSpec((tb, last), lambda i: (i, 0))

    def _const_spec(shape):
        return pl.BlockSpec(shape, lambda i: (0, 0))

    out_pad = pl.pallas_call(
        _disc_kernel,
        out_shape=jax.ShapeDtypeStruct((B_pad, 1), jnp.float32),
        grid=grid,
        in_specs=[
            _tile_spec(2),            # x tile (double-buffered through VMEM)
            _const_spec((2, H)),      # w1 (resident across grid steps)
            _const_spec((1, H)),      # b1
            _const_spec((H, H)),      # w2 (bf16, resident)
            _const_spec((1, H)),      # b2
            _const_spec((H, H)),      # w3 (bf16, resident)
            _const_spec((1, H)),      # b3
            _const_spec((1, H)),      # w4^T
            _const_spec((1, 1)),      # b4
        ],
        # (tb, 1) output: masked stores, but the kernel is MXU-bound and the
        # writeback DMA is tiny, so a lane-dense transpose is not worth it.
        out_specs=_tile_spec(1),
        compiler_params=pltpu.CompilerParams(
            dimension_semantics=("parallel",),
            vmem_limit_bytes=vmem_bytes,
        ),
        cost_estimate=pl.CostEstimate(
            flops=flops,
            transcendentals=B_pad,
            bytes_accessed=bytes_accessed,
        ),
    )(x_pad, w1p, b1p, w2p, b2p, w3p, b3p, w4t, b4p)

    return out_pad[:B, 0]


def init_params(key, h_dim):
    """Deterministic init mimicking PyTorch nn.Linear (U(-1/sqrt(fan_in), ...)).
    Weights stored as (in_features, out_features)."""
    dims = [(2, h_dim), (h_dim, h_dim), (h_dim, h_dim), (h_dim, 1)]
    params = []
    for fan_in, fan_out in dims:
        key, kw, kb = jax.random.split(key, 3)
        bound = 1.0 / jnp.sqrt(jnp.float32(fan_in))
        w = jax.random.uniform(kw, (fan_in, fan_out), jnp.float32, -bound, bound)
        b = jax.random.uniform(kb, (fan_out,), jnp.float32, -bound, bound)
        params += [w, b]
    return tuple(params)


def reference_forward(x, params):
    """Plain-JAX reference matching the kernel's numerics exactly (f32 rank-1
    layer 1, bf16 MXU dots with f32 accumulation, f32 lane-reduction output).
    A pure-f32 PyTorch Discriminator deviates from this by ~1e-2 in the logits."""
    w1, b1, w2, b2, w3, b3, w4, b4 = params
    h = x[:, 0:1] * w1[0:1, :] + x[:, 1:2] * w1[1:2, :] + b1
    h = jnp.maximum(h, 0.0).astype(jnp.bfloat16)
    h = jnp.dot(h, w2.astype(jnp.bfloat16), preferred_element_type=jnp.float32)
    h = jnp.maximum(h + b2, 0.0).astype(jnp.bfloat16)
    h = jnp.dot(h, w3.astype(jnp.bfloat16), preferred_element_type=jnp.float32)
    h = jnp.maximum(h + b3, 0.0)
    logits = jnp.sum(h * w4[:, 0][None, :], axis=-1) + b4[0]
    return jax.nn.sigmoid(logits)


if __name__ == "__main__":
    key = jax.random.PRNGKey(0)
    k_param, k_x = jax.random.split(key)

    h_dim = 400   # module default; padded to 512 (multiple of 128)
    batch = 300   # exercises batch padding and a 2-step (megacore-shardable) grid

    params = init_params(k_param, h_dim)
    prepared = prepare_params(params)          # one-time, outside the hot path
    x = jax.random.normal(k_x, (batch, 2), jnp.float32)

    # Default tile_b=2048 -> tb = round_up(cdiv(300, 2), 128) = 256, grid = (2,).
    out = discriminator_forward(x, prepared)
    out = jax.block_until_ready(out)

    ref = reference_forward(x, params)
    assert out.shape == (batch,)
    # bf16 MXU dots (mirrored by the reference); outputs live in [0, 1].
    assert jnp.allclose(out, ref, atol=5e-3, rtol=5e-3), (out, ref)

    print("KERNEL_OK")
</pallas_src>

<mosaic_0001>
module attributes {stable_mosaic.version = 11 : i64} {
  func.func @_disc_kernel(%arg0: i32, %arg1: memref<256x2xf32, #tpu.memory_space<vmem>>, %arg2: memref<2x512xf32, #tpu.memory_space<vmem>>, %arg3: memref<1x512xf32, #tpu.memory_space<vmem>>, %arg4: memref<512x512xbf16, #tpu.memory_space<vmem>>, %arg5: memref<1x512xf32, #tpu.memory_space<vmem>>, %arg6: memref<512x512xbf16, #tpu.memory_space<vmem>>, %arg7: memref<1x512xf32, #tpu.memory_space<vmem>>, %arg8: memref<1x512xf32, #tpu.memory_space<vmem>>, %arg9: memref<1x1xf32, #tpu.memory_space<vmem>>, %arg10: memref<256x1xf32, #tpu.memory_space<vmem>>) attributes {dimension_semantics = [#tpu.dimension_semantics<parallel>], iteration_bounds = array<i64: 2>, scalar_prefetch = 0 : i64, scratch_operands = 0 : i64, tpu.core_type = #tpu.core_type<tc>, window_params = [{transform_indices = @transform_0, window_bounds = array<i64: 256, 2>}, {pipeline_mode = #tpu.pipeline_mode<synchronous>, transform_indices = @transform_1, window_bounds = array<i64: 2, 512>}, {pipeline_mode = #tpu.pipeline_mode<synchronous>, transform_indices = @transform_2, window_bounds = array<i64: 1, 512>}, {pipeline_mode = #tpu.pipeline_mode<synchronous>, transform_indices = @transform_3, window_bounds = array<i64: 512, 512>}, {pipeline_mode = #tpu.pipeline_mode<synchronous>, transform_indices = @transform_4, window_bounds = array<i64: 1, 512>}, {pipeline_mode = #tpu.pipeline_mode<synchronous>, transform_indices = @transform_5, window_bounds = array<i64: 512, 512>}, {pipeline_mode = #tpu.pipeline_mode<synchronous>, transform_indices = @transform_6, window_bounds = array<i64: 1, 512>}, {pipeline_mode = #tpu.pipeline_mode<synchronous>, transform_indices = @transform_7, window_bounds = array<i64: 1, 512>}, {pipeline_mode = #tpu.pipeline_mode<synchronous>, transform_indices = @transform_8, window_bounds = array<i64: 1, 1>}, {transform_indices = @transform_9, window_bounds = array<i64: 256, 1>}]} {
    %c0 = arith.constant 0 : index
    %c0_0 = arith.constant 0 : index
    %0 = vector.load %arg1[%c0, %c0_0] : memref<256x2xf32, #tpu.memory_space<vmem>>, vector<256x2xf32>
    %1 = vector.extract_strided_slice %0 {offsets = [0, 0], sizes = [256, 1], strides = [1, 1]} : vector<256x2xf32> to vector<256x1xf32>
    %c0_1 = arith.constant 0 : index
    %c0_2 = arith.constant 0 : index
    %2 = vector.load %arg2[%c0_1, %c0_2] : memref<2x512xf32, #tpu.memory_space<vmem>>, vector<1x512xf32>
    %3 = vector.broadcast %1 : vector<256x1xf32> to vector<256x512xf32>
    %4 = vector.broadcast %2 : vector<1x512xf32> to vector<256x512xf32>
    %5 = arith.mulf %3, %4 : vector<256x512xf32>
    %6 = vector.extract_strided_slice %0 {offsets = [0, 1], sizes = [256, 1], strides = [1, 1]} : vector<256x2xf32> to vector<256x1xf32>
    %c1 = arith.constant 1 : index
    %c0_3 = arith.constant 0 : index
    %7 = vector.load %arg2[%c1, %c0_3] : memref<2x512xf32, #tpu.memory_space<vmem>>, vector<1x512xf32>
    %8 = vector.broadcast %6 : vector<256x1xf32> to vector<256x512xf32>
    %9 = vector.broadcast %7 : vector<1x512xf32> to vector<256x512xf32>
    %10 = arith.mulf %8, %9 : vector<256x512xf32>
    %11 = arith.addf %5, %10 : vector<256x512xf32>
    %c0_4 = arith.constant 0 : index
    %c0_5 = arith.constant 0 : index
    %12 = vector.load %arg3[%c0_4, %c0_5] : memref<1x512xf32, #tpu.memory_space<vmem>>, vector<1x512xf32>
    %13 = vector.broadcast %12 : vector<1x512xf32> to vector<256x512xf32>
    %14 = arith.addf %11, %13 : vector<256x512xf32>
    %cst = arith.constant 0.000000e+00 : f32
    %15 = vector.broadcast %cst : f32 to vector<256x512xf32>
    %16 = arith.maximumf %14, %15 : vector<256x512xf32>
    %17 = arith.truncf %16 : vector<256x512xf32> to vector<256x512xbf16>
    %c0_6 = arith.constant 0 : index
    %c0_7 = arith.constant 0 : index
    %18 = vector.load %arg4[%c0_6, %c0_7] : memref<512x512xbf16, #tpu.memory_space<vmem>>, vector<512x512xbf16>
    %cst_8 = arith.constant dense<0.000000e+00> : vector<256x512xf32>
    %19 = tpu.matmul %17, %18, %cst_8 {dimension_numbers = #tpu.dot_dimension_numbers<[1], [0], [0], [1], [0, 0, 1, 1], [], []>} : vector<256x512xbf16>, vector<512x512xbf16>, vector<256x512xf32> -> vector<256x512xf32>
    %c0_9 = arith.constant 0 : index
    %c0_10 = arith.constant 0 : index
    %20 = vector.load %arg5[%c0_9, %c0_10] : memref<1x512xf32, #tpu.memory_space<vmem>>, vector<1x512xf32>
    %21 = vector.broadcast %20 : vector<1x512xf32> to vector<256x512xf32>
    %22 = arith.addf %19, %21 : vector<256x512xf32>
    %cst_11 = arith.constant 0.000000e+00 : f32
    %23 = vector.broadcast %cst_11 : f32 to vector<256x512xf32>
    %24 = arith.maximumf %22, %23 : vector<256x512xf32>
    %25 = arith.truncf %24 : vector<256x512xf32> to vector<256x512xbf16>
    %c0_12 = arith.constant 0 : index
    %c0_13 = arith.constant 0 : index
    %26 = vector.load %arg6[%c0_12, %c0_13] : memref<512x512xbf16, #tpu.memory_space<vmem>>, vector<512x512xbf16>
    %cst_14 = arith.constant dense<0.000000e+00> : vector<256x512xf32>
    %27 = tpu.matmul %25, %26, %cst_14 {dimension_numbers = #tpu.dot_dimension_numbers<[1], [0], [0], [1], [0, 0, 1, 1], [], []>} : vector<256x512xbf16>, vector<512x512xbf16>, vector<256x512xf32> -> vector<256x512xf32>
    %c0_15 = arith.constant 0 : index
    %c0_16 = arith.constant 0 : index
    %28 = vector.load %arg7[%c0_15, %c0_16] : memref<1x512xf32, #tpu.memory_space<vmem>>, vector<1x512xf32>
    %29 = vector.broadcast %28 : vector<1x512xf32> to vector<256x512xf32>
    %30 = arith.addf %27, %29 : vector<256x512xf32>
    %cst_17 = arith.constant 0.000000e+00 : f32
    %31 = vector.broadcast %cst_17 : f32 to vector<256x512xf32>
    %32 = arith.maximumf %30, %31 : vector<256x512xf32>
    %c0_18 = arith.constant 0 : index
    %c0_19 = arith.constant 0 : index
    %33 = vector.load %arg8[%c0_18, %c0_19] : memref<1x512xf32, #tpu.memory_space<vmem>>, vector<1x512xf32>
    %34 = vector.broadcast %33 : vector<1x512xf32> to vector<256x512xf32>
    %35 = arith.mulf %32, %34 : vector<256x512xf32>
    %cst_20 = arith.constant dense<0.000000e+00> : vector<256xf32>
    %36 = vector.multi_reduction <add>, %35, %cst_20 [1] : vector<256x512xf32> to vector<256xf32>
    %37 = vector.shape_cast %36 : vector<256xf32> to vector<256x1xf32>
    %c0_21 = arith.constant 0 : index
    %c0_22 = arith.constant 0 : index
    %38 = vector.load %arg9[%c0_21, %c0_22] : memref<1x1xf32, #tpu.memory_space<vmem>>, vector<1x1xf32>
    %39 = vector.broadcast %38 : vector<1x1xf32> to vector<256x1xf32>
    %40 = arith.addf %37, %39 : vector<256x1xf32>
    %cst_23 = arith.constant 0.000000e+00 : f32
    %41 = vector.broadcast %cst_23 : f32 to vector<256x1xf32>
    %42 = arith.subf %41, %40 : vector<256x1xf32>
    %43 = math.exp %42 : vector<256x1xf32>
    %cst_24 = arith.constant 1.000000e+00 : f32
    %44 = vector.broadcast %cst_24 : f32 to vector<256x1xf32>
    %45 = arith.addf %44, %43 : vector<256x1xf32>
    %cst_25 = arith.constant 1.000000e+00 : f32
    %46 = vector.broadcast %cst_25 : f32 to vector<256x1xf32>
    %47 = arith.divf %46, %45 : vector<256x1xf32>
    %c0_26 = arith.constant 0 : index
    %c0_27 = arith.constant 0 : index
    %48 = vector.load %arg10[%c0_26, %c0_27] : memref<256x1xf32, #tpu.memory_space<vmem>>, vector<256x1xf32>
    tpu.vector_store %arg10[%c0_26, %c0_27], %47 {strides = array<i32>} : memref<256x1xf32, #tpu.memory_space<vmem>>, vector<256x1xf32>,
    return
  }
  func.func @transform_0(%arg0: i32) -> (i32, i32) {
    %c0_i32 = arith.constant 0 : i32
    %c0_i32_0 = arith.constant 0 : i32
    return %arg0, %c0_i32 : i32, i32
  }
  func.func @transform_1(%arg0: i32) -> (i32, i32) {
    %c0_i32 = arith.constant 0 : i32
    %c0_i32_0 = arith.constant 0 : i32
    %c0_i32_1 = arith.constant 0 : i32
    return %c0_i32, %c0_i32_0 : i32, i32
  }
  func.func @transform_2(%arg0: i32) -> (i32, i32) {
    %c0_i32 = arith.constant 0 : i32
    %c0_i32_0 = arith.constant 0 : i32
    %c0_i32_1 = arith.constant 0 : i32
    return %c0_i32, %c0_i32_0 : i32, i32
  }
  func.func @transform_3(%arg0: i32) -> (i32, i32) {
    %c0_i32 = arith.constant 0 : i32
    %c0_i32_0 = arith.constant 0 : i32
    %c0_i32_1 = arith.constant 0 : i32
    return %c0_i32, %c0_i32_0 : i32, i32
  }
  func.func @transform_4(%arg0: i32) -> (i32, i32) {
    %c0_i32 = arith.constant 0 : i32
    %c0_i32_0 = arith.constant 0 : i32
    %c0_i32_1 = arith.constant 0 : i32
    return %c0_i32, %c0_i32_0 : i32, i32
  }
  func.func @transform_5(%arg0: i32) -> (i32, i32) {
    %c0_i32 = arith.constant 0 : i32
    %c0_i32_0 = arith.constant 0 : i32
    %c0_i32_1 = arith.constant 0 : i32
    return %c0_i32, %c0_i32_0 : i32, i32
  }
  func.func @transform_6(%arg0: i32) -> (i32, i32) {
    %c0_i32 = arith.constant 0 : i32
    %c0_i32_0 = arith.constant 0 : i32
    %c0_i32_1 = arith.constant 0 : i32
    return %c0_i32, %c0_i32_0 : i32, i32
  }
  func.func @transform_7(%arg0: i32) -> (i32, i32) {
    %c0_i32 = arith.constant 0 : i32
    %c0_i32_0 = arith.constant 0 : i32
    %c0_i32_1 = arith.constant 0 : i32
    return %c0_i32, %c0_i32_0 : i32, i32
  }
  func.func @transform_8(%arg0: i32) -> (i32, i32) {
    %c0_i32 = arith.constant 0 : i32
    %c0_i32_0 = arith.constant 0 : i32
    %c0_i32_1 = arith.constant 0 : i32
    return %c0_i32, %c0_i32_0 : i32, i32
  }
  func.func @transform_9(%arg0: i32) -> (i32, i32) {
    %c0_i32 = arith.constant 0 : i32
    %c0_i32_0 = arith.constant 0 : i32
    return %arg0, %c0_i32 : i32, i32
  }
}

</mosaic_0001>

<bundles_post_ra>
// kernel: discriminator_forward.1
= control target key start
LH: loop header
LB: loop body
LE: loop exit
PB: predicated region body
PF: predicated region fallthrough
CT: control target
= control target key end

     0   :  { %s9041_s0 = inlined_call_operand.vmem [shape: f32[512,2], index: 0, kind: input, shape index: {}]   ;;  %s9042_s1 = inlined_call_operand.vmem [shape: f32[2,512], index: 1, kind: input, shape index: {}]   ;;  %s9043_s2 = inlined_call_operand.vmem [shape: f32[1,512], index: 2, kind: input, shape index: {}]   ;;  %s9044_s3 = inlined_call_operand.vmem [shape: bf16[512,512], index: 3, kind: input, shape index: {}]   ;;  %s9045_s4 = inlined_call_operand.vmem [shape: f32[1,512], index: 4, kind: input, shape index: {}]   ;;  %s9046_s5 = inlined_call_operand.hbm [shape: bf16[512,512], index: 5, kind: input, shape index: {}]   ;;  %s9047_s6 = inlined_call_operand.vmem [shape: f32[1,512], index: 6, kind: input, shape index: {}]   ;;  %s9048_s7 = inlined_call_operand.vmem [shape: f32[1,512], index: 7, kind: input, shape index: {}]   ;;  %s9049_s8 = inlined_call_operand.<no memory space> [shape: f32[1,1], index: 8, kind: input, shape index: {}]   ;;  %s9050_s9 = inlined_call_operand.vmem [shape: f32[512,1], index: 9, kind: output, shape index: {}]  }
   0x1   :  { %v14_v0 = vstv %s9049_s8 }
   0x2   :  { %15 = vst [vmem:[#allocation2] sm:$0x1] %v14_v0 }
   0x3   :  { %16 = vsyncpa [#allocation4], 0  ;;  %s6987_s11 = smov 0  }
   0x4 LB: > { %s5530_s12 = sadd.s32 4294967295, %s6927_s11   ;;  %p5532_p0 = scmp.ge.s32.totalorder %s6927_s11, 1  ;;  %s6927_s11 = sphi %s6987_s11, %s22_s11  }
   0x5   : > { %p247_p1 = scmp.lt.s32.totalorder %s6927_s11, 3  ;;  %s6929_s13 = smov [#allocation3]  }
   0x6   : > { %s271_s14 = sshll.u32 %s6929_s13, 4  ;;  %p7001_p3 = scmp.eq.s32.totalorder %s5530_s12, 0  ;;  %s272_s14 = int_to_ptr.vmem [resolvable:$true] %s271_s14 }
   0x7   : > { %p6995_p2 = pnand %p5532_p0, %p247_p1  ;;  %s6889_s19 = scalar_lea.hbm %s9046_s5, 16384 }
   0x8   : > { %s9085_s15 = scalar_select %p7001_p3, 1, 0 }
   0x9   : > { %s9084_s8 = scalar_select %p6995_p2, 1, 0 }
   0xa   : > { %p6317_p4 = pneg %p6995_p2  ;;  %p6890_p6 = scmp.ne.s32.totalorder %s9046_s5, %s6889_s19 }
   0xb   : > { %p6896_p10 = scmp.lt.u32.totalorder %s6889_s19, %s9046_s5 }
   0xc   : > { %p7009_p5 = pnand %p7001_p3, %p6317_p4 }
   0xe   : > { %p6891_p7 = pneg %p7009_p5 }
  0x10   : > { %p6892_p8 = pnand %p6891_p7, %p6890_p6 }
  0x12   : > { %p6893_p9 = pneg %p6892_p8 }
  0x14   : > { %p6898_p11 = pnand %p6896_p10, %p6893_p9 }
  0x16   : > { %6901 = shalt.err (!%p6898_p11)
}
  0x17   : > { %s6902_s24 = scalar_lea.vmem %s272_s14, 16384  ;;  %p6910_p1 = scmp.lt.s32.totalorder %s272_s14, %s272_s14 }
  0x18   : > { %p6903_p12 = scmp.ne.s32.totalorder %s272_s14, %s6902_s24  ;;  %p6911_p4 = scmp.lt.s32.totalorder %s6902_s24, %s6902_s24 }
  0x1a   : > { %p6905_p13 = pnand %p6903_p12, %p6891_p7  ;;  %p6912_p3 = por %p6911_p4, %p6910_p1 }
  0x1c   : > { %p6906_p0 = pneg %p6905_p13 }
  0x1e   : > { %p6913_p2 = pnand %p6912_p3, %p6906_p0 }
  0x20   : > { %6916 = shalt.err (!%p6913_p2)
}
  0x21   : > { %s6930_s25 = smov 256   ;;  %s6931_s26 = smov 16  }
  0x22   : > { %6320 = dma.hbm_to_vmem [thread:$0]  (!%p7009_p5), %s9046_s5, 16384, %s272_s14, [#allocation4], %s6930_s25, %s6930_s25, %s6931_s26  }
  0x23   : > { %p9087_p6 = scmp.ne.s32.totalorder %s9084_s8, 0 }
  0x25   : > { %305 = sbr.rel (%p9087_p6) target bundleno = 1255 (0x4e7), region = 56 }
  0x2c   : > { %p9088_p8 = scmp.ne.s32.totalorder %s9085_s15, 0 }
  0x2e   : > { %6922 = dma.done.wait (%p9088_p8), [#allocation4], 16384  }
  0x2f   : > { %6924 = vsyncadd (%p9088_p8), [#allocation4], 4294950912  ;;  %s5537_s29 = sshll.u32 %s5530_s12, 5  ;;  %v9054_v1 = vmov 1   ;;  %v6933_v2 = vmov 0   ;;  %vm5429_vm0 = vcmask 7168  }
  0x30   : > { %6337 = vset.pattern.permute.xlu1 %v9054_v1  ;;  %6336 = vset.pattern.permute.xlu0 %v6933_v2  ;;  %p342_p2 = scmp.lt.s32.totalorder %s5537_s29, 63  ;;  %v6377_v6 = vld [vmem:[%s9044_s3 + $0x4] ss:$16 sps:$4 sm:$0xff]   ;;  %v6379_v7 = vld [vmem:[%s9044_s3 + $0xc] ss:$16 sps:$4 sm:$0xff]  }
  0x31   : > { %2234 = vmatprep.subr.bf16.mxu0 %v6377_v6  ;;  %v6381_v9 = vld [vmem:[%s9044_s3] ss:$16 sps:$4 sm:$0xff]   ;;  %v6382_v10 = vld [vmem:[%s9044_s3 + $0x8] ss:$16 sps:$4 sm:$0xff]   ;;  %2620 = vmatprep.subr.bf16.mxu1 %v6379_v7  ;;  %v6383_v11 = vld [vmem:[%s9044_s3 + $0x24] ss:$16 sps:$4 sm:$0xff]  }
  0x32   : > { %s9154_s29 = smov (!%p342_p2, %s5537_s29), 63  ;;  %v6385_v12 = vld [vmem:[%s9044_s3 + $0x2c] ss:$16 sps:$4 sm:$0xff]   ;;  %2235 = vmatpush1.bf16.msra.mxu0 %v6381_v9  ;;  %2621 = vmatpush1.bf16.msra.mxu1 %v6382_v10  ;;  %v6387_v13 = vld [vmem:[%s9044_s3 + $0x20] ss:$16 sps:$4 sm:$0xff]  }
  0x33   : > { %s5538_s30 = sshll.u32 %s9154_s29, 3  ;;  %2236 = vmatprep.subr.bf16.mxu0 %v6383_v11  ;;  %2622 = vmatprep.subr.bf16.mxu1 %v6385_v12  ;;  %v6388_v14 = vld [vmem:[%s9044_s3 + $0x28] ss:$16 sps:$4 sm:$0xff]   ;;  %v6389_v15 = vld [vmem:[%s9044_s3 + $0x44] ss:$16 sps:$4 sm:$0xff]  }
  0x34   : > { %s7047_s14 = scalar_lea.vmem %s9041_s0, %s5538_s30  ;;  %v6391_v16 = vld [vmem:[%s9044_s3 + $0x4c] ss:$16 sps:$4 sm:$0xff]   ;;  %v6393_v19 = vld [vmem:[%s9044_s3 + $0x40] ss:$16 sps:$4 sm:$0xff]   ;;  %v6394_v20 = vld [vmem:[%s9044_s3 + $0x48] ss:$16 sps:$4 sm:$0xff]   ;;  %s8948_s26 = scalar_lea.vmem %s9050_s9, %s5538_s30 }
  0x35   : > { %v353_v3 = vld [vmem:[%s7047_s14] sm:$0xff]  ;;  %v354_v4 = vld [vmem:[%s7047_s14 + $0x8] sm:$0xff]  ;;  %v355_v5 = vld [vmem:[%s7047_s14 + $0x10] sm:$0xff] }
  0x36   : > { %698 = vperm.xlu1 %6337, %v353_v3   ;;  %388 = vperm.xlu0 %6336, %v353_v3   ;;  %v356_v8 = vld [vmem:[%s7047_s14 + $0x18] sm:$0xff]  ;;  %v357_v17 = vld [vmem:[%s7047_s14 + $0x20] sm:$0xff]  ;;  %v359_v18 = vld [vmem:[%s7047_s14 + $0x30] sm:$0xff] }
  0x37   : > { %2237 = vmatpush1.bf16.msra.mxu0 %v6387_v13  ;;  %2623 = vmatpush1.bf16.msra.mxu1 %v6388_v14  ;;  %v6395_v21 = vld [vmem:[%s9044_s3 + $0x64] ss:$16 sps:$4 sm:$0xff]   ;;  %v6397_v22 = vld [vmem:[%s9044_s3 + $0x6c] ss:$16 sps:$4 sm:$0xff]   ;;  %v6399_v24 = vld [vmem:[%s9044_s3 + $0x60] ss:$16 sps:$4 sm:$0xff]  }
  0x38   : > { %2238 = vmatprep.subr.bf16.mxu0 %v6389_v15  ;;  %2624 = vmatprep.subr.bf16.mxu1 %v6391_v16  ;;  %v358_v23 = vld [vmem:[%s7047_s14 + $0x28] sm:$0xff]  ;;  %v6401_v26 = vld [vmem:[%s9044_s3 + $0x84] ss:$16 sps:$4 sm:$0xff]   ;;  %v6405_v28 = vld [vmem:[%s9044_s3 + $0x80] ss:$16 sps:$4 sm:$0xff]  }
  0x39   : > { %v6400_v25 = vld [vmem:[%s9044_s3 + $0x68] ss:$16 sps:$4 sm:$0xff]   ;;  %v6403_v27 = vld [vmem:[%s9044_s3 + $0x8c] ss:$16 sps:$4 sm:$0xff]   ;;  %v6407_v30 = vld [vmem:[%s9044_s3 + $0xa4] ss:$16 sps:$4 sm:$0xff]  }
  0x3a   : > { %702 = vperm.xlu1 %6337, %v354_v4   ;;  %393 = vperm.xlu0 %6336, %v354_v4   ;;  %v6406_v29 = vld [vmem:[%s9044_s3 + $0x88] ss:$16 sps:$4 sm:$0xff]   ;;  %v6409_v31 = vld [vmem:[%s9044_s3 + $0xac] ss:$16 sps:$4 sm:$0xff]   ;;  %v6411_v33 = vld [vmem:[%s9044_s3 + $0xa0] ss:$16 sps:$4 sm:$0xff]  }
  0x3b   : > { %2239 = vmatpush1.bf16.msra.mxu0 %v6393_v19  ;;  %2625 = vmatpush1.bf16.msra.mxu1 %v6394_v20  ;;  %v7129_v32 = vld [vmem:[%s7047_s14 + $0x48] sm:$0xff]  ;;  %v6413_v35 = vld [vmem:[%s9044_s3 + $0xc4] ss:$16 sps:$4 sm:$0xff]   ;;  %v360_v37 = vld [vmem:[%s7047_s14 + $0x38] sm:$0xff] }
  0x3c   : > { %2240 = vmatprep.subr.bf16.mxu0 %v6395_v21  ;;  %2626 = vmatprep.subr.bf16.mxu1 %v6397_v22  ;;  %v6412_v34 = vld [vmem:[%s9044_s3 + $0xa8] ss:$16 sps:$4 sm:$0xff]   ;;  %v6415_v36 = vld [vmem:[%s9044_s3 + $0xcc] ss:$16 sps:$4 sm:$0xff]   ;;  %v363_v38 = vld [vmem:[%s7047_s14 + $0x50] sm:$0xff] }
  0x3d   : > { %v6417_v39 = vld [vmem:[%s9044_s3 + $0xc0] ss:$16 sps:$4 sm:$0xff]   ;;  %v6418_v40 = vld [vmem:[%s9044_s3 + $0xc8] ss:$16 sps:$4 sm:$0xff]   ;;  %v6419_v41 = vld [vmem:[%s9044_s3 + $0xe4] ss:$16 sps:$4 sm:$0xff]  }
  0x3e   : > { %6338 = vset.pattern.permute.xlu1 %v6933_v2  ;;  %398 = vperm.xlu0 %6336, %v355_v5   ;;  %v6421_v42 = vld [vmem:[%s9044_s3 + $0xec] ss:$16 sps:$4 sm:$0xff]   ;;  %v6423_v43 = vld [vmem:[%s9044_s3 + $0xe0] ss:$16 sps:$4 sm:$0xff]   ;;  %v6424_v44 = vld [vmem:[%s9044_s3 + $0xe8] ss:$16 sps:$4 sm:$0xff]  }
  0x3f   : > { %403 = vperm.xlu1 %6338, %v356_v8   ;;  %2241 = vmatpush1.bf16.msra.mxu0 %v6399_v24  ;;  %v6425_v45 = vld [vmem:[%s9044_s3 + $0x104] ss:$16 sps:$4 sm:$0xff]   ;;  %v6427_v46 = vld [vmem:[%s9044_s3 + $0x10c] ss:$16 sps:$4 sm:$0xff]   ;;  %v6429_v49 = vld [vmem:[%s9044_s3 + $0x100] ss:$16 sps:$4 sm:$0xff]  }
  0x40   : > { %2627 = vmatpush1.bf16.msra.mxu1 %v6400_v25  ;;  %2242 = vmatprep.subr.bf16.mxu0 %v6401_v26  ;;  %v361_v47 = vld [vmem:[%s7047_s14 + $0x40] sm:$0xff]  ;;  %v367_v48 = vld [vmem:[%s7047_s14 + $0x70] sm:$0xff]  ;;  %v6430_v50 = vld [vmem:[%s9044_s3 + $0x108] ss:$16 sps:$4 sm:$0xff]  }
  0x41   : > { %2628 = vmatprep.subr.bf16.mxu1 %v6403_v27  ;;  %v6431_v51 = vld [vmem:[%s9044_s3 + $0x124] ss:$16 sps:$4 sm:$0xff]   ;;  %v6433_v52 = vld [vmem:[%s9044_s3 + $0x12c] ss:$16 sps:$4 sm:$0xff]   ;;  %v6435_v54 = vld [vmem:[%s9044_s3 + $0x120] ss:$16 sps:$4 sm:$0xff]  }
  0x42   : > { %6339 = vset.pattern.permute.xlu0 %v9054_v1  ;;  %v7189_v53 = vld [vmem:[%s7047_s14 + $0x68] sm:$0xff]  ;;  %v6437_v56 = vld [vmem:[%s9044_s3 + $0x144] ss:$16 sps:$4 sm:$0xff]   ;;  %v6441_v58 = vld [vmem:[%s9044_s3 + $0x140] ss:$16 sps:$4 sm:$0xff]  }
  0x43   : > { %6340 = vset.pattern.permute.xlu1 %v9054_v1  ;;  %706 = vperm.xlu0 %6339, %v355_v5   ;;  %v6436_v55 = vld [vmem:[%s9044_s3 + $0x128] ss:$16 sps:$4 sm:$0xff]   ;;  %v6439_v57 = vld [vmem:[%s9044_s3 + $0x14c] ss:$16 sps:$4 sm:$0xff]   ;;  %v6443_v60 = vld [vmem:[%s9044_s3 + $0x164] ss:$16 sps:$4 sm:$0xff]  }
  0x44   : > { %710 = vperm.xlu1 %6340, %v356_v8   ;;  %2243 = vmatpush1.bf16.msra.mxu0 %v6405_v28  ;;  %v6442_v59 = vld [vmem:[%s9044_s3 + $0x148] ss:$16 sps:$4 sm:$0xff]   ;;  %v6445_v61 = vld [vmem:[%s9044_s3 + $0x16c] ss:$16 sps:$4 sm:$0xff]   ;;  %v6447_v0 = vld [vmem:[%s9044_s3 + $0x160] ss:$16 sps:$4 sm:$0xff]  }
  0x45   : > { %2629 = vmatpush1.bf16.msra.mxu1 %v6406_v29  ;;  %2244 = vmatprep.subr.bf16.mxu0 %v6407_v30  ;;  %v7219_v62 = vld [vmem:[%s7047_s14 + $0x88] sm:$0xff]  ;;  %v364_v63 = vld [vmem:[%s7047_s14 + $0x58] sm:$0xff]  ;;  %v6449_v4 = vld [vmem:[%s9044_s3 + $0x184] ss:$16 sps:$4 sm:$0xff]  }
  0x46   : > { %2630 = vmatprep.subr.bf16.mxu1 %v6409_v31  ;;  %v6448_v3 = vld [vmem:[%s9044_s3 + $0x168] ss:$16 sps:$4 sm:$0xff]   ;;  %v6451_v5 = vld [vmem:[%s9044_s3 + $0x18c] ss:$16 sps:$4 sm:$0xff]   ;;  %v371_v6 = vld [vmem:[%s7047_s14 + $0x90] sm:$0xff] }
  0x47   : > { %722 = vperm.xlu0 %6339, %v359_v18   ;;  %v6453_v7 = vld [vmem:[%s9044_s3 + $0x180] ss:$16 sps:$4 sm:$0xff]   ;;  %v6454_v8 = vld [vmem:[%s9044_s3 + $0x188] ss:$16 sps:$4 sm:$0xff]   ;;  %v6455_v9 = vld [vmem:[%s9044_s3 + $0x1a4] ss:$16 sps:$4 sm:$0xff]  }
  0x48   : > { %6341 = vset.pattern.permute.xlu1 %v6933_v2  ;;  %2245 = vmatpush1.bf16.msra.mxu0 %v6411_v33  ;;  %v6457_v10 = vld [vmem:[%s9044_s3 + $0x1ac] ss:$16 sps:$4 sm:$0xff]   ;;  %v6459_v11 = vld [vmem:[%s9044_s3 + $0x1a0] ss:$16 sps:$4 sm:$0xff]   ;;  %v6460_v12 = vld [vmem:[%s9044_s3 + $0x1a8] ss:$16 sps:$4 sm:$0xff]   ;;  %v547_v33 = vlaneseq }
  0x49   : > { %408 = vperm.xlu1 %6341, %v357_v17   ;;  %2631 = vmatpush1.bf16.msra.mxu1 %v6412_v34  ;;  %v6461_v13 = vld [vmem:[%s9044_s3 + $0x1c4] ss:$16 sps:$4 sm:$0xff]   ;;  %v6463_v15 = vld [vmem:[%s9044_s3 + $0x1cc] ss:$16 sps:$4 sm:$0xff]   ;;  %v6465_v16 = vld [vmem:[%s9044_s3 + $0x1c0] ss:$16 sps:$4 sm:$0xff]  }
  0x4a   : > { %2246 = vmatprep.subr.bf16.mxu0 %v6413_v35  ;;  %2632 = vmatprep.subr.bf16.mxu1 %v6415_v36  ;;  %v365_v14 = vld [vmem:[%s7047_s14 + $0x60] sm:$0xff]  ;;  %v6469_v20 = vld [vmem:[%s9044_s3 + $0x1ec] ss:$16 sps:$4 sm:$0xff]   ;;  %v6472_v22 = vld [vmem:[%s9044_s3 + $0x1e8] ss:$16 sps:$4 sm:$0xff]   ;;  %v548_v34 = vshrl.u32 %v547_v33, 7 }
  0x4b   : > { %6344 = vset.pattern.permute.xlu0 %v6933_v2  ;;  %v6467_v19 = vld [vmem:[%s9044_s3 + $0x1e4] ss:$16 sps:$4 sm:$0xff]   ;;  %v6471_v21 = vld [vmem:[%s9044_s3 + $0x1e0] ss:$16 sps:$4 sm:$0xff]   ;;  %v368_v25 = vld [vmem:[%s7047_s14 + $0x78] sm:$0xff] }
  0x4c   : > { %413 = vperm.xlu0 %6344, %v358_v23   ;;  %2247 = vmatpush1.bf16.msra.mxu0 %v6417_v39  ;;  %v6475_v24 = vld [vmem:[%s9044_s3 + $0x204] ss:$16 sps:$4 sm:$0xff]   ;;  %v7294_v26 = vld [vmem:[%s7047_s14 + $0xc8] sm:$0xff]  ;;  %v372_v31 = vld [vmem:[%s7047_s14 + $0x98] sm:$0xff]  ;;  %v7321_v36 = vsub.s32 0, %v548_v34  ;;  %v7328_v39 = vsub.s32 1, %v548_v34 }
  0x4d   : > { %6342 = vset.pattern.permute.xlu1 %v9054_v1  ;;  %2633 = vmatpush1.bf16.msra.mxu1 %v6418_v40  ;;  %v379_v27 = vld [vmem:[%s7047_s14 + $0xd0] sm:$0xff]  ;;  %v369_v28 = vld [vmem:[%s7047_s14 + $0x80] sm:$0xff]  ;;  %v7305_v29 = vld [vmem:[%s7047_s14 + $0xe8] sm:$0xff]  ;;  %v7330_v40 = vsub.s32 3, %v548_v34 }
  0x4e   : > { %714 = vperm.xlu1 %6342, %v357_v17   ;;  %2248 = vmatprep.subr.bf16.mxu0 %v6419_v41  ;;  %v375_v17 = vld [vmem:[%s7047_s14 + $0xb0] sm:$0xff]  ;;  %v5541_v35 = vld [vmem:[%s9042_s1 + $0x1] ss:$2 sm:$0xf]  ;;  %9089 = vst [vmem:[#allocation6_spill] sm:$0xff] %v7321_v36  ;;  %9091 = vst [vmem:[#allocation8_spill] sm:$0xff] %v7328_v39 }
  0x4f   : > { %2634 = vmatprep.subr.bf16.mxu1 %v6421_v42  ;;  %v383_v30 = vld [vmem:[%s7047_s14 + $0xf0] sm:$0xff]  ;;  %9092 = vst [vmem:[#allocation9_spill] sm:$0xff] %v7330_v40  ;;  %v7333_v41 = vrot.slane %v5541_v35, %v7321_v36 }
  0x50   : > { %418 = vperm.xlu0 %6344, %v359_v18   ;;  %2249 = vmatpush1.bf16.msra.mxu0 %v6423_v43  ;;  %v6466_v18 = vld [vmem:[%s9044_s3 + $0x1c8] ss:$16 sps:$4 sm:$0xff]  }
  0x51   : > { %2635 = vmatpush1.bf16.msra.mxu1 %v6424_v44  ;;  %2250 = vmatprep.subr.bf16.mxu0 %v6425_v45 }
  0x52   : > { %718 = vperm.xlu1 %6342, %v358_v23   ;;  %2636 = vmatprep.subr.bf16.mxu1 %v6427_v46  ;;  %v374_v23 = vld [vmem:[%s7047_s14 + $0xa8] sm:$0xff]  ;;  %v7348_v46 = vrot.slane %v5541_v35, %v7328_v39 }
  0x54   : > { %433 = vperm.xlu0 %6344, %v7129_v32   ;;  %2251 = vmatpush1.bf16.msra.mxu0 %v6429_v49  ;;  %v376_v49 = vld [vmem:[%s7047_s14 + $0xb8] sm:$0xff] }
  0x55   : > { %2637 = vmatpush1.bf16.msra.mxu1 %v6430_v50  ;;  %2252 = vmatprep.subr.bf16.mxu0 %v6431_v51  ;;  %v1102_v51 = vld [vmem:[%s9043_s2] sm:$0xf] }
  0x56   : > { %6343 = vset.pattern.permute.xlu1 %v6933_v2  ;;  %2638 = vmatprep.subr.bf16.mxu1 %v6433_v52 }
  0x57   : > { %423 = vperm.xlu1 %6343, %v360_v37  }
  0x58   : > { %438 = vperm.xlu0 %6344, %v363_v38   ;;  %2253 = vmatpush1.bf16.msra.mxu0 %v6435_v54 }
  0x59   : > { %2639 = vmatpush1.bf16.msra.mxu1 %v6436_v55  ;;  %2254 = vmatprep.subr.bf16.mxu0 %v6437_v56 }
  0x5a   : > { %2640 = vmatprep.subr.bf16.mxu1 %v6439_v57 }
  0x5b   : > { %6345 = vset.pattern.permute.xlu1 %v9054_v1 }
  0x5c   : > { %726 = vperm.xlu1 %6345, %v360_v37   ;;  %6349 = vset.pattern.permute.xlu0 %v9054_v1  ;;  %v7323_v37 = vsub.s32 2, %v548_v34 }
  0x5d   : > { %738 = vperm.xlu0 %6349, %v363_v38   ;;  %2255 = vmatpush1.bf16.msra.mxu0 %v6441_v58  ;;  %v385_v38 = vld [vmem:[%s9042_s1] ss:$2 sm:$0xf] }
  0x5e   : > { %2641 = vmatpush1.bf16.msra.mxu1 %v6442_v59  ;;  %2256 = vmatprep.subr.bf16.mxu0 %v6443_v60  ;;  %9090 = vst [vmem:[#allocation7_spill] sm:$0xff] %v7323_v37  ;;  %v7336_v42 = vrot.slane %v5541_v35, %v7323_v37  ;;  %v7339_v43 = vrot.slane %v385_v38, %v7321_v36 }
  0x5f   : > { %2642 = vmatprep.subr.bf16.mxu1 %v6445_v61  ;;  %v7342_v44 = vrot.slane %v385_v38, %v7328_v39  ;;  %v7345_v45 = vrot.slane %v385_v38, %v7323_v37  ;;  %v7369_v60 = vrot.slane %v1102_v51, %v7323_v37 }
  0x60   : > { %6346 = vset.pattern.permute.xlu1 %v6933_v2 }
  0x61   : > { %428 = vperm.xlu1 %6346, %v361_v47   ;;  %754 = vperm.xlu0 %6349, %v367_v48  }
  0x62   : > { %2257 = vmatpush1.bf16.msra.mxu0 %v6447_v0  ;;  %2643 = vmatpush1.bf16.msra.mxu1 %v6448_v3  ;;  %v7373_v3 = vrot.slane %v1102_v51, %v7328_v39 }
  0x63   : > { %2258 = vmatprep.subr.bf16.mxu0 %v6449_v4  ;;  %2644 = vmatprep.subr.bf16.mxu1 %v6451_v5  ;;  %v7376_v4 = vrot.slane %v1102_v51, %v7321_v36  ;;  %v7379_v5 = vrot.slane %v1102_v51, %v7330_v40 }
  0x65   : > { %6347 = vset.pattern.permute.xlu1 %v9054_v1  ;;  %6354 = vset.pattern.permute.xlu0 %v6933_v2 }
  0x66   : > { %730 = vperm.xlu1 %6347, %v361_v47   ;;  %453 = vperm.xlu0 %6354, %v7189_v53   ;;  %v7351_v47 = vrot.slane %v5541_v35, %v7330_v40 }
  0x67   : > { %2259 = vmatpush1.bf16.msra.mxu0 %v6453_v7  ;;  %2645 = vmatpush1.bf16.msra.mxu1 %v6454_v8 }
  0x68   : > { %2260 = vmatprep.subr.bf16.mxu0 %v6455_v9  ;;  %2646 = vmatprep.subr.bf16.mxu1 %v6457_v10 }
  0x6a   : > { %734 = vperm.xlu1 %6347, %v7129_v32   ;;  %458 = vperm.xlu0 %6354, %v367_v48   ;;  %v373_v32 = vld [vmem:[%s7047_s14 + $0xa0] sm:$0xff]  ;;  %v7354_v48 = vrot.slane %v385_v38, %v7330_v40 }
  0x6b   : > { %2261 = vmatpush1.bf16.msra.mxu0 %v6459_v11  ;;  %2647 = vmatpush1.bf16.msra.mxu1 %v6460_v12 }
  0x6c   : > { %2262 = vmatprep.subr.bf16.mxu0 %v6461_v13  ;;  %2648 = vmatprep.subr.bf16.mxu1 %v6463_v15 }
  0x6e   : > { %6348 = vset.pattern.permute.xlu1 %v6933_v2  ;;  %473 = vperm.xlu0 %6354, %v7219_v62  }
  0x6f   : > { %443 = vperm.xlu1 %6348, %v364_v63   ;;  %2263 = vmatpush1.bf16.msra.mxu0 %v6465_v16 }
  0x70   : > { %2649 = vmatpush1.bf16.msra.mxu1 %v6466_v18  ;;  %2264 = vmatprep.subr.bf16.mxu0 %v6467_v19 }
  0x71   : > { %2650 = vmatprep.subr.bf16.mxu1 %v6469_v20 }
  0x72   : > { %478 = vperm.xlu0 %6354, %v371_v6  }
  0x73   : > { %6350 = vset.pattern.permute.xlu1 %v9054_v1  ;;  %2265 = vmatpush1.bf16.msra.mxu0 %v6471_v21  ;;  %v377_v21 = vld [vmem:[%s7047_s14 + $0xc0] sm:$0xff] }
  0x74   : > { %742 = vperm.xlu1 %6350, %v364_v63   ;;  %2651 = vmatpush1.bf16.msra.mxu1 %v6472_v22 }
  0x75   : > { %2427 = vmatprep.subr.bf16.mxu0 %v6475_v24 }
  0x76   : > { %6359 = vset.pattern.permute.xlu0 %v9054_v1 }
  0x77   : > { %770 = vperm.xlu0 %6359, %v371_v6  }
  0x78   : > { %6351 = vset.pattern.permute.xlu1 %v6933_v2 }
  0x79   : > { %448 = vperm.xlu1 %6351, %v365_v14  }
  0x7b   : > { %786 = vperm.xlu0 %6359, %v375_v17  }
  0x7d   : > { %6352 = vset.pattern.permute.xlu1 %v9054_v1 }
  0x7e   : > { %746 = vperm.xlu1 %6352, %v365_v14  }
  0x7f   : > { %6364 = vset.pattern.permute.xlu0 %v6933_v2 }
  0x80   : > { %493 = vperm.xlu0 %6364, %v374_v23  }
  0x82   : > { %750 = vperm.xlu1 %6352, %v7189_v53  }
  0x84   : > { %498 = vperm.xlu0 %6364, %v375_v17  }
  0x86   : > { %6353 = vset.pattern.permute.xlu1 %v6933_v2 }
  0x87   : > { %463 = vperm.xlu1 %6353, %v368_v25  }
  0x88   : > { %513 = vperm.xlu0 %6364, %v7294_v26  }
  0x8b   : > { %6355 = vset.pattern.permute.xlu1 %v9054_v1 }
  0x8c   : > { %758 = vperm.xlu1 %6355, %v368_v25   ;;  %6369 = vset.pattern.permute.xlu0 %v9054_v1 }
  0x8d   : > { %802 = vperm.xlu0 %6369, %v379_v27  }
  0x90   : > { %6356 = vset.pattern.permute.xlu1 %v6933_v2 }
  0x91   : > { %468 = vperm.xlu1 %6356, %v369_v28   ;;  %6370 = vset.pattern.permute.xlu0 %v6933_v2 }
  0x92   : > { %518 = vperm.xlu0 %6370, %v379_v27   ;;  %v6502_v27 = vld [vmem:[%s9044_s3 + $0x20c] ss:$16 sps:$4 sm:$0xff]  }
  0x93   : > { %2813 = vmatprep.subr.bf16.mxu1 %v6502_v27  ;;  %v6478_v27 = vld [vmem:[%s9044_s3 + $0x224] ss:$16 sps:$4 sm:$0xff]  }
  0x95   : > { %6357 = vset.pattern.permute.xlu1 %v9054_v1 }
  0x96   : > { %762 = vperm.xlu1 %6357, %v369_v28   ;;  %533 = vperm.xlu0 %6370, %v7305_v29  }
  0x9a   : > { %766 = vperm.xlu1 %6357, %v7219_v62   ;;  %538 = vperm.xlu0 %6370, %v383_v30  }
  0x9e   : > { %6358 = vset.pattern.permute.xlu1 %v6933_v2  ;;  %6375 = vset.pattern.permute.xlu0 %v9054_v1 }
  0x9f   : > { %483 = vperm.xlu1 %6358, %v372_v31   ;;  %818 = vperm.xlu0 %6375, %v383_v30  }
  0xa3   : > { %6360 = vset.pattern.permute.xlu1 %v9054_v1 }
  0xa4   : > { %774 = vperm.xlu1 %6360, %v372_v31  }
  0xa8   : > { %6361 = vset.pattern.permute.xlu1 %v6933_v2 }
  0xa9   : > { %488 = vperm.xlu1 %6361, %v373_v32  }
  0xad   : > { %6362 = vset.pattern.permute.xlu1 %v9054_v1 }
  0xae   : > { %778 = vperm.xlu1 %6362, %v373_v32  }
  0xb2   : > { %782 = vperm.xlu1 %6362, %v374_v23  }
  0xb5   : > { %v699_v50 = vpop.permute.xlu1 %698  ;;  %v389_v52 = vpop.permute.xlu0 %388 }
  0xb6   : > { %v846_v53 = vmul.f32 %v7333_v41, %v699_v50  ;;  %v848_v54 = vmul.f32 %v7336_v42, %v699_v50  ;;  %v567_v55 = vmul.f32 %v7339_v43, %v389_v52  ;;  %6363 = vset.pattern.permute.xlu1 %v6933_v2  ;;  %v568_v56 = vmul.f32 %v7342_v44, %v389_v52 }
  0xb7   : > { %v569_v57 = vmul.f32 %v7345_v45, %v389_v52  ;;  %503 = vperm.xlu1 %6363, %v376_v49   ;;  %v847_v58 = vmul.f32 %v7348_v46, %v699_v50  ;;  %v849_v59 = vmul.f32 %v7351_v47, %v699_v50  ;;  %v570_v61 = vmul.f32 %v7354_v48, %v389_v52 }
  0xb8   : > { %v974_v62 = vadd.f32 %v846_v53, %v567_v55 }
  0xb9   : > { %v703_v63 = vpop.permute.xlu1 %702  ;;  %v394_v0 = vpop.permute.xlu0 %393  ;;  %v976_v6 = vadd.f32 %v848_v54, %v569_v57  ;;  %v975_v13 = vadd.f32 %v847_v58, %v568_v56  ;;  %v977_v14 = vadd.f32 %v849_v59, %v570_v61 }
  0xba   : > { %v850_v7 = vmul.f32 %v7333_v41, %v703_v63  ;;  %v852_v8 = vmul.f32 %v7336_v42, %v703_v63  ;;  %v571_v9 = vmul.f32 %v7339_v43, %v394_v0  ;;  %v853_v10 = vmul.f32 %v7351_v47, %v703_v63 }
  0xbb   : > { %v573_v11 = vmul.f32 %v7345_v45, %v394_v0  ;;  %v574_v12 = vmul.f32 %v7354_v48, %v394_v0  ;;  %6365 = vset.pattern.permute.xlu1 %v9054_v1  ;;  %v572_v15 = vmul.f32 %v7342_v44, %v394_v0  ;;  %v851_v17 = vmul.f32 %v7348_v46, %v703_v63 }
  0xbc   : > { %v978_v16 = vadd.f32 %v850_v7, %v571_v9  ;;  %790 = vperm.xlu1 %6365, %v376_v49   ;;  %v7394_v22 = vadd.f32 %v7369_v60, %v976_v6  ;;  %v1125_v24 = vadd.f32 %v7373_v3, %v975_v13  ;;  %v1124_v25 = vadd.f32 %v7376_v4, %v974_v62 }
  0xbd   : > { %v399_v18 = vpop.permute.xlu0 %398  ;;  %v980_v19 = vadd.f32 %v852_v8, %v573_v11  ;;  %v981_v23 = vadd.f32 %v853_v10, %v574_v12  ;;  %v979_v30 = vadd.f32 %v851_v17, %v572_v15  ;;  %v7405_v32 = vadd.f32 %v7379_v5, %v977_v14 }
  0xbe   : > { %v7390_v20 = vpop.permute.xlu1 %403  ;;  %v575_v28 = vmul.f32 %v7339_v43, %v399_v18  ;;  %v1128_v31 = vadd.f32 %v7376_v4, %v978_v16  ;;  %v576_v33 = vmul.f32 %v7342_v44, %v399_v18  ;;  %v577_v34 = vmul.f32 %v7345_v45, %v399_v18 }
  0xbf   : > { %9093 = vst [vmem:[#allocation10_spill] sm:$0xff] %v7390_v20  ;;  %v578_v35 = vmul.f32 %v7354_v48, %v399_v18  ;;  %v1130_v38 = vadd.f32 %v7369_v60, %v980_v19  ;;  %v579_v49 = vmul.f32 %v7339_v43, %v7390_v20  ;;  %v1129_v51 = vadd.f32 %v7373_v3, %v979_v30 }
  0xc0   : > { %6366 = vset.pattern.permute.xlu1 %v6933_v2  ;;  %v1256_v52 = vmax.f32 %v1128_v31, 0.0  ;;  %v580_v58 = vmul.f32 %v7342_v44, %v7390_v20  ;;  %v1252_v62 = vmax.f32 %v1124_v25, 0.0  ;;  %v1253_v8 = vmax.f32 %v1125_v24, 0.0 }
  0xc1   : > { %508 = vperm.xlu1 %6366, %v377_v21   ;;  %v1257_v9 = vmax.f32 %v1129_v51, 0.0  ;;  %v1258_v13 = vmax.f32 %v1130_v38, 0.0  ;;  %v1131_v15 = vadd.f32 %v7379_v5, %v981_v23  ;;  %v1254_v24 = vmax.f32 %v7394_v22, 0.0  ;;  %v6500_v23 = vld [vmem:[%s9044_s3 + $0x208] ss:$16 sps:$4 sm:$0xff]  }
  0xc2   : > { %v707_v50 = vpop.permute.xlu0 %706  ;;  %v1380_v14 = vpack.c.bf16 %v1256_v52, %v1252_v62  ;;  %v6505_v38 = vld [vmem:[%s9044_s3 + $0x22c] ss:$16 sps:$4 sm:$0xff]  }
  0xc3   : > { %v7414_v53 = vpop.permute.xlu1 %710  ;;  %v854_v54 = vmul.f32 %v7333_v41, %v707_v50  ;;  %v855_v55 = vmul.f32 %v7348_v46, %v707_v50  ;;  %v856_v56 = vmul.f32 %v7336_v42, %v707_v50  ;;  %v857_v57 = vmul.f32 %v7351_v47, %v707_v50 }
  0xc4   : > { %9094 = vst [vmem:[#allocation11_spill] sm:$0xff] %v7414_v53  ;;  %v858_v59 = vmul.f32 %v7333_v41, %v7414_v53  ;;  %v859_v61 = vmul.f32 %v7348_v46, %v7414_v53  ;;  %v1381_v16 = vpack.c.bf16 %v1257_v9, %v1253_v8  ;;  %v7453_v50 = vpack.c.bf16 %v1258_v13, %v1254_v24  ;;  %v6481_v8 = vld [vmem:[%s9044_s3 + $0x244] ss:$16 sps:$4 sm:$0xff]  }
  0xc5   : > { %v982_v63 = vadd.f32 %v854_v54, %v575_v28  ;;  %v983_v0 = vadd.f32 %v855_v55, %v576_v33  ;;  %v7426_v6 = vadd.f32 %v856_v56, %v577_v34  ;;  %v7428_v7 = vadd.f32 %v857_v57, %v578_v35  ;;  %6367 = vset.pattern.permute.xlu1 %v9054_v1 }
  0xc6   : > { %794 = vperm.xlu1 %6367, %v377_v21   ;;  %v723_v10 = vpop.permute.xlu0 %722  ;;  %v987_v11 = vadd.f32 %v859_v61, %v580_v58  ;;  %v986_v12 = vadd.f32 %v858_v59, %v579_v49  ;;  %v6473_v21 = vld [vmem:[%s9044_s3 + $0x200] ss:$16 sps:$4 sm:$0xff]   ;;  %2266 = vmatprep.mubr.bf16.mxu0 %v1381_v16  ;;  %v1255_v33 = vmax.f32 %v7405_v32, 0.0  ;;  %v1259_v49 = vmax.f32 %v1131_v15, 0.0  ;;  %9098 = vst [vmem:[#allocation15_spill] sm:$0xff] %v7453_v50 }
  0xc7   : > { %9095 = vst [vmem:[#allocation12_spill] sm:$0xff] %v7426_v6  ;;  %9096 = vst [vmem:[#allocation13_spill] sm:$0xff] %v7428_v7  ;;  %v1133_v18 = vadd.f32 %v7373_v3, %v983_v0  ;;  %v1132_v25 = vadd.f32 %v7376_v4, %v982_v63  ;;  %2652 = vmatprep.mubr.bf16.mxu1 %v1381_v16  ;;  %2267 = vmatmul.mubr.bf16.vlgmr.msra.gmra.mrb[0].mxu0 %v1380_v14  ;;  %v6476_v58 = vld [vmem:[%s9044_s3 + $0x220] ss:$16 sps:$4 sm:$0xff]   ;;  %v380_v63 = vld [vmem:[%s7047_s14 + $0xd8] sm:$0xff] }
  0xc8   : > { %v7432_v17 = vpop.permute.xlu1 %408  ;;  %v1137_v19 = vadd.f32 %v7373_v3, %v987_v11  ;;  %v1136_v31 = vadd.f32 %v7376_v4, %v986_v12  ;;  %2653 = vmatmul.mubr.bf16.vlgmr.msra.gmra.mrb[0].mxu1 %v1380_v14  ;;  %v870_v22 = vmul.f32 %v7333_v41, %v723_v10  ;;  %v871_v51 = vmul.f32 %v7348_v46, %v723_v10 }
  0xc9   : > { %9097 = vst [vmem:[#allocation14_spill] sm:$0xff] %v7432_v17  ;;  %v1261_v28 = vmax.f32 %v1133_v18, 0.0  ;;  %v1260_v34 = vmax.f32 %v1132_v25, 0.0  ;;  %v872_v32 = vmul.f32 %v7336_v42, %v723_v10  ;;  %2428 = vmatpush1.bf16.msra.mxu0 %v6473_v21  ;;  %v583_v55 = vmul.f32 %v7339_v43, %v7432_v17  ;;  %2814 = vmatpush1.bf16.msra.mxu1 %v6500_v23  ;;  %v6503_v18 = vld [vmem:[%s9044_s3 + $0x228] ss:$16 sps:$4 sm:$0xff]  }
  0xca   : > { %v1265_v30 = vmax.f32 %v1137_v19, 0.0  ;;  %798 = vperm.xlu1 %6367, %v7294_v26   ;;  %v1264_v54 = vmax.f32 %v1136_v31, 0.0  ;;  %v873_v57 = vmul.f32 %v7351_v47, %v723_v10  ;;  %2429 = vmatprep.subr.bf16.mxu0 %v6478_v27  ;;  %v7466_v26 = vpack.c.bf16 %v1259_v49, %v1255_v33 }
  0xcb   : > { %v414_v35 = vpop.permute.xlu0 %413  ;;  %v584_v59 = vmul.f32 %v7342_v44, %v7432_v17  ;;  %2815 = vmatprep.subr.bf16.mxu1 %v6505_v38 }
  0xcc   : > { %v1385_v52 = vpack.c.bf16 %v1265_v30, %v1261_v28  ;;  %9100 = vst [vmem:[#allocation17_spill] sm:$0xff] %v7466_v26  ;;  %v587_v0 = vmul.f32 %v7339_v43, %v414_v35  ;;  %v1384_v9 = vpack.c.bf16 %v1264_v54, %v1260_v34  ;;  %v588_v10 = vmul.f32 %v7342_v44, %v414_v35 }
  0xcd   : > { %v7460_v56 = vpop.permute.xlu1 %714  ;;  %v589_v11 = vmul.f32 %v7345_v45, %v414_v35  ;;  %v590_v13 = vmul.f32 %v7354_v48, %v414_v35  ;;  %2430 = vmatpush1.bf16.msra.mxu0 %v6476_v58  ;;  %v6479_v35 = vld [vmem:[%s9044_s3 + $0x240] ss:$16 sps:$4 sm:$0xff]   ;;  %2816 = vmatpush1.bf16.msra.mxu1 %v6503_v18 }
  0xce   : > { %9099 = vst [vmem:[#allocation16_spill] sm:$0xff] %v7460_v56  ;;  %v862_v61 = vmul.f32 %v7333_v41, %v7460_v56  ;;  %v863_v62 = vmul.f32 %v7348_v46, %v7460_v56  ;;  %2276 = vmatprep.mubr.bf16.mxu0 %v1385_v52  ;;  %2662 = vmatprep.mubr.bf16.mxu1 %v1385_v52 }
  0xcf   : > { %v419_v12 = vpop.permute.xlu0 %418  ;;  %6368 = vset.pattern.permute.xlu1 %v6933_v2  ;;  %2431 = vmatprep.subr.bf16.mxu0 %v6481_v8 }
  0xd0   : > { %v591_v14 = vmul.f32 %v7339_v43, %v419_v12  ;;  %v592_v15 = vmul.f32 %v7342_v44, %v419_v12  ;;  %v593_v16 = vmul.f32 %v7345_v45, %v419_v12  ;;  %523 = vperm.xlu1 %6368, %v380_v63   ;;  %v594_v25 = vmul.f32 %v7354_v48, %v419_v12 }
  0xd1   : > { %v719_v19 = vpop.permute.xlu1 %718  ;;  %v991_v21 = vadd.f32 %v863_v62, %v584_v59  ;;  %v990_v24 = vadd.f32 %v862_v61, %v583_v55  ;;  %2277 = vmatmul.mubr.bf16.gmra.mrb[4].mxu0 %v1384_v9  ;;  %2663 = vmatmul.mubr.bf16.gmra.mrb[4].mxu1 %v1384_v9  ;;  %v6484_v55 = vld [vmem:[%s9044_s3 + $0x264] ss:$16 sps:$4 sm:$0xff]   ;;  %v6509_v62 = vld [vmem:[%s9044_s3 + $0x248] ss:$16 sps:$4 sm:$0xff]  }
  0xd2   : > { %v866_v27 = vmul.f32 %v7333_v41, %v719_v19  ;;  %v867_v23 = vmul.f32 %v7348_v46, %v719_v19  ;;  %v868_v28 = vmul.f32 %v7336_v42, %v719_v19  ;;  %v869_v30 = vmul.f32 %v7351_v47, %v719_v19  ;;  %2432 = vmatpush1.bf16.msra.mxu0 %v6479_v35 }
  0xd3   : > { %v998_v31 = vadd.f32 %v870_v22, %v591_v14  ;;  %v7494_v33 = vadd.f32 %v872_v32, %v593_v16  ;;  %v7496_v34 = vpop.permute.xlu0 %433  ;;  %v6511_v22 = vld [vmem:[%s9044_s3 + $0x24c] ss:$16 sps:$4 sm:$0xff]   ;;  %v999_v32 = vadd.f32 %v871_v51, %v592_v15  ;;  %v7512_v58 = vadd.f32 %v873_v57, %v594_v25  ;;  %v6482_v51 = vld [vmem:[%s9044_s3 + $0x260] ss:$16 sps:$4 sm:$0xff]   ;;  %2433 = vmatprep.subr.bf16.mxu0 %v6484_v55 }
  0xd4   : > { %v994_v38 = vadd.f32 %v866_v27, %v587_v0  ;;  %v995_v49 = vadd.f32 %v867_v23, %v588_v10  ;;  %v7501_v52 = vadd.f32 %v868_v28, %v589_v11  ;;  %v7503_v54 = vadd.f32 %v869_v30, %v590_v13  ;;  %6371 = vset.pattern.permute.xlu1 %v9054_v1  ;;  %v381_v57 = vld [vmem:[%s7047_s14 + $0xe0] sm:$0xff] }
  0xd5   : > { %v1141_v59 = vadd.f32 %v7373_v3, %v991_v21  ;;  %v1140_v61 = vadd.f32 %v7376_v4, %v990_v24  ;;  %806 = vperm.xlu1 %6371, %v380_v63   ;;  %2817 = vmatprep.subr.bf16.mxu1 %v6511_v22  ;;  %v1149_v63 = vadd.f32 %v7373_v3, %v999_v32  ;;  %v6485_v32 = vld [vmem:[%s9044_s3 + $0x280] ss:$16 sps:$4 sm:$0xff]  }
  0xd6   : > { %9101 = vst [vmem:[#allocation18_spill] sm:$0xff] %v7501_v52  ;;  %9102 = vst [vmem:[#allocation19_spill] sm:$0xff] %v7503_v54  ;;  %v424_v0 = vpop.permute.xlu1 %423  ;;  %v1145_v8 = vadd.f32 %v7373_v3, %v995_v49  ;;  %v1144_v9 = vadd.f32 %v7376_v4, %v994_v38  ;;  %v1148_v15 = vadd.f32 %v7376_v4, %v998_v31  ;;  %2818 = vmatpush1.bf16.msra.mxu1 %v6509_v62  ;;  %v6487_v49 = vld [vmem:[%s9044_s3 + $0x284] ss:$16 sps:$4 sm:$0xff]  }
  0xd7   : > { %v7521_v10 = vpop.permute.xlu0 %438  ;;  %v1269_v11 = vmax.f32 %v1141_v59, 0.0  ;;  %v1268_v13 = vmax.f32 %v1140_v61, 0.0  ;;  %v595_v16 = vmul.f32 %v7339_v43, %v424_v0  ;;  %v596_v18 = vmul.f32 %v7342_v44, %v424_v0  ;;  %2434 = vmatpush1.bf16.msra.mxu0 %v6482_v51 }
  0xd8   : > { %v1273_v12 = vmax.f32 %v1145_v8, 0.0  ;;  %v1272_v14 = vmax.f32 %v1144_v9, 0.0  ;;  %v597_v21 = vmul.f32 %v7345_v45, %v424_v0  ;;  %v598_v24 = vmul.f32 %v7354_v48, %v424_v0  ;;  %v6490_v8 = vld [vmem:[%s9044_s3 + $0x2a4] ss:$16 sps:$4 sm:$0xff]   ;;  %v6514_v9 = vld [vmem:[%s9044_s3 + $0x26c] ss:$16 sps:$4 sm:$0xff]   ;;  %2435 = vmatprep.subr.bf16.mxu0 %v6487_v49 }
  0xd9   : > { %6372 = vset.pattern.permute.xlu1 %v6933_v2  ;;  %v609_v23 = vmul.f32 %v7345_v45, %v7521_v10  ;;  %v610_v55 = vmul.f32 %v7354_v48, %v7521_v10  ;;  %2819 = vmatprep.subr.bf16.mxu1 %v6514_v9  ;;  %v384_v9 = vld [vmem:[%s7047_s14 + $0xf8] sm:$0xff] }
  0xda   : > { %v1389_v19 = vpack.c.bf16 %v1273_v12, %v1269_v11  ;;  %v1388_v25 = vpack.c.bf16 %v1272_v14, %v1268_v13  ;;  %528 = vperm.xlu1 %6372, %v381_v57   ;;  %v6512_v12 = vld [vmem:[%s9044_s3 + $0x268] ss:$16 sps:$4 sm:$0xff]  }
  0xdb   : > { %v727_v27 = vpop.permute.xlu1 %726  ;;  %2436 = vmatpush1.bf16.msra.mxu0 %v6485_v32  ;;  %2820 = vmatpush1.bf16.msra.mxu1 %v6512_v12  ;;  %v605_v12 = vmul.f32 %v7345_v45, %v7496_v34 }
  0xdc   : > { %v874_v28 = vmul.f32 %v7333_v41, %v727_v27  ;;  %v875_v30 = vmul.f32 %v7348_v46, %v727_v27  ;;  %v876_v31 = vmul.f32 %v7336_v42, %v727_v27  ;;  %v877_v35 = vmul.f32 %v7351_v47, %v727_v27  ;;  %2286 = vmatprep.mubr.bf16.mxu0 %v1389_v19  ;;  %v7540_v38 = vpop.permute.xlu0 %738 }
  0xdd   : > { %2672 = vmatprep.mubr.bf16.mxu1 %v1389_v19  ;;  %2287 = vmatmul.mubr.bf16.gmra.mrb[8].mxu0 %v1388_v25  ;;  %v888_v22 = vmul.f32 %v7336_v42, %v7540_v38  ;;  %v889_v51 = vmul.f32 %v7351_v47, %v7540_v38  ;;  %v1276_v19 = vmax.f32 %v1148_v15, 0.0 }
  0xde   : > { %v1002_v59 = vadd.f32 %v874_v28, %v595_v16  ;;  %v1003_v61 = vadd.f32 %v875_v30, %v596_v18  ;;  %v7552_v62 = vadd.f32 %v876_v31, %v597_v21  ;;  %v7554_v0 = vadd.f32 %v877_v35, %v598_v24  ;;  %2673 = vmatmul.mubr.bf16.gmra.mrb[8].mxu1 %v1388_v25  ;;  %v6520_v21 = vld [vmem:[%s9044_s3 + $0x28c] ss:$16 sps:$4 sm:$0xff]   ;;  %v6488_v24 = vld [vmem:[%s9044_s3 + $0x2a0] ss:$16 sps:$4 sm:$0xff]  }
  0xdf   : > { %6373 = vset.pattern.permute.xlu1 %v9054_v1  ;;  %v7565_v11 = vadd.f32 %v888_v22, %v609_v23  ;;  %v1277_v16 = vmax.f32 %v1149_v63, 0.0  ;;  %v7580_v23 = vadd.f32 %v889_v51, %v610_v55  ;;  %2437 = vmatprep.subr.bf16.mxu0 %v6490_v8  ;;  %v603_v63 = vmul.f32 %v7339_v43, %v7496_v34  ;;  %v6493_v51 = vld [vmem:[%s9044_s3 + $0x2c4] ss:$16 sps:$4 sm:$0xff]  }
  0xe0   : > { %810 = vperm.xlu1 %6373, %v381_v57   ;;  %v429_v13 = vpop.permute.xlu1 %428  ;;  %v1153_v14 = vadd.f32 %v7373_v3, %v1003_v61  ;;  %v1152_v18 = vadd.f32 %v7376_v4, %v1002_v59  ;;  %v7572_v25 = vpop.permute.xlu0 %754  ;;  %v604_v30 = vmul.f32 %v7342_v44, %v7496_v34  ;;  %2821 = vmatprep.subr.bf16.mxu1 %v6520_v21 }
  0xe1   : > { %v599_v31 = vmul.f32 %v7339_v43, %v429_v13  ;;  %v600_v35 = vmul.f32 %v7342_v44, %v429_v13  ;;  %v601_v49 = vmul.f32 %v7345_v45, %v429_v13  ;;  %v602_v55 = vmul.f32 %v7354_v48, %v429_v13  ;;  %2438 = vmatpush1.bf16.msra.mxu0 %v6488_v24 }
  0xe2   : > { %v1281_v57 = vmax.f32 %v1153_v14, 0.0  ;;  %v1280_v27 = vmax.f32 %v1152_v18, 0.0  ;;  %v606_v13 = vmul.f32 %v7354_v48, %v7496_v34  ;;  %v607_v14 = vmul.f32 %v7339_v43, %v7521_v10  ;;  %2439 = vmatprep.subr.bf16.mxu0 %v6493_v51 }
  0xe4   : > { %814 = vperm.xlu1 %6373, %v7305_v29   ;;  %v1393_v15 = vpack.c.bf16 %v1281_v57, %v1277_v16  ;;  %v1392_v28 = vpack.c.bf16 %v1280_v27, %v1276_v19  ;;  %v6491_v16 = vld [vmem:[%s9044_s3 + $0x2c0] ss:$16 sps:$4 sm:$0xff]   ;;  %v6496_v57 = vld [vmem:[%s9044_s3 + $0x2e4] ss:$16 sps:$4 sm:$0xff]   ;;  %v608_v27 = vmul.f32 %v7342_v44, %v7521_v10 }
  0xe5   : > { %v731_v22 = vpop.permute.xlu1 %730  ;;  %v7591_v32 = vpop.permute.xlu0 %453  ;;  %2440 = vmatpush1.bf16.msra.mxu0 %v6491_v16  ;;  %v9103_v16 = vmov 1  }
  0xe6   : > { %v878_v29 = vmul.f32 %v7333_v41, %v731_v22  ;;  %v879_v59 = vmul.f32 %v7348_v46, %v731_v22  ;;  %v880_v61 = vmul.f32 %v7336_v42, %v731_v22  ;;  %v881_v8 = vmul.f32 %v7351_v47, %v731_v22  ;;  %2296 = vmatprep.mubr.bf16.mxu0 %v1393_v15 }
  0xe7   : > { %2682 = vmatprep.mubr.bf16.mxu1 %v1393_v15  ;;  %2297 = vmatmul.mubr.bf16.gmra.mrb[12].mxu0 %v1392_v28  ;;  %v886_v15 = vmul.f32 %v7333_v41, %v7540_v38 }
  0xe8   : > { %v1006_v18 = vadd.f32 %v878_v29, %v599_v31  ;;  %v1007_v19 = vadd.f32 %v879_v59, %v600_v35  ;;  %v7610_v21 = vadd.f32 %v880_v61, %v601_v49  ;;  %v7612_v24 = vadd.f32 %v881_v8, %v602_v55  ;;  %6374 = vset.pattern.permute.xlu1 %v6933_v2  ;;  %v6518_v2 = vld [vmem:[%s9044_s3 + $0x288] ss:$16 sps:$4 sm:$0xff]   ;;  %v6494_v61 = vld [vmem:[%s9044_s3 + $0x2e0] ss:$16 sps:$4 sm:$0xff]  }
  0xe9   : > { %543 = vperm.xlu1 %6374, %v384_v9   ;;  %2683 = vmatmul.mubr.bf16.gmra.mrb[12].mxu1 %v1392_v28  ;;  %v735_v34 = vpop.permute.xlu1 %734  ;;  %v887_v31 = vmul.f32 %v7348_v46, %v7540_v38  ;;  %v7624_v35 = vpop.permute.xlu0 %458  ;;  %v904_v38 = vmul.f32 %v7336_v42, %v7572_v25  ;;  %v905_v59 = vmul.f32 %v7351_v47, %v7572_v25 }
  0xea   : > { %v882_v49 = vmul.f32 %v7333_v41, %v735_v34  ;;  %v883_v28 = vmul.f32 %v7348_v46, %v735_v34  ;;  %v884_v55 = vmul.f32 %v7336_v42, %v735_v34  ;;  %v885_v10 = vmul.f32 %v7351_v47, %v735_v34  ;;  %2441 = vmatprep.subr.bf16.mxu0 %v6496_v57 }
  0xeb   : > { %v1157_v22 = vadd.f32 %v7373_v3, %v1007_v19  ;;  %v1156_v29 = vadd.f32 %v7376_v4, %v1006_v18  ;;  %v6499_v18 = vld [vmem:[%s9044_s3 + $0x304] ss:$16 sps:$4 sm:$0xff]   ;;  %v6523_v19 = vld [vmem:[%s9044_s3 + $0x2ac] ss:$16 sps:$4 sm:$0xff]   ;;  %v625_v34 = vmul.f32 %v7345_v45, %v7624_v35  ;;  %2822 = vmatpush1.bf16.msra.mxu1 %v6518_v2  ;;  %v1014_v57 = vadd.f32 %v886_v15, %v607_v14  ;;  %v6497_v2 = vld [vmem:[%s9044_s3 + $0x300] ss:$16 sps:$4 sm:$0xff]  }
  0xec   : > { %v1010_v8 = vadd.f32 %v882_v49, %v603_v63  ;;  %v1011_v1 = vadd.f32 %v883_v28, %v604_v30  ;;  %v7642_v40 = vadd.f32 %v884_v55, %v605_v12  ;;  %v7644_v51 = vadd.f32 %v885_v10, %v606_v13  ;;  %v6521_v12 = vld [vmem:[%s9044_s3 + $0x2a8] ss:$16 sps:$4 sm:$0xff]   ;;  %v6529_v10 = vld [vmem:[%s9044_s3 + $0x2cc] ss:$16 sps:$4 sm:$0xff]   ;;  %2442 = vmatpush1.bf16.msra.mxu0 %v6494_v61 }
  0xed   : > { %6376 = vset.pattern.permute.xlu1 %v9103_v16  ;;  %v626_v63 = vmul.f32 %v7354_v48, %v7624_v35  ;;  %v7657_v30 = vpop.permute.xlu0 %473  ;;  %v1015_v49 = vadd.f32 %v887_v31, %v608_v27  ;;  %v1285_v16 = vmax.f32 %v1157_v22, 0.0  ;;  %v1284_v39 = vmax.f32 %v1156_v29, 0.0  ;;  %2443 = vmatprep.subr.bf16.mxu0 %v6499_v18 }
  0xee   : > { %822 = vperm.xlu1 %6376, %v384_v9   ;;  %v444_v13 = vpop.permute.xlu1 %443  ;;  %v1161_v28 = vadd.f32 %v7373_v3, %v1011_v1  ;;  %v1160_v55 = vadd.f32 %v7376_v4, %v1010_v8  ;;  %v7670_v36 = vadd.f32 %v904_v38, %v625_v34  ;;  %2823 = vmatprep.subr.bf16.mxu1 %v6523_v19 }
  0xef   : > { %v7672_v14 = vadd.f32 %v905_v59, %v626_v63  ;;  %2824 = vmatpush1.bf16.msra.mxu1 %v6521_v12  ;;  %v1165_v31 = vadd.f32 %v7373_v3, %v1015_v49  ;;  %v1164_v22 = vadd.f32 %v7376_v4, %v1014_v57  ;;  %v611_v29 = vmul.f32 %v7339_v43, %v444_v13  ;;  %v6506_v63 = vld [vmem:[%s9044_s3 + $0x320] ss:$16 sps:$4 sm:$0xff]   ;;  %v6527_v12 = vld [vmem:[%s9044_s3 + $0x2c8] ss:$16 sps:$4 sm:$0xff]  }
  0xf0   : > { %v1289_v37 = vmax.f32 %v1161_v28, 0.0  ;;  %v1288_v9 = vmax.f32 %v1160_v55, 0.0  ;;  %9104 = vst [vmem:[#allocation20_spill] sm:$0xff] %v7670_v36  ;;  %2825 = vmatprep.subr.bf16.mxu1 %v6529_v10  ;;  %v612_v61 = vmul.f32 %v7342_v44, %v444_v13  ;;  %v613_v38 = vmul.f32 %v7345_v45, %v444_v13  ;;  %2444 = vmatpush1.bf16.msra.mxu0 %v6497_v2 }
  0xf1   : > { %9105 = vst [vmem:[#allocation21_spill] sm:$0xff] %v7672_v14  ;;  %v7674_v1 = vpop.permute.xlu0 %478  ;;  %v614_v59 = vmul.f32 %v7354_v48, %v444_v13  ;;  %v6517_v13 = vld [vmem:[%s9044_s3 + $0x344] ss:$16 sps:$4 sm:$0xff]  }
  0xf2   : > { %v1397_v27 = vpack.c.bf16 %v1289_v37, %v1285_v16  ;;  %v1396_v15 = vpack.c.bf16 %v1288_v9, %v1284_v39  ;;  %v6508_v37 = vld [vmem:[%s9044_s3 + $0x324] ss:$16 sps:$4 sm:$0xff]   ;;  %v6532_v16 = vld [vmem:[%s9044_s3 + $0x2ec] ss:$16 sps:$4 sm:$0xff]   ;;  %v641_v2 = vmul.f32 %v7345_v45, %v7674_v1  ;;  %v642_v9 = vmul.f32 %v7354_v48, %v7674_v1 }
  0xf3   : > { %v743_v8 = vpop.permute.xlu1 %742  ;;  %2445 = vmatprep.subr.bf16.mxu0 %v6508_v37  ;;  %2826 = vmatpush1.bf16.msra.mxu1 %v6527_v12  ;;  %v6530_v37 = vld [vmem:[%s9044_s3 + $0x2e8] ss:$16 sps:$4 sm:$0xff]   ;;  %v619_v12 = vmul.f32 %v7339_v43, %v7591_v32  ;;  %v639_v14 = vmul.f32 %v7339_v43, %v7674_v1 }
  0xf4   : > { %v890_v39 = vmul.f32 %v7333_v41, %v743_v8  ;;  %v891_v18 = vmul.f32 %v7348_v46, %v743_v8  ;;  %v892_v19 = vmul.f32 %v7336_v42, %v743_v8  ;;  %v893_v34 = vmul.f32 %v7351_v47, %v743_v8  ;;  %2306 = vmatprep.mubr.bf16.mxu0 %v1397_v27 }
  0xf5   : > { %2692 = vmatprep.mubr.bf16.mxu1 %v1397_v27  ;;  %2307 = vmatmul.mubr.bf16.gmra.mrb[16].mxu0 %v1396_v15  ;;  %v1292_v8 = vmax.f32 %v1164_v22, 0.0  ;;  %v903_v22 = vmul.f32 %v7348_v46, %v7572_v25 }
  0xf6   : > { %v1018_v57 = vadd.f32 %v890_v39, %v611_v29  ;;  %v1019_v49 = vadd.f32 %v891_v18, %v612_v61  ;;  %v7698_v28 = vadd.f32 %v892_v19, %v613_v38  ;;  %v7700_v55 = vadd.f32 %v893_v34, %v614_v59  ;;  %2693 = vmatmul.mubr.bf16.gmra.mrb[16].mxu1 %v1396_v15  ;;  %v7702_v10 = vpop.permute.xlu0 %770  ;;  %v6515_v39 = vld [vmem:[%s9044_s3 + $0x340] ss:$16 sps:$4 sm:$0xff]   ;;  %v6526_v18 = vld [vmem:[%s9044_s3 + $0x364] ss:$16 sps:$4 sm:$0xff]  }
  0xf7   : > { %v920_v27 = vmul.f32 %v7336_v42, %v7702_v10  ;;  %v921_v29 = vmul.f32 %v7351_v47, %v7702_v10  ;;  %v1293_v38 = vmax.f32 %v1165_v31, 0.0  ;;  %2446 = vmatpush1.bf16.msra.mxu0 %v6506_v63  ;;  %v902_v31 = vmul.f32 %v7333_v41, %v7572_v25  ;;  %2827 = vmatprep.subr.bf16.mxu1 %v6532_v16 }
  0xf8   : > { %v449_v15 = vpop.permute.xlu1 %448  ;;  %v1169_v61 = vadd.f32 %v7373_v3, %v1019_v49  ;;  %v1168_v59 = vadd.f32 %v7376_v4, %v1018_v57  ;;  %2447 = vmatprep.subr.bf16.mxu0 %v6517_v13  ;;  %v620_v13 = vmul.f32 %v7342_v44, %v7591_v32  ;;  %v621_v25 = vmul.f32 %v7345_v45, %v7591_v32 }
  0xf9   : > { %v7736_v57 = vadd.f32 %v920_v27, %v641_v2  ;;  %v7738_v49 = vadd.f32 %v921_v29, %v642_v9  ;;  %v615_v52 = vmul.f32 %v7339_v43, %v449_v15  ;;  %v616_v16 = vmul.f32 %v7342_v44, %v449_v15  ;;  %v6524_v2 = vld [vmem:[%s9044_s3 + $0x360] ss:$16 sps:$4 sm:$0xff]   ;;  %2828 = vmatpush1.bf16.msra.mxu1 %v6530_v37 }
  0xfa   : > { %v1297_v19 = vmax.f32 %v1169_v61, 0.0  ;;  %v1296_v34 = vmax.f32 %v1168_v59, 0.0  ;;  %v7730_v63 = vpop.permute.xlu0 %786  ;;  %v617_v61 = vmul.f32 %v7345_v45, %v449_v15  ;;  %v618_v59 = vmul.f32 %v7354_v48, %v449_v15  ;;  %v6535_v15 = vld [vmem:[%s9044_s3 + $0x384] ss:$16 sps:$4 sm:$0xff]  }
  0xfb   : > { %9106 = vst [vmem:[#allocation22_spill] sm:$0xff] %v7736_v57  ;;  %9107 = vst [vmem:[#allocation23_spill] sm:$0xff] %v7738_v49  ;;  %2448 = vmatpush1.bf16.msra.mxu0 %v6515_v39  ;;  %v623_v39 = vmul.f32 %v7339_v43, %v7624_v35 }
  0xfc   : > { %v1401_v50 = vpack.c.bf16 %v1297_v19, %v1293_v38  ;;  %v1400_v54 = vpack.c.bf16 %v1296_v34, %v1292_v8  ;;  %2449 = vmatprep.subr.bf16.mxu0 %v6526_v18  ;;  %v622_v8 = vmul.f32 %v7354_v48, %v7591_v32  ;;  %v624_v18 = vmul.f32 %v7342_v44, %v7624_v35  ;;  %v6536_v32 = vld [vmem:[%s9044_s3 + $0x308] ss:$16 sps:$4 sm:$0xff]   ;;  %v6533_v35 = vld [vmem:[%s9044_s3 + $0x380] ss:$16 sps:$4 sm:$0xff]  }
  0xfd   : > { %v747_v6 = vpop.permute.xlu1 %746 }
  0xfe   : > { %v894_v9 = vmul.f32 %v7333_v41, %v747_v6  ;;  %v895_v27 = vmul.f32 %v7348_v46, %v747_v6  ;;  %v896_v29 = vmul.f32 %v7336_v42, %v747_v6  ;;  %v897_v38 = vmul.f32 %v7351_v47, %v747_v6  ;;  %2316 = vmatprep.mubr.bf16.mxu0 %v1401_v50  ;;  %v6538_v6 = vld [vmem:[%s9044_s3 + $0x30c] ss:$16 sps:$4 sm:$0xff]  }
  0xff   : > { %2702 = vmatprep.mubr.bf16.mxu1 %v1401_v50  ;;  %2317 = vmatmul.mubr.bf16.gmra.mrb[20].mxu0 %v1400_v54  ;;  %v7762_v37 = vpop.permute.xlu0 %493 }
 0x100   : > { %v1022_v19 = vadd.f32 %v894_v9, %v615_v52  ;;  %v1023_v34 = vadd.f32 %v895_v27, %v616_v16  ;;  %v7767_v17 = vadd.f32 %v896_v29, %v617_v61  ;;  %v7769_v50 = vadd.f32 %v897_v38, %v618_v59  ;;  %2703 = vmatmul.mubr.bf16.gmra.mrb[20].mxu1 %v1400_v54  ;;  %v6541_v52 = vld [vmem:[%s9044_s3 + $0x32c] ss:$16 sps:$4 sm:$0xff]  }
 0x101   : > { %v751_v26 = vpop.permute.xlu1 %750  ;;  %2450 = vmatpush1.bf16.msra.mxu0 %v6524_v2  ;;  %v6544_v2 = vld [vmem:[%s9044_s3 + $0x3a4] ss:$16 sps:$4 sm:$0xff]   ;;  %v1030_v9 = vadd.f32 %v902_v31, %v623_v39  ;;  %v1031_v27 = vadd.f32 %v903_v22, %v624_v18  ;;  %2829 = vmatprep.subr.bf16.mxu1 %v6538_v6  ;;  %v936_v31 = vmul.f32 %v7336_v42, %v7730_v63  ;;  %v6547_v18 = vld [vmem:[%s9044_s3 + $0x34c] ss:$16 sps:$4 sm:$0xff]  }
 0x102   : > { %v898_v16 = vmul.f32 %v7333_v41, %v751_v26  ;;  %v899_v61 = vmul.f32 %v7348_v46, %v751_v26  ;;  %v900_v54 = vmul.f32 %v7336_v42, %v751_v26  ;;  %v901_v59 = vmul.f32 %v7351_v47, %v751_v26  ;;  %2451 = vmatprep.subr.bf16.mxu0 %v6535_v15  ;;  %v6539_v26 = vld [vmem:[%s9044_s3 + $0x328] ss:$16 sps:$4 sm:$0xff]  }
 0x103   : > { %v1173_v29 = vadd.f32 %v7373_v3, %v1023_v34  ;;  %v1172_v38 = vadd.f32 %v7376_v4, %v1022_v19  ;;  %v7789_v56 = vpop.permute.xlu0 %498  ;;  %2830 = vmatpush1.bf16.msra.mxu1 %v6536_v32  ;;  %v937_v22 = vmul.f32 %v7351_v47, %v7730_v63  ;;  %v7815_v6 = vadd.f32 %v7373_v3, %v1031_v27 }
 0x104   : > { %v1026_v7 = vadd.f32 %v898_v16, %v619_v12  ;;  %v1027_v53 = vadd.f32 %v899_v61, %v620_v13  ;;  %v7791_v20 = vadd.f32 %v900_v54, %v621_v25  ;;  %v7793_v57 = vadd.f32 %v901_v59, %v622_v8  ;;  %2831 = vmatprep.subr.bf16.mxu1 %v6541_v52  ;;  %v6542_v12 = vld [vmem:[%s9044_s3 + $0x3a0] ss:$16 sps:$4 sm:$0xff]  }
 0x105   : > { %2452 = vmatpush1.bf16.msra.mxu0 %v6533_v35  ;;  %v657_v8 = vmul.f32 %v7345_v45, %v7789_v56  ;;  %v658_v39 = vmul.f32 %v7354_v48, %v7789_v56  ;;  %v7818_v19 = vadd.f32 %v7376_v4, %v1030_v9  ;;  %v1300_v32 = vmax.f32 %v1172_v38, 0.0 }
 0x106   : > { %9108 = vst [vmem:[#allocation24_spill] sm:$0xff] %v7791_v20  ;;  %v464_v13 = vpop.permute.xlu1 %463  ;;  %v1177_v25 = vadd.f32 %v7373_v3, %v1027_v53  ;;  %v1176_v15 = vadd.f32 %v7376_v4, %v1026_v7  ;;  %2453 = vmatprep.subr.bf16.mxu0 %v6544_v2  ;;  %v6553_v53 = vld [vmem:[%s9044_s3 + $0x3c4] ss:$16 sps:$4 sm:$0xff]   ;;  %v1301_v7 = vmax.f32 %v1173_v29, 0.0  ;;  %v7827_v16 = vmul.f32 %v7339_v43, %v7657_v30 }
 0x107   : > { %v7823_v52 = vpop.permute.xlu0 %513  ;;  %2832 = vmatpush1.bf16.msra.mxu1 %v6539_v26  ;;  %v7831_v61 = vmul.f32 %v7342_v44, %v7657_v30  ;;  %v7833_v54 = vadd.f32 %v936_v31, %v657_v8  ;;  %v7835_v59 = vadd.f32 %v937_v22, %v658_v39  ;;  %v640_v27 = vmul.f32 %v7342_v44, %v7674_v1 }
 0x108   : > { %v1305_v34 = vmax.f32 %v1177_v25, 0.0  ;;  %v1304_v35 = vmax.f32 %v1176_v15, 0.0  ;;  %v919_v29 = vmul.f32 %v7348_v46, %v7702_v10  ;;  %2833 = vmatprep.subr.bf16.mxu1 %v6547_v18  ;;  %v627_v38 = vmul.f32 %v7339_v43, %v464_v13  ;;  %v6551_v15 = vld [vmem:[%s9044_s3 + $0x3c0] ss:$16 sps:$4 sm:$0xff]  }
 0x109   : > { %9109 = vst [vmem:[#allocation25_spill] sm:$0xff] %v7833_v54  ;;  %9110 = vst [vmem:[#allocation26_spill] sm:$0xff] %v7835_v59  ;;  %2454 = vmatpush1.bf16.msra.mxu0 %v6542_v12  ;;  %v628_v26 = vmul.f32 %v7342_v44, %v464_v13  ;;  %v629_v25 = vmul.f32 %v7345_v45, %v464_v13  ;;  %v630_v31 = vmul.f32 %v7354_v48, %v464_v13  ;;  %v6545_v12 = vld [vmem:[%s9044_s3 + $0x348] ss:$16 sps:$4 sm:$0xff]  }
 0x10a   : > { %v1405_v2 = vpack.c.bf16 %v1305_v34, %v1301_v7  ;;  %v1404_v9 = vpack.c.bf16 %v1304_v35, %v1300_v32  ;;  %2455 = vmatprep.subr.bf16.mxu0 %v6553_v53  ;;  %v6550_v34 = vld [vmem:[%s9044_s3 + $0x36c] ss:$16 sps:$4 sm:$0xff]   ;;  %v6562_v32 = vld [vmem:[%s9044_s3 + $0x3e4] ss:$16 sps:$4 sm:$0xff]   ;;  %v7865_v53 = vmul.f32 %v7345_v45, %v7657_v30  ;;  %v7869_v35 = vmul.f32 %v7354_v48, %v7657_v30  ;;  %v6560_v30 = vld [vmem:[%s9044_s3 + $0x3e0] ss:$16 sps:$4 sm:$0xff]  }
 0x10b   : > { %v759_v22 = vpop.permute.xlu1 %758  ;;  %v918_v20 = vmul.f32 %v7333_v41, %v7702_v10  ;;  %2834 = vmatpush1.bf16.msra.mxu1 %v6545_v12  ;;  %v1308_v10 = vmax.f32 %v7818_v19, 0.0 }
 0x10c   : > { %v906_v8 = vmul.f32 %v7333_v41, %v759_v22  ;;  %v907_v39 = vmul.f32 %v7348_v46, %v759_v22  ;;  %v908_v18 = vmul.f32 %v7336_v42, %v759_v22  ;;  %v909_v7 = vmul.f32 %v7351_v47, %v759_v22  ;;  %2326 = vmatprep.mubr.bf16.mxu0 %v1405_v2  ;;  %v7855_v13 = vpop.permute.xlu0 %802 }
 0x10d   : > { %9111 = vst [vmem:[#allocation27_spill] sm:$0xff] %v7855_v13  ;;  %2712 = vmatprep.mubr.bf16.mxu1 %v1405_v2  ;;  %2327 = vmatmul.mubr.bf16.gmra.mrb[24].mxu0 %v1404_v9  ;;  %v1151_v22 = vadd.f32 %v7379_v5, %v7512_v58  ;;  %v1309_v2 = vmax.f32 %v7815_v6, 0.0  ;;  %v6548_v58 = vld [vmem:[%s9044_s3 + $0x368] ss:$16 sps:$4 sm:$0xff]  }
 0x10e   : > { %v1034_v54 = vadd.f32 %v906_v8, %v627_v38  ;;  %v1035_v59 = vadd.f32 %v907_v39, %v628_v26  ;;  %v7873_v49 = vadd.f32 %v908_v18, %v629_v25  ;;  %v7875_v36 = vadd.f32 %v909_v7, %v630_v31  ;;  %2713 = vmatmul.mubr.bf16.gmra.mrb[24].mxu1 %v1404_v9  ;;  %v6556_v25 = vld [vmem:[%s9044_s3 + $0x38c] ss:$16 sps:$4 sm:$0xff]  }
 0x10f   : > { %2456 = vmatpush1.bf16.msra.mxu0 %v6551_v15  ;;  %v1155_v9 = vadd.f32 %v7379_v5, %v7554_v0  ;;  %v1047_v26 = vadd.f32 %v919_v29, %v640_v27  ;;  %2835 = vmatprep.subr.bf16.mxu1 %v6550_v34  ;;  %v952_v31 = vmul.f32 %v7336_v42, %v7855_v13  ;;  %v1279_v12 = vmax.f32 %v1151_v22, 0.0 }
 0x110   : > { %v469_v6 = vpop.permute.xlu1 %468  ;;  %v1185_v38 = vadd.f32 %v7373_v3, %v1035_v59  ;;  %v1184_v1 = vadd.f32 %v7376_v4, %v1034_v54  ;;  %2457 = vmatprep.subr.bf16.mxu0 %v6562_v32  ;;  %v953_v0 = vmul.f32 %v7351_v47, %v7855_v13  ;;  %v1150_v59 = vadd.f32 %v7369_v60, %v7494_v33 }
 0x111   : > { %v631_v54 = vmul.f32 %v7339_v43, %v469_v6  ;;  %v632_v19 = vmul.f32 %v7342_v44, %v469_v6  ;;  %v7904_v15 = vpop.permute.xlu0 %518  ;;  %2836 = vmatpush1.bf16.msra.mxu1 %v6548_v58  ;;  %v1283_v18 = vmax.f32 %v1155_v9, 0.0  ;;  %v1154_v33 = vadd.f32 %v7369_v60, %v7552_v62  ;;  %v6554_v58 = vld [vmem:[%s9044_s3 + $0x388] ss:$16 sps:$4 sm:$0xff]  }
 0x112   : > { %v1313_v27 = vmax.f32 %v1185_v38, 0.0  ;;  %v1312_v29 = vmax.f32 %v1184_v1, 0.0  ;;  %9112 = vst [vmem:[#allocation28_spill] sm:$0xff] %v7904_v15  ;;  %v673_v8 = vmul.f32 %v7345_v45, %v7904_v15  ;;  %v674_v39 = vmul.f32 %v7354_v48, %v7904_v15  ;;  %2837 = vmatprep.subr.bf16.mxu1 %v6556_v25 }
 0x113   : > { %2458 = vmatpush1.bf16.msra.mxu0 %v6560_v30  ;;  %v633_v7 = vmul.f32 %v7345_v45, %v469_v6  ;;  %v634_v34 = vmul.f32 %v7354_v48, %v469_v6  ;;  %v7921_v30 = vpack.c.bf16 %v1283_v18, %v1279_v12  ;;  %v1278_v9 = vmax.f32 %v1150_v59, 0.0 }
 0x114   : > { %v1409_v32 = vpack.c.bf16 %v1313_v27, %v1309_v2  ;;  %v1408_v22 = vpack.c.bf16 %v1312_v29, %v1308_v10  ;;  %v7914_v1 = vadd.f32 %v952_v31, %v673_v8  ;;  %v7916_v13 = vadd.f32 %v953_v0, %v674_v39  ;;  %v6559_v10 = vld [vmem:[%s9044_s3 + $0x3ac] ss:$16 sps:$4 sm:$0xff]  }
 0x115   : > { %v763_v38 = vpop.permute.xlu1 %762  ;;  %v1046_v25 = vadd.f32 %v918_v20, %v639_v14  ;;  %v934_v31 = vmul.f32 %v7333_v41, %v7730_v63  ;;  %v935_v0 = vmul.f32 %v7348_v46, %v7730_v63  ;;  %v1282_v12 = vmax.f32 %v1154_v33, 0.0  ;;  %2838 = vmatpush1.bf16.msra.mxu1 %v6554_v58  ;;  %v6557_v63 = vld [vmem:[%s9044_s3 + $0x3a8] ss:$16 sps:$4 sm:$0xff]  }
 0x116   : > { %v910_v62 = vmul.f32 %v7333_v41, %v763_v38  ;;  %v911_v15 = vmul.f32 %v7348_v46, %v763_v38  ;;  %v912_v2 = vmul.f32 %v7336_v42, %v763_v38  ;;  %v913_v6 = vmul.f32 %v7351_v47, %v763_v38  ;;  %2336 = vmatprep.mubr.bf16.mxu0 %v1409_v32 }
 0x117   : > { %2722 = vmatprep.mubr.bf16.mxu1 %v1409_v32  ;;  %2337 = vmatmul.mubr.bf16.gmra.mrb[28].mxu0 %v1408_v22  ;;  %v7939_v18 = vadd.f32 %v7373_v3, %v1047_v26  ;;  %v655_v20 = vmul.f32 %v7339_v43, %v7789_v56  ;;  %v656_v14 = vmul.f32 %v7342_v44, %v7789_v56  ;;  %v6565_v56 = vld [vmem:[%s9044_s3 + $0x3cc] ss:$16 sps:$4 sm:$0xff]  }
 0x118   : > { %v1038_v59 = vadd.f32 %v910_v62, %v631_v54  ;;  %v1039_v27 = vadd.f32 %v911_v15, %v632_v19  ;;  %v7934_v29 = vadd.f32 %v912_v2, %v633_v7  ;;  %v7936_v8 = vadd.f32 %v913_v6, %v634_v34  ;;  %2723 = vmatmul.mubr.bf16.gmra.mrb[28].mxu1 %v1408_v22  ;;  %v6563_v6 = vld [vmem:[%s9044_s3 + $0x3c8] ss:$16 sps:$4 sm:$0xff]  }
 0x119   : > { %v767_v39 = vpop.permute.xlu1 %766  ;;  %v7948_v54 = vpack.c.bf16 %v1282_v12, %v1278_v9  ;;  %2839 = vmatprep.subr.bf16.mxu1 %v6559_v10  ;;  %v7968_v9 = vadd.f32 %v7376_v4, %v1046_v25  ;;  %v1062_v62 = vadd.f32 %v934_v31, %v655_v20  ;;  %v1063_v2 = vadd.f32 %v935_v0, %v656_v14  ;;  %v6568_v25 = vld [vmem:[%s9044_s3 + $0x3ec] ss:$16 sps:$4 sm:$0xff]  }
 0x11a   : > { %v914_v19 = vmul.f32 %v7333_v41, %v767_v39  ;;  %v915_v15 = vmul.f32 %v7348_v46, %v767_v39  ;;  %v916_v26 = vmul.f32 %v7336_v42, %v767_v39  ;;  %v917_v33 = vmul.f32 %v7351_v47, %v767_v39  ;;  %2840 = vmatpush1.bf16.msra.mxu1 %v6557_v63 }
 0x11b   : > { %v1189_v7 = vadd.f32 %v7373_v3, %v1039_v27  ;;  %v1188_v34 = vadd.f32 %v7376_v4, %v1038_v59  ;;  %2841 = vmatprep.subr.bf16.mxu1 %v6565_v56  ;;  %v7985_v31 = vmul.f32 %v7342_v44, %v7762_v37  ;;  %v7989_v0 = vmul.f32 %v7345_v45, %v7762_v37 }
 0x11c   : > { %v1042_v32 = vadd.f32 %v914_v19, %v7827_v16  ;;  %v1043_v22 = vadd.f32 %v915_v15, %v7831_v61  ;;  %v7962_v38 = vadd.f32 %v916_v26, %v7865_v53  ;;  %v7965_v58 = vadd.f32 %v917_v33, %v7869_v35 }
 0x11d   : > { %v7978_v35 = vmul.f32 %v7339_v43, %v7762_v37  ;;  %v7993_v12 = vmul.f32 %v7354_v48, %v7762_v37  ;;  %v7997_v59 = vmul.f32 %v7339_v43, %v7823_v52  ;;  %v1317_v27 = vmax.f32 %v1189_v7, 0.0 }
 0x11e   : > { %v484_v10 = vpop.permute.xlu1 %483  ;;  %v1193_v16 = vadd.f32 %v7373_v3, %v1043_v22  ;;  %v1192_v61 = vadd.f32 %v7376_v4, %v1042_v32  ;;  %v1316_v20 = vmax.f32 %v1188_v34, 0.0  ;;  %v8000_v63 = vadd.f32 %v7373_v3, %v1063_v2  ;;  %2842 = vmatpush1.bf16.msra.mxu1 %v6563_v6 }
 0x11f   : > { %v8003_v19 = vadd.f32 %v7376_v4, %v1062_v62  ;;  %v1159_v15 = vadd.f32 %v7379_v5, %v7612_v24  ;;  %v1163_v37 = vadd.f32 %v7379_v5, %v7644_v51  ;;  %v643_v26 = vmul.f32 %v7339_v43, %v484_v10  ;;  %2843 = vmatprep.subr.bf16.mxu1 %v6568_v25  ;;  %v6566_v62 = vld [vmem:[%s9044_s3 + $0x3e8] ss:$16 sps:$4 sm:$0xff]  }
 0x120   : > { %v1321_v39 = vmax.f32 %v1193_v16, 0.0  ;;  %v1320_v14 = vmax.f32 %v1192_v61, 0.0  ;;  %v644_v33 = vmul.f32 %v7342_v44, %v484_v10  ;;  %v645_v34 = vmul.f32 %v7345_v45, %v484_v10 }
 0x121   : > { %v646_v32 = vmul.f32 %v7354_v48, %v484_v10  ;;  %v1287_v24 = vmax.f32 %v1159_v15, 0.0  ;;  %v1291_v2 = vmax.f32 %v1163_v37, 0.0  ;;  %v1324_v10 = vmax.f32 %v7968_v9, 0.0 }
 0x122   : > { %v1413_v56 = vpack.c.bf16 %v1321_v39, %v1317_v27  ;;  %v1412_v7 = vpack.c.bf16 %v1320_v14, %v1316_v20  ;;  %v8023_v25 = vmul.f32 %v7342_v44, %v7823_v52  ;;  %v8027_v27 = vmul.f32 %v7345_v45, %v7823_v52  ;;  %2844 = vmatpush1.bf16.msra.mxu1 %v6566_v62 }
 0x123   : > { %v775_v22 = vpop.permute.xlu1 %774  ;;  %v8029_v39 = vpack.c.bf16 %v1291_v2, %v1287_v24  ;;  %v1162_v53 = vadd.f32 %v7369_v60, %v7642_v40 }
 0x124   : > { %v922_v51 = vmul.f32 %v7333_v41, %v775_v22  ;;  %v923_v6 = vmul.f32 %v7348_v46, %v775_v22  ;;  %v924_v16 = vmul.f32 %v7336_v42, %v775_v22  ;;  %v925_v61 = vmul.f32 %v7351_v47, %v775_v22  ;;  %2346 = vmatprep.mubr.bf16.mxu0 %v1413_v56 }
 0x125   : > { %2732 = vmatprep.mubr.bf16.mxu1 %v1413_v56  ;;  %2347 = vmatmul.mubr.bf16.gmra.mrb[32].mxu0 %v1412_v7  ;;  %9113 = vst [vmem:[#allocation29_spill] sm:$0xff] %v8029_v39  ;;  %v1158_v22 = vadd.f32 %v7369_v60, %v7610_v21 }
 0x126   : > { %v1050_v20 = vadd.f32 %v922_v51, %v643_v26  ;;  %v1051_v14 = vadd.f32 %v923_v6, %v644_v33  ;;  %v8031_v15 = vadd.f32 %v924_v16, %v645_v34  ;;  %v8033_v37 = vadd.f32 %v925_v61, %v646_v32  ;;  %2733 = vmatmul.mubr.bf16.gmra.mrb[32].mxu1 %v1412_v7 }
 0x127   : > { %v1167_v34 = vadd.f32 %v7379_v5, %v7580_v23  ;;  %v1171_v7 = vadd.f32 %v7379_v5, %v7700_v55  ;;  %v1286_v6 = vmax.f32 %v1158_v22, 0.0  ;;  %v1290_v16 = vmax.f32 %v1162_v53, 0.0 }
 0x128   : > { %v489_v24 = vpop.permute.xlu1 %488  ;;  %v1201_v26 = vadd.f32 %v7373_v3, %v1051_v14  ;;  %v1200_v33 = vadd.f32 %v7376_v4, %v1050_v20  ;;  %v1166_v23 = vadd.f32 %v7369_v60, %v7565_v11  ;;  %v1170_v55 = vadd.f32 %v7369_v60, %v7698_v28 }
 0x129   : > { %v647_v32 = vmul.f32 %v7339_v43, %v489_v24  ;;  %v648_v62 = vmul.f32 %v7342_v44, %v489_v24  ;;  %v649_v21 = vmul.f32 %v7345_v45, %v489_v24  ;;  %v650_v2 = vmul.f32 %v7354_v48, %v489_v24 }
 0x12a   : > { %v1329_v40 = vmax.f32 %v1201_v26, 0.0  ;;  %v1328_v51 = vmax.f32 %v1200_v33, 0.0  ;;  %v1295_v61 = vmax.f32 %v1167_v34, 0.0  ;;  %v1299_v20 = vmax.f32 %v1171_v7, 0.0 }
 0x12b   : > { %v9114_v14 = vmax.f32 %v7939_v18, 0.0  ;;  %v8057_v39 = vpack.c.bf16 %v1290_v16, %v1286_v6  ;;  %v1175_v24 = vadd.f32 %v7379_v5, %v7769_v50  ;;  %v1294_v53 = vmax.f32 %v1166_v23, 0.0 }
 0x12c   : > { %v1416_v56 = vpack.c.bf16 %v1328_v51, %v1324_v10  ;;  %v8061_v22 = vpack.c.bf16 %v1299_v20, %v1295_v61  ;;  %v1298_v33 = vmax.f32 %v1170_v55, 0.0  ;;  %v1179_v11 = vadd.f32 %v7379_v5, %v7793_v57  ;;  %v9115_v55 = vld [vmem:[#allocation24_spill] sm:$0xff] }
 0x12d   : > { %v1417_v9 = vpack.c.bf16 %v1329_v40, %v9114_v14  ;;  %v779_v26 = vpop.permute.xlu1 %778  ;;  %v1303_v7 = vmax.f32 %v1175_v24, 0.0  ;;  %v1174_v51 = vadd.f32 %v7369_v60, %v7767_v17 }
 0x12e   : > { %v926_v34 = vmul.f32 %v7333_v41, %v779_v26  ;;  %v927_v28 = vmul.f32 %v7348_v46, %v779_v26  ;;  %v928_v18 = vmul.f32 %v7336_v42, %v779_v26  ;;  %v929_v10 = vmul.f32 %v7351_v47, %v779_v26  ;;  %v9116_v26 = vld [vmem:[#allocation21_spill] sm:$0xff] }
 0x12f   : > { %2356 = vmatprep.mubr.bf16.mxu0 %v1417_v9  ;;  %2742 = vmatprep.mubr.bf16.mxu1 %v1417_v9  ;;  %v8069_v50 = vpack.c.bf16 %v1298_v33, %v1294_v53  ;;  %v1307_v40 = vmax.f32 %v1179_v11, 0.0  ;;  %v1178_v9 = vadd.f32 %v7369_v60, %v9115_v55  ;;  %v1302_v14 = vmax.f32 %v1174_v51, 0.0 }
 0x130   : > { %2357 = vmatmul.mubr.bf16.gmra.mrb[36].mxu0 %v1416_v56  ;;  %v1054_v6 = vadd.f32 %v926_v34, %v647_v32  ;;  %v1055_v57 = vadd.f32 %v927_v28, %v648_v62  ;;  %v8073_v16 = vadd.f32 %v928_v18, %v649_v21  ;;  %v8075_v61 = vadd.f32 %v929_v10, %v650_v2 }
 0x131   : > { %2743 = vmatmul.mubr.bf16.gmra.mrb[36].mxu1 %v1416_v56  ;;  %v783_v20 = vpop.permute.xlu1 %782  ;;  %v8077_v23 = vpack.c.bf16 %v1307_v40, %v1303_v7  ;;  %v1183_v24 = vadd.f32 %v7379_v5, %v9116_v26  ;;  %v1306_v2 = vmax.f32 %v1178_v9, 0.0  ;;  %v1187_v33 = vadd.f32 %v7379_v5, %v7875_v36 }
 0x132   : > { %v930_v53 = vmul.f32 %v7333_v41, %v783_v20  ;;  %v931_v17 = vmul.f32 %v7348_v46, %v783_v20  ;;  %v932_v32 = vmul.f32 %v7336_v42, %v783_v20  ;;  %v933_v62 = vmul.f32 %v7351_v47, %v783_v20 }
 0x133   : > { %v1205_v56 = vadd.f32 %v7373_v3, %v1055_v57  ;;  %v1204_v21 = vadd.f32 %v7376_v4, %v1054_v6  ;;  %v8099_v40 = vpack.c.bf16 %v1306_v2, %v1302_v14  ;;  %v1311_v51 = vmax.f32 %v1183_v24, 0.0 }
 0x134   : > { %v1058_v11 = vadd.f32 %v930_v53, %v7978_v35  ;;  %v1059_v34 = vadd.f32 %v931_v17, %v7985_v31  ;;  %v8094_v28 = vadd.f32 %v932_v32, %v7989_v0  ;;  %v8097_v18 = vadd.f32 %v933_v62, %v7993_v12  ;;  %v9117_v35 = vld [vmem:[#allocation20_spill] sm:$0xff] }
 0x135   : > { %v1333_v10 = vmax.f32 %v1205_v56, 0.0  ;;  %v1332_v7 = vmax.f32 %v1204_v21, 0.0  ;;  %v1315_v20 = vmax.f32 %v1187_v33, 0.0  ;;  %v1182_v31 = vadd.f32 %v7369_v60, %v9117_v35 }
 0x136   : > { %v504_v6 = vpop.permute.xlu1 %503  ;;  %v1209_v57 = vadd.f32 %v7373_v3, %v1059_v34  ;;  %v1208_v36 = vadd.f32 %v7376_v4, %v1058_v11  ;;  %v1186_v53 = vadd.f32 %v7369_v60, %v7873_v49  ;;  %v1191_v32 = vadd.f32 %v7379_v5, %v7936_v8 }
 0x137   : > { %v659_v0 = vmul.f32 %v7339_v43, %v504_v6  ;;  %v660_v55 = vmul.f32 %v7342_v44, %v504_v6  ;;  %v661_v12 = vmul.f32 %v7345_v45, %v504_v6  ;;  %v662_v9 = vmul.f32 %v7354_v48, %v504_v6 }
 0x138   : > { %v1337_v14 = vmax.f32 %v1209_v57, 0.0  ;;  %v1336_v26 = vmax.f32 %v1208_v36, 0.0  ;;  %v8109_v24 = vpack.c.bf16 %v1315_v20, %v1311_v51  ;;  %v1310_v17 = vmax.f32 %v1182_v31, 0.0  ;;  %v9118_v57 = vld [vmem:[#allocation23_spill] sm:$0xff] }
 0x139   : > { %v1195_v62 = vadd.f32 %v7379_v5, %v7965_v58  ;;  %v1190_v56 = vadd.f32 %v7369_v60, %v7934_v29  ;;  %v1314_v33 = vmax.f32 %v1186_v53, 0.0  ;;  %v1194_v11 = vadd.f32 %v7369_v60, %v7962_v38 }
 0x13a   : > { %v1421_v21 = vpack.c.bf16 %v1337_v14, %v1333_v10  ;;  %v1420_v2 = vpack.c.bf16 %v1336_v26, %v1332_v7  ;;  %v1319_v51 = vmax.f32 %v1191_v32, 0.0  ;;  %v1199_v36 = vadd.f32 %v7379_v5, %v9118_v57 }
 0x13b   : > { %v791_v34 = vpop.permute.xlu1 %790  ;;  %v1323_v6 = vmax.f32 %v1195_v62, 0.0  ;;  %v1318_v49 = vmax.f32 %v1190_v56, 0.0  ;;  %v8127_v10 = vpack.c.bf16 %v1314_v33, %v1310_v17  ;;  %v1322_v7 = vmax.f32 %v1194_v11, 0.0 }
 0x13c   : > { %v938_v8 = vmul.f32 %v7333_v41, %v791_v34  ;;  %v939_v58 = vmul.f32 %v7348_v46, %v791_v34  ;;  %v940_v20 = vmul.f32 %v7336_v42, %v791_v34  ;;  %v941_v29 = vmul.f32 %v7351_v47, %v791_v34  ;;  %2366 = vmatprep.mubr.bf16.mxu0 %v1421_v21  ;;  %v9119_v34 = vld [vmem:[#allocation22_spill] sm:$0xff] }
 0x13d   : > { %2752 = vmatprep.mubr.bf16.mxu1 %v1421_v21  ;;  %2367 = vmatmul.mubr.bf16.gmra.mrb[40].mxu0 %v1420_v2  ;;  %v8129_v38 = vpack.c.bf16 %v1323_v6, %v1319_v51  ;;  %v1203_v35 = vadd.f32 %v7379_v5, %v8033_v37  ;;  %v8133_v32 = vpack.c.bf16 %v1322_v7, %v1318_v49  ;;  %v1327_v62 = vmax.f32 %v1199_v36, 0.0 }
 0x13e   : > { %v1066_v31 = vadd.f32 %v938_v8, %v659_v0  ;;  %v1067_v14 = vadd.f32 %v939_v58, %v660_v55  ;;  %v1068_v26 = vadd.f32 %v940_v20, %v661_v12  ;;  %v1069_v53 = vadd.f32 %v941_v29, %v662_v9  ;;  %2753 = vmatmul.mubr.bf16.gmra.mrb[40].mxu1 %v1420_v2 }
 0x13f   : > { %v1331_v56 = vmax.f32 %v1203_v35, 0.0  ;;  %v1198_v21 = vadd.f32 %v7369_v60, %v9119_v34  ;;  %v1202_v37 = vadd.f32 %v7369_v60, %v8031_v15  ;;  %v1207_v0 = vadd.f32 %v7379_v5, %v8075_v61 }
 0x140   : > { %v509_v17 = vpop.permute.xlu1 %508  ;;  %v1217_v33 = vadd.f32 %v7373_v3, %v1067_v14  ;;  %v1216_v11 = vadd.f32 %v7376_v4, %v1066_v31  ;;  %v1211_v15 = vadd.f32 %v7379_v5, %v8097_v18  ;;  %v1206_v61 = vadd.f32 %v7369_v60, %v8073_v16  ;;  %v9122_v31 = vld [vmem:[#allocation26_spill] sm:$0xff] }
 0x141   : > { %v663_v55 = vmul.f32 %v7339_v43, %v509_v17  ;;  %v664_v12 = vmul.f32 %v7342_v44, %v509_v17  ;;  %v665_v9 = vmul.f32 %v7345_v45, %v509_v17  ;;  %v666_v2 = vmul.f32 %v7354_v48, %v509_v17 }
 0x142   : > { %v1345_v51 = vmax.f32 %v1217_v33, 0.0  ;;  %v1344_v6 = vmax.f32 %v1216_v11, 0.0  ;;  %v8147_v49 = vpack.c.bf16 %v1331_v56, %v1327_v62  ;;  %v1326_v57 = vmax.f32 %v1198_v21, 0.0 }
 0x143   : > { %v1330_v36 = vmax.f32 %v1202_v37, 0.0  ;;  %v1335_v8 = vmax.f32 %v1207_v0, 0.0  ;;  %v9120_v58 = vmax.f32 %v8000_v63, 0.0  ;;  %v9121_v29 = vmax.f32 %v8003_v19, 0.0 }
 0x144   : > { %v1210_v35 = vadd.f32 %v7369_v60, %v8094_v28  ;;  %v1215_v14 = vadd.f32 %v7379_v5, %v9122_v31  ;;  %v1339_v18 = vmax.f32 %v1211_v15, 0.0  ;;  %v1334_v34 = vmax.f32 %v1206_v61, 0.0  ;;  %v9124_v15 = vld [vmem:[#allocation25_spill] sm:$0xff] }
 0x145   : > { %v1425_v20 = vpack.c.bf16 %v1345_v51, %v9120_v58  ;;  %v1424_v7 = vpack.c.bf16 %v1344_v6, %v9121_v29  ;;  %v795_v62 = vpop.permute.xlu1 %794  ;;  %v8161_v56 = vpack.c.bf16 %v1330_v36, %v1326_v57  ;;  %v1219_v21 = vadd.f32 %v7379_v5, %v1069_v53 }
 0x146   : > { %v942_v16 = vmul.f32 %v7333_v41, %v795_v62  ;;  %v943_v63 = vmul.f32 %v7348_v46, %v795_v62  ;;  %v944_v19 = vmul.f32 %v7336_v42, %v795_v62  ;;  %v945_v17 = vmul.f32 %v7351_v47, %v795_v62 }
 0x147   : > { %2376 = vmatprep.mubr.bf16.mxu0 %v1425_v20  ;;  %2762 = vmatprep.mubr.bf16.mxu1 %v1425_v20  ;;  %v8168_v28 = vpack.c.bf16 %v1339_v18, %v1335_v8  ;;  %v1338_v33 = vmax.f32 %v1210_v35, 0.0  ;;  %v1343_v11 = vmax.f32 %v1215_v14, 0.0  ;;  %v1347_v37 = vmax.f32 %v1219_v21, 0.0  ;;  %v9125_v20 = vld [vmem:[#allocation27_spill] sm:$0xff] }
 0x148   : > { %2377 = vmatmul.mubr.bf16.gmra.mrb[44].mxu0 %v1424_v7  ;;  %v1070_v0 = vadd.f32 %v942_v16, %v663_v55  ;;  %v1071_v51 = vadd.f32 %v943_v63, %v664_v12  ;;  %v1072_v6 = vadd.f32 %v944_v19, %v665_v9  ;;  %v1073_v53 = vadd.f32 %v945_v17, %v666_v2  ;;  %v9126_v12 = vld [vmem:[#allocation28_spill] sm:$0xff] }
 0x149   : > { %2763 = vmatmul.mubr.bf16.gmra.mrb[44].mxu1 %v1424_v7  ;;  %v8170_v57 = vpack.c.bf16 %v1338_v33, %v1334_v34  ;;  %v8172_v36 = vpack.c.bf16 %v1347_v37, %v1343_v11  ;;  %v1214_v61 = vadd.f32 %v7369_v60, %v9124_v15  ;;  %v1218_v58 = vadd.f32 %v7369_v60, %v1068_v26  ;;  %v799_v2 = vpop.permute.xlu1 %798 }
 0x14a   : > { %v670_v8 = vmul.f32 %v7354_v48, %v7823_v52  ;;  %v950_v29 = vmul.f32 %v7333_v41, %v9125_v20  ;;  %v951_v55 = vmul.f32 %v7348_v46, %v9125_v20  ;;  %v671_v9 = vmul.f32 %v7339_v43, %v9126_v12 }
 0x14b   : > { %9123 = vst [vmem:[#allocation24_spill] sm:$0xff] %v8172_v36  ;;  %v672_v7 = vmul.f32 %v7342_v44, %v9126_v12  ;;  %v1221_v35 = vadd.f32 %v7373_v3, %v1071_v51  ;;  %v1342_v31 = vmax.f32 %v1214_v61, 0.0  ;;  %v1346_v26 = vmax.f32 %v1218_v58, 0.0 }
 0x14c   : > { %v946_v14 = vmul.f32 %v7333_v41, %v799_v2  ;;  %v947_v52 = vmul.f32 %v7348_v46, %v799_v2  ;;  %v948_v62 = vmul.f32 %v7336_v42, %v799_v2  ;;  %v949_v18 = vmul.f32 %v7351_v47, %v799_v2 }
 0x14d   : > { %v1220_v34 = vadd.f32 %v7376_v4, %v1070_v0  ;;  %v8193_v21 = vpack.c.bf16 %v1346_v26, %v1342_v31  ;;  %v1223_v16 = vadd.f32 %v7379_v5, %v1073_v53  ;;  %v1222_v63 = vadd.f32 %v7369_v60, %v1072_v6 }
 0x14e   : > { %v1074_v19 = vadd.f32 %v946_v14, %v7997_v59  ;;  %v1075_v17 = vadd.f32 %v947_v52, %v8023_v25  ;;  %v1076_v33 = vadd.f32 %v948_v62, %v8027_v27  ;;  %v1077_v11 = vadd.f32 %v949_v18, %v670_v8 }
 0x14f   : > { %9127 = vst [vmem:[#allocation21_spill] sm:$0xff] %v8193_v21  ;;  %v1078_v37 = vadd.f32 %v950_v29, %v671_v9  ;;  %v1079_v51 = vadd.f32 %v951_v55, %v672_v7  ;;  %v524_v15 = vpop.permute.xlu1 %523  ;;  %v1349_v20 = vmax.f32 %v1221_v35, 0.0  ;;  %v1348_v6 = vmax.f32 %v1220_v34, 0.0  ;;  %v534_v7 = vpop.permute.xlu0 %533 }
 0x150   : > { %v1225_v61 = vadd.f32 %v7373_v3, %v1075_v17  ;;  %v1224_v0 = vadd.f32 %v7376_v4, %v1074_v19  ;;  %v1227_v58 = vadd.f32 %v7379_v5, %v1077_v11  ;;  %v1226_v53 = vadd.f32 %v7369_v60, %v1076_v33 }
 0x151   : > { %v1351_v12 = vmax.f32 %v1223_v16, 0.0  ;;  %v1350_v59 = vmax.f32 %v1222_v63, 0.0  ;;  %v1229_v8 = vadd.f32 %v7373_v3, %v1079_v51  ;;  %v1228_v29 = vadd.f32 %v7376_v4, %v1078_v37 }
 0x152   : > { %v1353_v2 = vmax.f32 %v1225_v61, 0.0  ;;  %v1352_v25 = vmax.f32 %v1224_v0, 0.0  ;;  %v1355_v31 = vmax.f32 %v1227_v58, 0.0  ;;  %v1354_v27 = vmax.f32 %v1226_v53, 0.0 }
 0x153   : > { %v1231_v55 = vadd.f32 %v7379_v5, %v7916_v13  ;;  %v1230_v9 = vadd.f32 %v7369_v60, %v7914_v1  ;;  %v675_v62 = vmul.f32 %v7339_v43, %v524_v15  ;;  %v676_v18 = vmul.f32 %v7342_v44, %v524_v15  ;;  %v539_v53 = vpop.permute.xlu0 %538 }
 0x154   : > { %v1429_v26 = vpack.c.bf16 %v1353_v2, %v1349_v20  ;;  %v1428_v35 = vpack.c.bf16 %v1352_v25, %v1348_v6  ;;  %v8210_v14 = vpack.c.bf16 %v1355_v31, %v1351_v12  ;;  %v8212_v52 = vpack.c.bf16 %v1354_v27, %v1350_v59  ;;  %v807_v63 = vpop.permute.xlu1 %806  ;;  %v6571_v59 = vld [vmem:[#allocation3 + $0x4] ss:$16 sps:$4 sm:$0xff]  }
 0x155   : > { %v677_v34 = vmul.f32 %v7345_v45, %v524_v15  ;;  %v678_v16 = vmul.f32 %v7354_v48, %v524_v15  ;;  %v954_v13 = vmul.f32 %v7333_v41, %v807_v63  ;;  %v955_v1 = vmul.f32 %v7348_v46, %v807_v63  ;;  %3988 = vmatprep.subr.bf16.mxu0 %v6571_v59 }
 0x156   : > { %9128 = vst [vmem:[#allocation20_spill] sm:$0xff] %v8210_v14  ;;  %9129 = vst [vmem:[#allocation23_spill] sm:$0xff] %v8212_v52  ;;  %v956_v19 = vmul.f32 %v7336_v42, %v807_v63  ;;  %v957_v17 = vmul.f32 %v7351_v47, %v807_v63  ;;  %2386 = vmatprep.mubr.bf16.mxu0 %v1429_v26  ;;  %2772 = vmatprep.mubr.bf16.mxu1 %v1429_v26  ;;  %v1357_v61 = vmax.f32 %v1229_v8, 0.0  ;;  %v9130_v8 = vld [vmem:[#allocation10_spill] sm:$0xff] }
 0x157   : > { %2387 = vmatmul.mubr.bf16.gmra.mrb[48].mxu0 %v1428_v35  ;;  %v1082_v33 = vadd.f32 %v954_v13, %v675_v62  ;;  %v1083_v11 = vadd.f32 %v955_v1, %v676_v18  ;;  %2773 = vmatmul.mubr.bf16.gmra.mrb[48].mxu1 %v1428_v35  ;;  %v1356_v0 = vmax.f32 %v1228_v29, 0.0  ;;  %v1359_v15 = vmax.f32 %v1231_v55, 0.0  ;;  %v9131_v55 = vld [vmem:[#allocation11_spill] sm:$0xff] }
 0x158   : > { %v1084_v37 = vadd.f32 %v956_v19, %v677_v34  ;;  %v1085_v51 = vadd.f32 %v957_v17, %v678_v16  ;;  %v1358_v58 = vmax.f32 %v1230_v9, 0.0  ;;  %v8228_v29 = vmul.f32 %v7354_v48, %v9130_v8 }
 0x159   : > { %v529_v20 = vpop.permute.xlu1 %528  ;;  %v1233_v6 = vadd.f32 %v7373_v3, %v1083_v11  ;;  %v1232_v12 = vadd.f32 %v7376_v4, %v1082_v33  ;;  %v8232_v9 = vmul.f32 %v7351_v47, %v9131_v55  ;;  %v683_v62 = vmul.f32 %v7339_v43, %v534_v7 }
 0x15a   : > { %v1235_v2 = vadd.f32 %v7379_v5, %v1085_v51  ;;  %v1234_v25 = vadd.f32 %v7369_v60, %v1084_v37  ;;  %v684_v18 = vmul.f32 %v7342_v44, %v534_v7  ;;  %v679_v1 = vmul.f32 %v7339_v43, %v529_v20  ;;  %v819_v37 = vpop.permute.xlu0 %818 }
 0x15b   : > { %v1361_v31 = vmax.f32 %v1233_v6, 0.0  ;;  %v1360_v27 = vmax.f32 %v1232_v12, 0.0  ;;  %v680_v19 = vmul.f32 %v7342_v44, %v529_v20  ;;  %v681_v17 = vmul.f32 %v7345_v45, %v529_v20 }
 0x15c   : > { %v1363_v26 = vmax.f32 %v1235_v2, 0.0  ;;  %v1362_v35 = vmax.f32 %v1234_v25, 0.0  ;;  %v682_v33 = vmul.f32 %v7354_v48, %v529_v20  ;;  %v687_v12 = vmul.f32 %v7339_v43, %v539_v53  ;;  %v6574_v20 = vld [vmem:[#allocation3 + $0xc] ss:$16 sps:$4 sm:$0xff]  }
 0x15d   : > { %v1433_v34 = vpack.c.bf16 %v1361_v31, %v1357_v61  ;;  %v1432_v16 = vpack.c.bf16 %v1360_v27, %v1356_v0  ;;  %v688_v27 = vmul.f32 %v7342_v44, %v539_v53  ;;  %4374 = vmatprep.subr.bf16.mxu1 %v6574_v20  ;;  %v966_v20 = vmul.f32 %v7333_v41, %v819_v37 }
 0x15e   : > { %v8236_v63 = vpack.c.bf16 %v1363_v26, %v1359_v15  ;;  %v8238_v13 = vpack.c.bf16 %v1362_v35, %v1358_v58  ;;  %v685_v15 = vmul.f32 %v7345_v45, %v534_v7  ;;  %v686_v58 = vmul.f32 %v7354_v48, %v534_v7 }
 0x15f   : > { %v811_v11 = vpop.permute.xlu1 %810  ;;  %2396 = vmatprep.mubr.bf16.mxu0 %v1433_v34  ;;  %2782 = vmatprep.mubr.bf16.mxu1 %v1433_v34  ;;  %v689_v26 = vmul.f32 %v7345_v45, %v539_v53  ;;  %v690_v35 = vmul.f32 %v7354_v48, %v539_v53  ;;  %v969_v52 = vmul.f32 %v7351_v47, %v819_v37 }
 0x160   : > { %9132 = vst [vmem:[#allocation22_spill] sm:$0xff] %v8236_v63  ;;  %9133 = vst [vmem:[#allocation26_spill] sm:$0xff] %v8238_v13  ;;  %v958_v51 = vmul.f32 %v7333_v41, %v811_v11  ;;  %v959_v6 = vmul.f32 %v7348_v46, %v811_v11  ;;  %v960_v61 = vmul.f32 %v7336_v42, %v811_v11  ;;  %2397 = vmatmul.mubr.bf16.gmra.mrb[52].mxu0 %v1432_v16 }
 0x161   : > { %v961_v0 = vmul.f32 %v7351_v47, %v811_v11  ;;  %2783 = vmatmul.mubr.bf16.gmra.mrb[52].mxu1 %v1432_v16  ;;  %v967_v11 = vmul.f32 %v7348_v46, %v819_v37  ;;  %v968_v63 = vmul.f32 %v7336_v42, %v819_v37  ;;  %v1094_v21 = vadd.f32 %v966_v20, %v687_v12 }
 0x162   : > { %v1086_v59 = vadd.f32 %v958_v51, %v679_v1  ;;  %v1087_v2 = vadd.f32 %v959_v6, %v680_v19  ;;  %v1088_v25 = vadd.f32 %v960_v61, %v681_v17 }
 0x163   : > { %v1089_v31 = vadd.f32 %v961_v0, %v682_v33  ;;  %v815_v13 = vpop.permute.xlu1 %814  ;;  %v1095_v14 = vadd.f32 %v967_v11, %v688_v27  ;;  %v1096_v37 = vadd.f32 %v968_v63, %v689_v26  ;;  %v1097_v27 = vadd.f32 %v969_v52, %v690_v35 }
 0x164   : > { %v962_v7 = vmul.f32 %v7333_v41, %v815_v13  ;;  %v963_v34 = vmul.f32 %v7348_v46, %v815_v13  ;;  %v964_v1 = vmul.f32 %v7336_v42, %v815_v13  ;;  %v965_v19 = vmul.f32 %v7351_v47, %v815_v13 }
 0x165   : > { %v1237_v16 = vadd.f32 %v7373_v3, %v1087_v2  ;;  %v1236_v17 = vadd.f32 %v7376_v4, %v1086_v59  ;;  %v1239_v33 = vadd.f32 %v7379_v5, %v1089_v31  ;;  %v1238_v53 = vadd.f32 %v7369_v60, %v1088_v25 }
 0x166   : > { %v1090_v51 = vadd.f32 %v962_v7, %v683_v62  ;;  %v1091_v6 = vadd.f32 %v963_v34, %v684_v18  ;;  %v1092_v61 = vadd.f32 %v964_v1, %v685_v15  ;;  %v1093_v0 = vadd.f32 %v965_v19, %v686_v58 }
 0x167   : > { %v1365_v62 = vmax.f32 %v1237_v16, 0.0  ;;  %v1364_v18 = vmax.f32 %v1236_v17, 0.0  ;;  %v1367_v15 = vmax.f32 %v1239_v33, 0.0  ;;  %v1366_v58 = vmax.f32 %v1238_v53, 0.0 }
 0x168   : > { %v544_v13 = vpop.permute.xlu1 %543  ;;  %v1241_v2 = vadd.f32 %v7373_v3, %v1091_v6  ;;  %v1240_v59 = vadd.f32 %v7376_v4, %v1090_v51  ;;  %v1243_v31 = vadd.f32 %v7379_v5, %v1093_v0  ;;  %v1242_v25 = vadd.f32 %v7369_v60, %v1092_v61 }
 0x169   : > { %v1245_v11 = vadd.f32 %v7373_v3, %v1095_v14  ;;  %v691_v16 = vmul.f32 %v7339_v43, %v544_v13  ;;  %v692_v17 = vmul.f32 %v7342_v44, %v544_v13  ;;  %v693_v33 = vmul.f32 %v7345_v45, %v544_v13 }
 0x16a   : > { %v1369_v7 = vmax.f32 %v1241_v2, 0.0  ;;  %v1368_v34 = vmax.f32 %v1240_v59, 0.0  ;;  %v1371_v1 = vmax.f32 %v1243_v31, 0.0  ;;  %v1370_v19 = vmax.f32 %v1242_v25, 0.0 }
 0x16b   : > { %v694_v53 = vmul.f32 %v7354_v48, %v544_v13  ;;  %v1244_v43 = vadd.f32 %v7376_v4, %v1094_v21  ;;  %v1247_v44 = vadd.f32 %v7379_v5, %v1097_v27  ;;  %v1246_v26 = vadd.f32 %v7369_v60, %v1096_v37 }
 0x16c   : > { %v1437_v6 = vpack.c.bf16 %v1369_v7, %v1365_v62  ;;  %v1436_v36 = vpack.c.bf16 %v1368_v34, %v1364_v18  ;;  %v8271_v51 = vpack.c.bf16 %v1371_v1, %v1367_v15  ;;  %v8273_v0 = vpack.c.bf16 %v1370_v19, %v1366_v58 }
 0x16d   : > { %v823_v61 = vpop.permute.xlu1 %822  ;;  %v1373_v25 = vmax.f32 %v1245_v11, 0.0  ;;  %v1372_v62 = vmax.f32 %v1244_v43, 0.0  ;;  %v1375_v18 = vmax.f32 %v1247_v44, 0.0  ;;  %v1374_v15 = vmax.f32 %v1246_v26, 0.0  ;;  %v6569_v43 = vld [vmem:[#allocation3] ss:$16 sps:$4 sm:$0xff]  }
 0x16e   : > { %v970_v63 = vmul.f32 %v7333_v41, %v823_v61  ;;  %v971_v52 = vmul.f32 %v7348_v46, %v823_v61  ;;  %v972_v14 = vmul.f32 %v7336_v42, %v823_v61  ;;  %v973_v12 = vmul.f32 %v7351_v47, %v823_v61  ;;  %2406 = vmatprep.mubr.bf16.mxu0 %v1437_v6  ;;  %v6572_v44 = vld [vmem:[#allocation3 + $0x8] ss:$16 sps:$4 sm:$0xff]  }
 0x16f   : > { %2792 = vmatprep.mubr.bf16.mxu1 %v1437_v6  ;;  %2407 = vmatmul.mubr.bf16.gmra.mrb[56].mxu0 %v1436_v36  ;;  %v989_v41 = vadd.f32 %v8232_v9, %v8228_v29  ;;  %v581_v11 = vmul.f32 %v7345_v45, %v9130_v8  ;;  %v9135_v6 = vld [vmem:[#allocation16_spill] sm:$0xff] }
 0x170   : > { %v1098_v35 = vadd.f32 %v970_v63, %v691_v16  ;;  %v1099_v20 = vadd.f32 %v971_v52, %v692_v17  ;;  %v1100_v13 = vadd.f32 %v972_v14, %v693_v33  ;;  %v1101_v2 = vadd.f32 %v973_v12, %v694_v53  ;;  %2793 = vmatmul.mubr.bf16.gmra.mrb[56].mxu1 %v1436_v36  ;;  %v9136_v17 = vld [vmem:[#allocation17_spill] sm:$0xff]  ;;  %v9137_v33 = vld [vmem:[#allocation14_spill] sm:$0xff]  ;;  %v9138_v14 = vld [vmem:[#allocation12_spill] sm:$0xff] }
 0x171   : > { %v1139_v27 = vadd.f32 %v7379_v5, %v989_v41  ;;  %v865_v16 = vmul.f32 %v7351_v47, %v9135_v6  ;;  %v586_v53 = vmul.f32 %v7354_v48, %v9137_v33  ;;  %v1134_v12 = vadd.f32 %v7369_v60, %v9138_v14  ;;  %v9139_v47 = vld [vmem:[#allocation19_spill] sm:$0xff]  ;;  %v6607_v14 = vld [vmem:[#allocation3 + $0xc4] ss:$16 sps:$4 sm:$0xff]  }
 0x172   : > { %v1249_v46 = vadd.f32 %v7373_v3, %v1099_v20  ;;  %v1248_v59 = vadd.f32 %v7376_v4, %v1098_v35  ;;  %v1251_v31 = vadd.f32 %v7379_v5, %v1101_v2  ;;  %v1250_v21 = vadd.f32 %v7369_v60, %v1100_v13  ;;  %v9134_v4 = vld [vmem:[#allocation13_spill] sm:$0xff]  ;;  %v6577_v20 = vld [vmem:[#allocation3 + $0x24] ss:$16 sps:$4 sm:$0xff]   ;;  %v9140_v48 = vld [vmem:[#allocation15_spill] sm:$0xff] }
 0x173   : > { %v860_v3 = vmul.f32 %v7336_v42, %v9131_v55  ;;  %v1135_v9 = vadd.f32 %v7379_v5, %v9134_v4  ;;  %v1267_v63 = vmax.f32 %v1139_v27, 0.0  ;;  %v993_v52 = vadd.f32 %v865_v16, %v586_v53  ;;  %v6580_v13 = vld [vmem:[#allocation3 + $0x2c] ss:$16 sps:$4 sm:$0xff]   ;;  %v6587_v27 = vld [vmem:[#allocation3 + $0x60] ss:$16 sps:$4 sm:$0xff]  }
 0x174   : > { %v1377_v58 = vmax.f32 %v1249_v46, 0.0  ;;  %v1376_v7 = vmax.f32 %v1248_v59, 0.0  ;;  %v1379_v34 = vmax.f32 %v1251_v31, 0.0  ;;  %v1378_v1 = vmax.f32 %v1250_v21, 0.0  ;;  %v6575_v21 = vld [vmem:[#allocation3 + $0x20] ss:$16 sps:$4 sm:$0xff]  }
 0x175   : > { %v988_v55 = vadd.f32 %v860_v3, %v581_v11  ;;  %v1263_v61 = vmax.f32 %v1135_v9, 0.0  ;;  %v1147_v35 = vadd.f32 %v7379_v5, %v9139_v47  ;;  %v864_v2 = vmul.f32 %v7336_v42, %v9135_v6  ;;  %v6583_v42 = vld [vmem:[#allocation3 + $0x44] ss:$16 sps:$4 sm:$0xff]   ;;  %v6592_v3 = vld [vmem:[#allocation3 + $0x6c] ss:$16 sps:$4 sm:$0xff]  }
 0x176   : > { %v1441_v36 = vpack.c.bf16 %v1377_v58, %v1373_v25  ;;  %v1440_v19 = vpack.c.bf16 %v1376_v7, %v1372_v62  ;;  %v8292_v37 = vpack.c.bf16 %v1379_v34, %v1375_v18  ;;  %v8294_v29 = vpack.c.bf16 %v1378_v1, %v1374_v15  ;;  %v6578_v25 = vld [vmem:[#allocation3 + $0x28] ss:$16 sps:$4 sm:$0xff]   ;;  %v6586_v18 = vld [vmem:[#allocation3 + $0x4c] ss:$16 sps:$4 sm:$0xff]   ;;  %v9141_v34 = vld [vmem:[#allocation18_spill] sm:$0xff] }
 0x177   : > { %v1138_v8 = vadd.f32 %v7369_v60, %v988_v55  ;;  %v1387_v26 = vpack.c.bf16 %v1267_v63, %v1263_v61  ;;  %v1143_v41 = vadd.f32 %v7379_v5, %v993_v52  ;;  %v585_v46 = vmul.f32 %v7345_v45, %v9137_v33  ;;  %v6581_v45 = vld [vmem:[#allocation3 + $0x40] ss:$16 sps:$4 sm:$0xff]   ;;  %v6584_v1 = vld [vmem:[#allocation3 + $0x48] ss:$16 sps:$4 sm:$0xff]   ;;  %v6595_v6 = vld [vmem:[#allocation3 + $0x84] ss:$16 sps:$4 sm:$0xff]  }
 0x178   : > { %2416 = vmatprep.mubr.bf16.mxu0 %v1441_v36  ;;  %2802 = vmatprep.mubr.bf16.mxu1 %v1441_v36  ;;  %v1262_v59 = vmax.f32 %v1134_v12, 0.0  ;;  %v1275_v62 = vmax.f32 %v1147_v35, 0.0  ;;  %v1146_v5 = vadd.f32 %v7369_v60, %v9141_v34  ;;  %v6590_v11 = vld [vmem:[#allocation3 + $0x68] ss:$16 sps:$4 sm:$0xff]   ;;  %v6598_v16 = vld [vmem:[#allocation3 + $0x8c] ss:$16 sps:$4 sm:$0xff]  }
 0x179   : > { %2417 = vmatmul.mubr.bf16.gmra.mrb[60].mxu0 %v1440_v19  ;;  %2803 = vmatmul.mubr.bf16.gmra.mrb[60].mxu1 %v1440_v19  ;;  %v1266_v31 = vmax.f32 %v1138_v8, 0.0  ;;  %v992_v15 = vadd.f32 %v864_v2, %v585_v46  ;;  %v1271_v58 = vmax.f32 %v1143_v41, 0.0  ;;  %v6589_v19 = vld [vmem:[#allocation3 + $0x64] ss:$16 sps:$4 sm:$0xff]   ;;  %v6593_v33 = vld [vmem:[#allocation3 + $0x80] ss:$16 sps:$4 sm:$0xff]  }
 0x17a   : > { %2459 = vmatprep.mubr.bf16.mxu0 %v9136_v17  ;;  %2845 = vmatprep.mubr.bf16.mxu1 %v9136_v17  ;;  %v1274_v9 = vmax.f32 %v1146_v5, 0.0  ;;  %v6596_v53 = vld [vmem:[#allocation3 + $0x88] ss:$16 sps:$4 sm:$0xff]   ;;  %v6604_v61 = vld [vmem:[#allocation3 + $0xac] ss:$16 sps:$4 sm:$0xff]  }
 0x17b   : > { %v1386_v7 = vpack.c.bf16 %v1266_v31, %v1262_v59  ;;  %v1391_v36 = vpack.c.bf16 %v1275_v62, %v1271_v58  ;;  %v1142_v4 = vadd.f32 %v7369_v60, %v992_v15  ;;  %v6601_v60 = vld [vmem:[#allocation3 + $0xa4] ss:$16 sps:$4 sm:$0xff]   ;;  %v6599_v63 = vld [vmem:[#allocation3 + $0xa0] ss:$16 sps:$4 sm:$0xff]   ;;  %v6602_v52 = vld [vmem:[#allocation3 + $0xa8] ss:$16 sps:$4 sm:$0xff]  }
 0x17c   : > { %v6610_v12 = vld [vmem:[#allocation3 + $0xcc] ss:$16 sps:$4 sm:$0xff]   ;;  %v6605_v8 = vld [vmem:[#allocation3 + $0xc0] ss:$16 sps:$4 sm:$0xff]   ;;  %v6614_v35 = vld [vmem:[#allocation3 + $0xe8] ss:$16 sps:$4 sm:$0xff]  }
 0x17d   : > { %v1270_v17 = vmax.f32 %v1142_v4, 0.0  ;;  %v6611_v47 = vld [vmem:[#allocation3 + $0xe0] ss:$16 sps:$4 sm:$0xff]   ;;  %v6625_v41 = vld [vmem:[#allocation3 + $0x124] ss:$16 sps:$4 sm:$0xff]  }
 0x17e   : > { %v6617_v2 = vld [vmem:[#allocation3 + $0x100] ss:$16 sps:$4 sm:$0xff]   ;;  %v6626_v59 = vld [vmem:[#allocation3 + $0x128] ss:$16 sps:$4 sm:$0xff]   ;;  %v6631_v31 = vld [vmem:[#allocation3 + $0x144] ss:$16 sps:$4 sm:$0xff]  }
 0x17f   : > { %v1390_v55 = vpack.c.bf16 %v1274_v9, %v1270_v17  ;;  %v6623_v46 = vld [vmem:[#allocation3 + $0x120] ss:$16 sps:$4 sm:$0xff]   ;;  %v6632_v62 = vld [vmem:[#allocation3 + $0x148] ss:$16 sps:$4 sm:$0xff]   ;;  %v6643_v15 = vld [vmem:[#allocation3 + $0x184] ss:$16 sps:$4 sm:$0xff]  }
 0x180   : > { %v6646_v58 = vld [vmem:[#allocation3 + $0x18c] ss:$16 sps:$4 sm:$0xff]   ;;  %v6644_v34 = vld [vmem:[#allocation3 + $0x188] ss:$16 sps:$4 sm:$0xff]   ;;  %v6649_v5 = vld [vmem:[#allocation3 + $0x1a4] ss:$16 sps:$4 sm:$0xff]  }
 0x181   : > { %2460 = vmatmul.mubr.bf16.vlgmr.msra.gmra.mrb[0].mxu0 %v9140_v48  ;;  %2846 = vmatmul.mubr.bf16.vlgmr.msra.gmra.mrb[0].mxu1 %v9140_v48  ;;  %v6620_v48 = vld [vmem:[#allocation3 + $0x108] ss:$16 sps:$4 sm:$0xff]   ;;  %v6667_v4 = vld [vmem:[#allocation3 + $0x204] ss:$16 sps:$4 sm:$0xff]   ;;  %v6670_v9 = vld [vmem:[#allocation3 + $0x20c] ss:$16 sps:$4 sm:$0xff]  }
 0x182   : > { %2469 = vmatprep.mubr.bf16.mxu0 %v1387_v26  ;;  %2855 = vmatprep.mubr.bf16.mxu1 %v1387_v26  ;;  %v6616_v26 = vld [vmem:[#allocation3 + $0xec] ss:$16 sps:$4 sm:$0xff]  }
 0x183   : > { %3989 = vmatpush1.bf16.msra.mxu0 %v6569_v43  ;;  %4375 = vmatpush1.bf16.msra.mxu1 %v6572_v44  ;;  %v6608_v43 = vld [vmem:[#allocation3 + $0xc8] ss:$16 sps:$4 sm:$0xff]   ;;  %v6613_v44 = vld [vmem:[#allocation3 + $0xe4] ss:$16 sps:$4 sm:$0xff]  }
 0x184   : > { %3990 = vmatprep.subr.bf16.mxu0 %v6577_v20  ;;  %4376 = vmatprep.subr.bf16.mxu1 %v6580_v13  ;;  %v6619_v20 = vld [vmem:[#allocation3 + $0x104] ss:$16 sps:$4 sm:$0xff]   ;;  %v6622_v13 = vld [vmem:[#allocation3 + $0x10c] ss:$16 sps:$4 sm:$0xff]  }
 0x187   : > { %3991 = vmatpush1.bf16.msra.mxu0 %v6575_v21  ;;  %4377 = vmatpush1.bf16.msra.mxu1 %v6578_v25  ;;  %v6634_v21 = vld [vmem:[#allocation3 + $0x14c] ss:$16 sps:$4 sm:$0xff]   ;;  %v6629_v25 = vld [vmem:[#allocation3 + $0x140] ss:$16 sps:$4 sm:$0xff]  }
 0x188   : > { %3992 = vmatprep.subr.bf16.mxu0 %v6583_v42  ;;  %4378 = vmatprep.subr.bf16.mxu1 %v6586_v18  ;;  %v6637_v42 = vld [vmem:[#allocation3 + $0x164] ss:$16 sps:$4 sm:$0xff]   ;;  %v6638_v18 = vld [vmem:[#allocation3 + $0x168] ss:$16 sps:$4 sm:$0xff]  }
 0x189   : > { %2470 = vmatmul.mubr.bf16.gmra.mrb[4].mxu0 %v1386_v7  ;;  %2856 = vmatmul.mubr.bf16.gmra.mrb[4].mxu1 %v1386_v7  ;;  %v6641_v7 = vld [vmem:[#allocation3 + $0x180] ss:$16 sps:$4 sm:$0xff]  }
 0x18a   : > { %2479 = vmatprep.mubr.bf16.mxu0 %v1391_v36  ;;  %2865 = vmatprep.mubr.bf16.mxu1 %v1391_v36  ;;  %v6658_v36 = vld [vmem:[#allocation3 + $0x1cc] ss:$16 sps:$4 sm:$0xff]  }
 0x18b   : > { %3993 = vmatpush1.bf16.msra.mxu0 %v6581_v45  ;;  %4379 = vmatpush1.bf16.msra.mxu1 %v6584_v1  ;;  %v6650_v45 = vld [vmem:[#allocation3 + $0x1a8] ss:$16 sps:$4 sm:$0xff]   ;;  %v6655_v1 = vld [vmem:[#allocation3 + $0x1c4] ss:$16 sps:$4 sm:$0xff]  }
 0x18c   : > { %3994 = vmatprep.subr.bf16.mxu0 %v6589_v19  ;;  %4380 = vmatprep.subr.bf16.mxu1 %v6592_v3  ;;  %v6653_v19 = vld [vmem:[#allocation3 + $0x1c0] ss:$16 sps:$4 sm:$0xff]   ;;  %v6656_v3 = vld [vmem:[#allocation3 + $0x1c8] ss:$16 sps:$4 sm:$0xff]  }
 0x18f   : > { %3995 = vmatpush1.bf16.msra.mxu0 %v6587_v27  ;;  %4381 = vmatpush1.bf16.msra.mxu1 %v6590_v11  ;;  %v9148_v27 = vld [vmem:[#allocation26_spill] sm:$0xff] }
 0x190   : > { %3996 = vmatprep.subr.bf16.mxu0 %v6595_v6  ;;  %4382 = vmatprep.subr.bf16.mxu1 %v6598_v16  ;;  %v1572_v11 = vld [vmem:[%s9045_s4] sm:$0xf] }
 0x191   : > { %2480 = vmatmul.mubr.bf16.gmra.mrb[8].mxu0 %v1390_v55  ;;  %2866 = vmatmul.mubr.bf16.gmra.mrb[8].mxu1 %v1390_v55  ;;  %v9149_v6 = vld [vmem:[#allocation6_spill] sm:$0xff]  ;;  %v9151_v55 = vld [vmem:[#allocation8_spill] sm:$0xff] }
 0x192   : > { %2489 = vmatprep.mubr.bf16.mxu0 %v7921_v30  ;;  %2875 = vmatprep.mubr.bf16.mxu1 %v7921_v30  ;;  %v9142_v30 = vld [vmem:[#allocation29_spill] sm:$0xff]  ;;  %v8380_v16 = vrot.slane %v1572_v11, %v9149_v6 }
 0x193   : > { %3997 = vmatpush1.bf16.msra.mxu0 %v6593_v33  ;;  %4383 = vmatpush1.bf16.msra.mxu1 %v6596_v53  ;;  %v9152_v33 = vld [vmem:[#allocation9_spill] sm:$0xff] }
 0x194   : > { %3998 = vmatprep.subr.bf16.mxu0 %v6601_v60  ;;  %4384 = vmatprep.subr.bf16.mxu1 %v6604_v61  ;;  %v8389_v53 = vrot.slane %v1572_v11, %v9152_v33 }
 0x197   : > { %3999 = vmatpush1.bf16.msra.mxu0 %v6599_v63  ;;  %4385 = vmatpush1.bf16.msra.mxu1 %v6602_v52 }
 0x198   : > { %4000 = vmatprep.subr.bf16.mxu0 %v6607_v14  ;;  %4386 = vmatprep.subr.bf16.mxu1 %v6610_v12 }
 0x199   : > { %2490 = vmatmul.mubr.bf16.gmra.mrb[12].mxu0 %v7948_v54  ;;  %2876 = vmatmul.mubr.bf16.gmra.mrb[12].mxu1 %v7948_v54  ;;  %v6628_v54 = vld [vmem:[#allocation3 + $0x12c] ss:$16 sps:$4 sm:$0xff]  }
 0x19a   : > { %2499 = vmatprep.mubr.bf16.mxu0 %v9142_v30  ;;  %2885 = vmatprep.mubr.bf16.mxu1 %v9142_v30 }
 0x19b   : > { %4001 = vmatpush1.bf16.msra.mxu0 %v6605_v8  ;;  %4387 = vmatpush1.bf16.msra.mxu1 %v6608_v43 }
 0x19c   : > { %4002 = vmatprep.subr.bf16.mxu0 %v6613_v44  ;;  %4388 = vmatprep.subr.bf16.mxu1 %v6616_v26 }
 0x19f   : > { %4003 = vmatpush1.bf16.msra.mxu0 %v6611_v47  ;;  %4389 = vmatpush1.bf16.msra.mxu1 %v6614_v35 }
 0x1a0   : > { %4004 = vmatprep.subr.bf16.mxu0 %v6619_v20  ;;  %4390 = vmatprep.subr.bf16.mxu1 %v6622_v13 }
 0x1a1   : > { %2500 = vmatmul.mubr.bf16.gmra.mrb[16].mxu0 %v8057_v39  ;;  %2886 = vmatmul.mubr.bf16.gmra.mrb[16].mxu1 %v8057_v39  ;;  %v6640_v39 = vld [vmem:[#allocation3 + $0x16c] ss:$16 sps:$4 sm:$0xff]  }
 0x1a2   : > { %2509 = vmatprep.mubr.bf16.mxu0 %v8061_v22  ;;  %2895 = vmatprep.mubr.bf16.mxu1 %v8061_v22  ;;  %v6635_v22 = vld [vmem:[#allocation3 + $0x160] ss:$16 sps:$4 sm:$0xff]  }
 0x1a3   : > { %4005 = vmatpush1.bf16.msra.mxu0 %v6617_v2  ;;  %4391 = vmatpush1.bf16.msra.mxu1 %v6620_v48 }
 0x1a4   : > { %4006 = vmatprep.subr.bf16.mxu0 %v6625_v41  ;;  %4392 = vmatprep.subr.bf16.mxu1 %v6628_v54 }
 0x1a7   : > { %4007 = vmatpush1.bf16.msra.mxu0 %v6623_v46  ;;  %4393 = vmatpush1.bf16.msra.mxu1 %v6626_v59 }
 0x1a8   : > { %4008 = vmatprep.subr.bf16.mxu0 %v6631_v31  ;;  %4394 = vmatprep.subr.bf16.mxu1 %v6634_v21 }
 0x1a9   : > { %2510 = vmatmul.mubr.bf16.gmra.mrb[20].mxu0 %v8069_v50  ;;  %2896 = vmatmul.mubr.bf16.gmra.mrb[20].mxu1 %v8069_v50  ;;  %v6652_v50 = vld [vmem:[#allocation3 + $0x1ac] ss:$16 sps:$4 sm:$0xff]  }
 0x1aa   : > { %2519 = vmatprep.mubr.bf16.mxu0 %v8077_v23  ;;  %2905 = vmatprep.mubr.bf16.mxu1 %v8077_v23  ;;  %v6647_v23 = vld [vmem:[#allocation3 + $0x1a0] ss:$16 sps:$4 sm:$0xff]  }
 0x1ab   : > { %4009 = vmatpush1.bf16.msra.mxu0 %v6629_v25  ;;  %4395 = vmatpush1.bf16.msra.mxu1 %v6632_v62 }
 0x1ac   : > { %4010 = vmatprep.subr.bf16.mxu0 %v6637_v42  ;;  %4396 = vmatprep.subr.bf16.mxu1 %v6640_v39 }
 0x1af   : > { %4011 = vmatpush1.bf16.msra.mxu0 %v6635_v22  ;;  %4397 = vmatpush1.bf16.msra.mxu1 %v6638_v18  ;;  %v6665_v18 = vld [vmem:[#allocation3 + $0x200] ss:$16 sps:$4 sm:$0xff]  }
 0x1b0   : > { %4012 = vmatprep.subr.bf16.mxu0 %v6643_v15  ;;  %4398 = vmatprep.subr.bf16.mxu1 %v6646_v58  ;;  %v6668_v15 = vld [vmem:[#allocation3 + $0x208] ss:$16 sps:$4 sm:$0xff]  }
 0x1b1   : > { %2520 = vmatmul.mubr.bf16.gmra.mrb[24].mxu0 %v8099_v40  ;;  %2906 = vmatmul.mubr.bf16.gmra.mrb[24].mxu1 %v8099_v40  ;;  %v9143_v40 = vld [vmem:[#allocation24_spill] sm:$0xff] }
 0x1b2   : > { %2529 = vmatprep.mubr.bf16.mxu0 %v8109_v24  ;;  %2915 = vmatprep.mubr.bf16.mxu1 %v8109_v24  ;;  %v9144_v24 = vld [vmem:[#allocation21_spill] sm:$0xff] }
 0x1b3   : > { %4013 = vmatpush1.bf16.msra.mxu0 %v6641_v7  ;;  %4399 = vmatpush1.bf16.msra.mxu1 %v6644_v34 }
 0x1b4   : > { %4014 = vmatprep.subr.bf16.mxu0 %v6649_v5  ;;  %4400 = vmatprep.subr.bf16.mxu1 %v6652_v50  ;;  %v6673_v50 = vld [vmem:[#allocation3 + $0x224] ss:$16 sps:$4 sm:$0xff]  }
 0x1b7   : > { %4015 = vmatpush1.bf16.msra.mxu0 %v6647_v23  ;;  %4401 = vmatpush1.bf16.msra.mxu1 %v6650_v45  ;;  %v6676_v23 = vld [vmem:[#allocation3 + $0x22c] ss:$16 sps:$4 sm:$0xff]  }
 0x1b8   : > { %4016 = vmatprep.subr.bf16.mxu0 %v6655_v1  ;;  %4402 = vmatprep.subr.bf16.mxu1 %v6658_v36 }
 0x1b9   : > { %2530 = vmatmul.mubr.bf16.gmra.mrb[28].mxu0 %v8127_v10  ;;  %2916 = vmatmul.mubr.bf16.gmra.mrb[28].mxu1 %v8127_v10  ;;  %v9145_v10 = vld [vmem:[#allocation20_spill] sm:$0xff] }
 0x1ba   : > { %2539 = vmatprep.mubr.bf16.mxu0 %v8129_v38  ;;  %2925 = vmatprep.mubr.bf16.mxu1 %v8129_v38  ;;  %v6659_v38 = vld [vmem:[#allocation3 + $0x1e0] ss:$16 sps:$4 sm:$0xff]  }
 0x1bb   : > { %4017 = vmatpush1.bf16.msra.mxu0 %v6653_v19  ;;  %4403 = vmatpush1.bf16.msra.mxu1 %v6656_v3 }
 0x1c1   : > { %2540 = vmatmul.mubr.bf16.gmra.mrb[32].mxu0 %v8133_v32  ;;  %2926 = vmatmul.mubr.bf16.gmra.mrb[32].mxu1 %v8133_v32  ;;  %v6661_v32 = vld [vmem:[#allocation3 + $0x1e4] ss:$16 sps:$4 sm:$0xff]  }
 0x1c2   : > { %2549 = vmatprep.mubr.bf16.mxu0 %v8147_v49  ;;  %2935 = vmatprep.mubr.bf16.mxu1 %v8147_v49  ;;  %v6662_v49 = vld [vmem:[#allocation3 + $0x1e8] ss:$16 sps:$4 sm:$0xff]  }
 0x1c3   : > { %4018 = vmatprep.subr.bf16.mxu0 %v6661_v32 }
 0x1c4   : > { %4019 = vmatpush1.bf16.msra.mxu0 %v6659_v38 }
 0x1c5   : > { %4181 = vmatprep.subr.bf16.mxu0 %v6667_v4 }
 0x1c9   : > { %2550 = vmatmul.mubr.bf16.gmra.mrb[36].mxu0 %v8161_v56  ;;  %2936 = vmatmul.mubr.bf16.gmra.mrb[36].mxu1 %v8161_v56  ;;  %v6664_v56 = vld [vmem:[#allocation3 + $0x1ec] ss:$16 sps:$4 sm:$0xff]  }
 0x1ca   : > { %2559 = vmatprep.mubr.bf16.mxu0 %v8168_v28  ;;  %2945 = vmatprep.mubr.bf16.mxu1 %v8168_v28  ;;  %v9146_v28 = vld [vmem:[#allocation23_spill] sm:$0xff] }
 0x1cb   : > { %4404 = vmatprep.subr.bf16.mxu1 %v6664_v56  ;;  %v6674_v56 = vld [vmem:[#allocation3 + $0x228] ss:$16 sps:$4 sm:$0xff]  }
 0x1cc   : > { %4405 = vmatpush1.bf16.msra.mxu1 %v6662_v49  ;;  %v6671_v49 = vld [vmem:[#allocation3 + $0x220] ss:$16 sps:$4 sm:$0xff]  }
 0x1cd   : > { %4567 = vmatprep.subr.bf16.mxu1 %v6670_v9 }
 0x1d1   : > { %2560 = vmatmul.mubr.bf16.gmra.mrb[40].mxu0 %v8170_v57  ;;  %2946 = vmatmul.mubr.bf16.gmra.mrb[40].mxu1 %v8170_v57  ;;  %v9147_v57 = vld [vmem:[#allocation22_spill] sm:$0xff] }
 0x1d2   : > { %2569 = vmatprep.mubr.bf16.mxu0 %v9143_v40  ;;  %2955 = vmatprep.mubr.bf16.mxu1 %v9143_v40 }
 0x1d9   : > { %2570 = vmatmul.mubr.bf16.gmra.mrb[44].mxu0 %v9144_v24  ;;  %2956 = vmatmul.mubr.bf16.gmra.mrb[44].mxu1 %v9144_v24 }
 0x1da   : > { %2579 = vmatprep.mubr.bf16.mxu0 %v9145_v10  ;;  %2965 = vmatprep.mubr.bf16.mxu1 %v9145_v10 }
 0x1e1   : > { %2580 = vmatmul.mubr.bf16.gmra.mrb[48].mxu0 %v9146_v28  ;;  %2966 = vmatmul.mubr.bf16.gmra.mrb[48].mxu1 %v9146_v28  ;;  %v6679_v28 = vld [vmem:[#allocation3 + $0x244] ss:$16 sps:$4 sm:$0xff]  }
 0x1e2   : > { %2589 = vmatprep.mubr.bf16.mxu0 %v9147_v57  ;;  %2975 = vmatprep.mubr.bf16.mxu1 %v9147_v57 }
 0x1e9   : > { %2590 = vmatmul.mubr.bf16.gmra.mrb[52].mxu0 %v9148_v27  ;;  %2976 = vmatmul.mubr.bf16.gmra.mrb[52].mxu1 %v9148_v27 }
 0x1ea   : > { %2599 = vmatprep.mubr.bf16.mxu0 %v8271_v51  ;;  %2985 = vmatprep.mubr.bf16.mxu1 %v8271_v51  ;;  %v9150_v51 = vld [vmem:[#allocation7_spill] sm:$0xff] }
 0x1eb   : > { %v8383_v17 = vrot.slane %v1572_v11, %v9150_v51 }
 0x1f1   : > { %2600 = vmatmul.mubr.bf16.gmra.mrb[56].mxu0 %v8273_v0  ;;  %2986 = vmatmul.mubr.bf16.gmra.mrb[56].mxu1 %v8273_v0  ;;  %v8386_v0 = vrot.slane %v1572_v11, %v9151_v55  ;;  %v6682_v11 = vld [vmem:[#allocation3 + $0x24c] ss:$16 sps:$4 sm:$0xff]  }
 0x1f2   : > { %2609 = vmatprep.mubr.bf16.mxu0 %v8292_v37  ;;  %2995 = vmatprep.mubr.bf16.mxu1 %v8292_v37 }
 0x1f9   : > { %2610 = vmatmul.mubr.bf16.gmra.mrb[60].mxu0 %v8294_v29  ;;  %2996 = vmatmul.mubr.bf16.gmra.mrb[60].mxu1 %v8294_v29 }
 0x254   : > { %v2461_v37 = vpop.f32.mrb[0].mxu0  ;;  %v2847_v60 = vpop.f32.mrb[0].mxu1 }
 0x255   : > { %v5801_v29 = vadd.f32 %v2461_v37, %v8380_v16  ;;  %v5865_v61 = vadd.f32 %v2847_v60, %v8383_v17  ;;  %v2463_v63 = vpop.f32.mrb[1].mxu0  ;;  %v2849_v52 = vpop.f32.mrb[1].mxu1 }
 0x256   : > { %v5802_v14 = vadd.f32 %v2463_v63, %v8386_v0  ;;  %v5866_v12 = vadd.f32 %v2849_v52, %v8389_v53  ;;  %v2465_v8 = vpop.f32.mrb[2].mxu0  ;;  %v2851_v43 = vpop.f32.mrb[2].mxu1 }
 0x257   : > { %v5803_v44 = vadd.f32 %v2465_v8, %v8380_v16  ;;  %v5867_v26 = vadd.f32 %v2851_v43, %v8383_v17  ;;  %v2467_v30 = vpop.f32.mrb[3].mxu0  ;;  %v2853_v47 = vpop.f32.mrb[3].mxu1  ;;  %v3006_v13 = vmax.f32 %v5801_v29, 0.0  ;;  %v3008_v2 = vmax.f32 %v5865_v61, 0.0 }
 0x258   : > { %v5804_v35 = vadd.f32 %v2467_v30, %v8386_v0  ;;  %v5868_v20 = vadd.f32 %v2853_v47, %v8389_v53  ;;  %v3007_v54 = vmax.f32 %v5802_v14, 0.0  ;;  %v3009_v46 = vmax.f32 %v5866_v12, 0.0 }
 0x259   : > { %v3010_v48 = vmax.f32 %v5803_v44, 0.0  ;;  %v3012_v41 = vmax.f32 %v5867_v26, 0.0  ;;  %v6677_v44 = vld [vmem:[#allocation3 + $0x240] ss:$16 sps:$4 sm:$0xff]   ;;  %v6680_v26 = vld [vmem:[#allocation3 + $0x248] ss:$16 sps:$4 sm:$0xff]  }
 0x25a   : > { %v3011_v59 = vmax.f32 %v5804_v35, 0.0  ;;  %v3013_v31 = vmax.f32 %v5868_v20, 0.0 }
 0x25b   : > { %v3134_v21 = vpack.c.bf16 %v3010_v48, %v3006_v13  ;;  %v8399_v25 = vpack.c.bf16 %v3012_v41, %v3008_v2  ;;  %v6685_v13 = vld [vmem:[#allocation3 + $0x264] ss:$16 sps:$4 sm:$0xff]   ;;  %v6688_v2 = vld [vmem:[#allocation3 + $0x26c] ss:$16 sps:$4 sm:$0xff]  }
 0x25c   : > { %v3135_v62 = vpack.c.bf16 %v3011_v59, %v3007_v54  ;;  %v8401_v42 = vpack.c.bf16 %v3013_v31, %v3009_v46  ;;  %v2471_v39 = vpop.f32.mrb[4].mxu0  ;;  %v2857_v22 = vpop.f32.mrb[4].mxu1 }
 0x25d   : > { %v5805_v58 = vadd.f32 %v2471_v39, %v8380_v16  ;;  %v5869_v7 = vadd.f32 %v2857_v22, %v8383_v17  ;;  %v2473_v34 = vpop.f32.mrb[5].mxu0  ;;  %v2859_v5 = vpop.f32.mrb[5].mxu1 }
 0x25e   : > { %v5806_v45 = vadd.f32 %v2473_v34, %v8386_v0  ;;  %v5870_v1 = vadd.f32 %v2859_v5, %v8389_v53  ;;  %v2475_v36 = vpop.f32.mrb[6].mxu0  ;;  %v2861_v19 = vpop.f32.mrb[6].mxu1  ;;  %4020 = vmatprep.mubr.bf16.mxu0 %v3135_v62  ;;  %4406 = vmatprep.mubr.bf16.mxu1 %v3135_v62 }
 0x25f   : > { %v5807_v3 = vadd.f32 %v2475_v36, %v8380_v16  ;;  %v5871_v40 = vadd.f32 %v2861_v19, %v8383_v17  ;;  %v2477_v24 = vpop.f32.mrb[7].mxu0  ;;  %v2863_v10 = vpop.f32.mrb[7].mxu1  ;;  %4021 = vmatmul.mubr.bf16.vlgmr.msra.gmra.mrb[64].mxu0 %v3134_v21  ;;  %4407 = vmatmul.mubr.bf16.vlgmr.msra.gmra.mrb[64].mxu1 %v3134_v21  ;;  %v3014_v57 = vmax.f32 %v5805_v58, 0.0  ;;  %v3016_v4 = vmax.f32 %v5869_v7, 0.0  ;;  %v6691_v58 = vld [vmem:[#allocation3 + $0x284] ss:$16 sps:$4 sm:$0xff]  }
 0x260   : > { %v5808_v38 = vadd.f32 %v2477_v24, %v8386_v0  ;;  %v5872_v32 = vadd.f32 %v2863_v10, %v8389_v53  ;;  %4182 = vmatpush1.bf16.msra.mxu0 %v6665_v18  ;;  %4568 = vmatpush1.bf16.msra.mxu1 %v6668_v15  ;;  %v3015_v37 = vmax.f32 %v5806_v45, 0.0  ;;  %v3017_v60 = vmax.f32 %v5870_v1, 0.0  ;;  %v6683_v18 = vld [vmem:[#allocation3 + $0x260] ss:$16 sps:$4 sm:$0xff]   ;;  %v6686_v15 = vld [vmem:[#allocation3 + $0x268] ss:$16 sps:$4 sm:$0xff]  }
 0x261   : > { %v3018_v9 = vmax.f32 %v5807_v3, 0.0  ;;  %v3020_v27 = vmax.f32 %v5871_v40, 0.0  ;;  %4183 = vmatprep.subr.bf16.mxu0 %v6673_v50  ;;  %4569 = vmatprep.subr.bf16.mxu1 %v6676_v23  ;;  %v6694_v23 = vld [vmem:[#allocation3 + $0x28c] ss:$16 sps:$4 sm:$0xff]  }
 0x262   : > { %v3019_v29 = vmax.f32 %v5808_v38, 0.0  ;;  %v3021_v61 = vmax.f32 %v5872_v32, 0.0 }
 0x263   : > { %v3138_v63 = vpack.c.bf16 %v3018_v9, %v3014_v57  ;;  %v8411_v52 = vpack.c.bf16 %v3020_v27, %v3016_v4  ;;  %v6697_v27 = vld [vmem:[#allocation3 + $0x2a4] ss:$16 sps:$4 sm:$0xff]  }
 0x264   : > { %v3139_v14 = vpack.c.bf16 %v3019_v29, %v3015_v37  ;;  %v8413_v12 = vpack.c.bf16 %v3021_v61, %v3017_v60  ;;  %v2481_v8 = vpop.f32.mrb[8].mxu0  ;;  %v2867_v43 = vpop.f32.mrb[8].mxu1  ;;  %4184 = vmatpush1.bf16.msra.mxu0 %v6671_v49  ;;  %4570 = vmatpush1.bf16.msra.mxu1 %v6674_v56  ;;  %v6689_v49 = vld [vmem:[#allocation3 + $0x280] ss:$16 sps:$4 sm:$0xff]   ;;  %v6692_v56 = vld [vmem:[#allocation3 + $0x288] ss:$16 sps:$4 sm:$0xff]  }
 0x265   : > { %v5809_v30 = vadd.f32 %v2481_v8, %v8380_v16  ;;  %v5873_v47 = vadd.f32 %v2867_v43, %v8383_v17  ;;  %v2483_v35 = vpop.f32.mrb[9].mxu0  ;;  %v2869_v20 = vpop.f32.mrb[9].mxu1  ;;  %4185 = vmatprep.subr.bf16.mxu0 %v6679_v28  ;;  %4571 = vmatprep.subr.bf16.mxu1 %v6682_v11  ;;  %v6700_v11 = vld [vmem:[#allocation3 + $0x2ac] ss:$16 sps:$4 sm:$0xff]  }
 0x266   : > { %v5810_v48 = vadd.f32 %v2483_v35, %v8386_v0  ;;  %v5874_v41 = vadd.f32 %v2869_v20, %v8389_v53  ;;  %v2485_v54 = vpop.f32.mrb[10].mxu0  ;;  %v2871_v46 = vpop.f32.mrb[10].mxu1  ;;  %4030 = vmatprep.mubr.bf16.mxu0 %v3139_v14  ;;  %4416 = vmatprep.mubr.bf16.mxu1 %v3139_v14  ;;  %v6703_v35 = vld [vmem:[#allocation3 + $0x2c4] ss:$16 sps:$4 sm:$0xff]  }
 0x267   : > { %v5811_v59 = vadd.f32 %v2485_v54, %v8380_v16  ;;  %v5875_v31 = vadd.f32 %v2871_v46, %v8383_v17  ;;  %v2487_v21 = vpop.f32.mrb[11].mxu0  ;;  %v2873_v62 = vpop.f32.mrb[11].mxu1  ;;  %4031 = vmatmul.mubr.bf16.gmra.mrb[68].mxu0 %v3138_v63  ;;  %4417 = vmatmul.mubr.bf16.gmra.mrb[68].mxu1 %v3138_v63  ;;  %v3022_v7 = vmax.f32 %v5809_v30, 0.0  ;;  %v3024_v34 = vmax.f32 %v5873_v47, 0.0  ;;  %v6695_v30 = vld [vmem:[#allocation3 + $0x2a0] ss:$16 sps:$4 sm:$0xff]  }
 0x268   : > { %v5812_v39 = vadd.f32 %v2487_v21, %v8386_v0  ;;  %v5876_v22 = vadd.f32 %v2873_v62, %v8389_v53  ;;  %4186 = vmatpush1.bf16.msra.mxu0 %v6677_v44  ;;  %4572 = vmatpush1.bf16.msra.mxu1 %v6680_v26  ;;  %v3023_v45 = vmax.f32 %v5810_v48, 0.0  ;;  %v3025_v1 = vmax.f32 %v5874_v41, 0.0  ;;  %v6698_v47 = vld [vmem:[#allocation3 + $0x2a8] ss:$16 sps:$4 sm:$0xff]   ;;  %v6706_v41 = vld [vmem:[#allocation3 + $0x2cc] ss:$16 sps:$4 sm:$0xff]  }
 0x269   : > { %v3026_v5 = vmax.f32 %v5811_v59, 0.0  ;;  %v3028_v50 = vmax.f32 %v5875_v31, 0.0  ;;  %4187 = vmatprep.subr.bf16.mxu0 %v6685_v13  ;;  %4573 = vmatprep.subr.bf16.mxu1 %v6688_v2 }
 0x26a   : > { %v3027_v36 = vmax.f32 %v5812_v39, 0.0  ;;  %v3029_v19 = vmax.f32 %v5876_v22, 0.0 }
 0x26b   : > { %v3142_v3 = vpack.c.bf16 %v3026_v5, %v3022_v7  ;;  %v8423_v40 = vpack.c.bf16 %v3028_v50, %v3024_v34  ;;  %v6704_v7 = vld [vmem:[#allocation3 + $0x2c8] ss:$16 sps:$4 sm:$0xff]  }
 0x26c   : > { %v3143_v24 = vpack.c.bf16 %v3027_v36, %v3023_v45  ;;  %v8425_v10 = vpack.c.bf16 %v3029_v19, %v3025_v1  ;;  %v2491_v38 = vpop.f32.mrb[12].mxu0  ;;  %v2877_v32 = vpop.f32.mrb[12].mxu1  ;;  %4188 = vmatpush1.bf16.msra.mxu0 %v6683_v18  ;;  %4574 = vmatpush1.bf16.msra.mxu1 %v6686_v15  ;;  %v6709_v45 = vld [vmem:[#allocation3 + $0x2e4] ss:$16 sps:$4 sm:$0xff]   ;;  %v6712_v1 = vld [vmem:[#allocation3 + $0x2ec] ss:$16 sps:$4 sm:$0xff]  }
 0x26d   : > { %v5813_v28 = vadd.f32 %v2491_v38, %v8380_v16  ;;  %v5877_v57 = vadd.f32 %v2877_v32, %v8383_v17  ;;  %v2493_v4 = vpop.f32.mrb[13].mxu0  ;;  %v2879_v9 = vpop.f32.mrb[13].mxu1  ;;  %4189 = vmatprep.subr.bf16.mxu0 %v6691_v58  ;;  %4575 = vmatprep.subr.bf16.mxu1 %v6694_v23  ;;  %v6701_v58 = vld [vmem:[#allocation3 + $0x2c0] ss:$16 sps:$4 sm:$0xff]  }
 0x26e   : > { %v5814_v37 = vadd.f32 %v2493_v4, %v8386_v0  ;;  %v5878_v60 = vadd.f32 %v2879_v9, %v8389_v53  ;;  %v2495_v29 = vpop.f32.mrb[14].mxu0  ;;  %v2881_v61 = vpop.f32.mrb[14].mxu1  ;;  %4040 = vmatprep.mubr.bf16.mxu0 %v3143_v24  ;;  %4426 = vmatprep.mubr.bf16.mxu1 %v3143_v24  ;;  %v6707_v4 = vld [vmem:[#allocation3 + $0x2e0] ss:$16 sps:$4 sm:$0xff]   ;;  %v6710_v9 = vld [vmem:[#allocation3 + $0x2e8] ss:$16 sps:$4 sm:$0xff]  }
 0x26f   : > { %v5815_v63 = vadd.f32 %v2495_v29, %v8380_v16  ;;  %v5879_v14 = vadd.f32 %v2881_v61, %v8383_v17  ;;  %v2497_v8 = vpop.f32.mrb[15].mxu0  ;;  %v2883_v43 = vpop.f32.mrb[15].mxu1  ;;  %4041 = vmatmul.mubr.bf16.gmra.mrb[72].mxu0 %v3142_v3  ;;  %4427 = vmatmul.mubr.bf16.gmra.mrb[72].mxu1 %v3142_v3  ;;  %v3030_v20 = vmax.f32 %v5813_v28, 0.0  ;;  %v3032_v13 = vmax.f32 %v5877_v57, 0.0  ;;  %v6718_v61 = vld [vmem:[#allocation3 + $0x30c] ss:$16 sps:$4 sm:$0xff]  }
 0x270   : > { %v5816_v44 = vadd.f32 %v2497_v8, %v8386_v0  ;;  %v5880_v26 = vadd.f32 %v2883_v43, %v8389_v53  ;;  %4190 = vmatpush1.bf16.msra.mxu0 %v6689_v49  ;;  %4576 = vmatpush1.bf16.msra.mxu1 %v6692_v56  ;;  %v3031_v54 = vmax.f32 %v5814_v37, 0.0  ;;  %v3033_v46 = vmax.f32 %v5878_v60, 0.0 }
 0x271   : > { %v3034_v2 = vmax.f32 %v5815_v63, 0.0  ;;  %v3036_v48 = vmax.f32 %v5879_v14, 0.0  ;;  %4191 = vmatprep.subr.bf16.mxu0 %v6697_v27  ;;  %4577 = vmatprep.subr.bf16.mxu1 %v6700_v11  ;;  %v6715_v27 = vld [vmem:[#allocation3 + $0x304] ss:$16 sps:$4 sm:$0xff]  }
 0x272   : > { %v3035_v59 = vmax.f32 %v5816_v44, 0.0  ;;  %v3037_v31 = vmax.f32 %v5880_v26, 0.0 }
 0x273   : > { %v3146_v21 = vpack.c.bf16 %v3034_v2, %v3030_v20  ;;  %v8435_v62 = vpack.c.bf16 %v3036_v48, %v3032_v13  ;;  %v6713_v13 = vld [vmem:[#allocation3 + $0x300] ss:$16 sps:$4 sm:$0xff]   ;;  %v6716_v2 = vld [vmem:[#allocation3 + $0x308] ss:$16 sps:$4 sm:$0xff]  }
 0x274   : > { %v3147_v39 = vpack.c.bf16 %v3035_v59, %v3031_v54  ;;  %v8437_v22 = vpack.c.bf16 %v3037_v31, %v3033_v46  ;;  %v2501_v18 = vpop.f32.mrb[16].mxu0  ;;  %v2887_v15 = vpop.f32.mrb[16].mxu1  ;;  %4192 = vmatpush1.bf16.msra.mxu0 %v6695_v30  ;;  %4578 = vmatpush1.bf16.msra.mxu1 %v6698_v47  ;;  %v6721_v59 = vld [vmem:[#allocation3 + $0x324] ss:$16 sps:$4 sm:$0xff]   ;;  %v6724_v31 = vld [vmem:[#allocation3 + $0x32c] ss:$16 sps:$4 sm:$0xff]  }
 0x275   : > { %v5817_v34 = vadd.f32 %v2501_v18, %v8380_v16  ;;  %v5881_v5 = vadd.f32 %v2887_v15, %v8383_v17  ;;  %v2503_v50 = vpop.f32.mrb[17].mxu0  ;;  %v2889_v23 = vpop.f32.mrb[17].mxu1  ;;  %4193 = vmatprep.subr.bf16.mxu0 %v6703_v35  ;;  %4579 = vmatprep.subr.bf16.mxu1 %v6706_v41 }
 0x276   : > { %v5818_v36 = vadd.f32 %v2503_v50, %v8386_v0  ;;  %v5882_v19 = vadd.f32 %v2889_v23, %v8389_v53  ;;  %v2505_v3 = vpop.f32.mrb[18].mxu0  ;;  %v2891_v24 = vpop.f32.mrb[18].mxu1  ;;  %4050 = vmatprep.mubr.bf16.mxu0 %v3147_v39  ;;  %4436 = vmatprep.mubr.bf16.mxu1 %v3147_v39 }
 0x277   : > { %v5819_v38 = vadd.f32 %v2505_v3, %v8380_v16  ;;  %v5883_v32 = vadd.f32 %v2891_v24, %v8383_v17  ;;  %v2507_v49 = vpop.f32.mrb[19].mxu0  ;;  %v2893_v56 = vpop.f32.mrb[19].mxu1  ;;  %4051 = vmatmul.mubr.bf16.gmra.mrb[76].mxu0 %v3146_v21  ;;  %4437 = vmatmul.mubr.bf16.gmra.mrb[76].mxu1 %v3146_v21  ;;  %v3038_v11 = vmax.f32 %v5817_v34, 0.0  ;;  %v3040_v37 = vmax.f32 %v5881_v5, 0.0 }
 0x278   : > { %v5820_v28 = vadd.f32 %v2507_v49, %v8386_v0  ;;  %v5884_v57 = vadd.f32 %v2893_v56, %v8389_v53  ;;  %4194 = vmatpush1.bf16.msra.mxu0 %v6701_v58  ;;  %4580 = vmatpush1.bf16.msra.mxu1 %v6704_v7  ;;  %v3039_v63 = vmax.f32 %v5818_v36, 0.0  ;;  %v3041_v14 = vmax.f32 %v5882_v19, 0.0  ;;  %v6727_v36 = vld [vmem:[#allocation3 + $0x344] ss:$16 sps:$4 sm:$0xff]  }
 0x279   : > { %v3042_v60 = vmax.f32 %v5819_v38, 0.0  ;;  %v3044_v29 = vmax.f32 %v5883_v32, 0.0  ;;  %4195 = vmatprep.subr.bf16.mxu0 %v6709_v45  ;;  %4581 = vmatprep.subr.bf16.mxu1 %v6712_v1  ;;  %v6719_v45 = vld [vmem:[#allocation3 + $0x320] ss:$16 sps:$4 sm:$0xff]   ;;  %v6722_v1 = vld [vmem:[#allocation3 + $0x328] ss:$16 sps:$4 sm:$0xff]  }
 0x27a   : > { %v3043_v8 = vmax.f32 %v5820_v28, 0.0  ;;  %v3045_v43 = vmax.f32 %v5884_v57, 0.0  ;;  %v6730_v32 = vld [vmem:[#allocation3 + $0x34c] ss:$16 sps:$4 sm:$0xff]  }
 0x27b   : > { %v3150_v44 = vpack.c.bf16 %v3042_v60, %v3038_v11  ;;  %v8447_v26 = vpack.c.bf16 %v3044_v29, %v3040_v37  ;;  %v6725_v29 = vld [vmem:[#allocation3 + $0x340] ss:$16 sps:$4 sm:$0xff]  }
 0x27c   : > { %v3151_v30 = vpack.c.bf16 %v3043_v8, %v3039_v63  ;;  %v8449_v47 = vpack.c.bf16 %v3045_v43, %v3041_v14  ;;  %v2511_v35 = vpop.f32.mrb[20].mxu0  ;;  %v2897_v20 = vpop.f32.mrb[20].mxu1  ;;  %4196 = vmatpush1.bf16.msra.mxu0 %v6707_v4  ;;  %4582 = vmatpush1.bf16.msra.mxu1 %v6710_v9 }
 0x27d   : > { %v5821_v48 = vadd.f32 %v2511_v35, %v8380_v16  ;;  %v5885_v41 = vadd.f32 %v2897_v20, %v8383_v17  ;;  %v2513_v54 = vpop.f32.mrb[21].mxu0  ;;  %v2899_v46 = vpop.f32.mrb[21].mxu1  ;;  %4197 = vmatprep.subr.bf16.mxu0 %v6715_v27  ;;  %4583 = vmatprep.subr.bf16.mxu1 %v6718_v61  ;;  %v6728_v61 = vld [vmem:[#allocation3 + $0x348] ss:$16 sps:$4 sm:$0xff]  }
 0x27e   : > { %v5822_v21 = vadd.f32 %v2513_v54, %v8386_v0  ;;  %v5886_v39 = vadd.f32 %v2899_v46, %v8389_v53  ;;  %v2515_v18 = vpop.f32.mrb[22].mxu0  ;;  %v2901_v15 = vpop.f32.mrb[22].mxu1  ;;  %4060 = vmatprep.mubr.bf16.mxu0 %v3151_v30  ;;  %4446 = vmatprep.mubr.bf16.mxu1 %v3151_v30  ;;  %v6736_v30 = vld [vmem:[#allocation3 + $0x36c] ss:$16 sps:$4 sm:$0xff]  }
 0x27f   : > { %v5823_v58 = vadd.f32 %v2515_v18, %v8380_v16  ;;  %v5887_v7 = vadd.f32 %v2901_v15, %v8383_v17  ;;  %v2517_v34 = vpop.f32.mrb[23].mxu0  ;;  %v2903_v5 = vpop.f32.mrb[23].mxu1  ;;  %4061 = vmatmul.mubr.bf16.gmra.mrb[80].mxu0 %v3150_v44  ;;  %4447 = vmatmul.mubr.bf16.gmra.mrb[80].mxu1 %v3150_v44  ;;  %v3046_v19 = vmax.f32 %v5821_v48, 0.0  ;;  %v3048_v3 = vmax.f32 %v5885_v41, 0.0  ;;  %v6733_v44 = vld [vmem:[#allocation3 + $0x364] ss:$16 sps:$4 sm:$0xff]  }
 0x280   : > { %v5824_v50 = vadd.f32 %v2517_v34, %v8386_v0  ;;  %v5888_v23 = vadd.f32 %v2903_v5, %v8389_v53  ;;  %4198 = vmatpush1.bf16.msra.mxu0 %v6713_v13  ;;  %4584 = vmatpush1.bf16.msra.mxu1 %v6716_v2  ;;  %v3047_v49 = vmax.f32 %v5822_v21, 0.0  ;;  %v3049_v56 = vmax.f32 %v5886_v39, 0.0  ;;  %v6731_v21 = vld [vmem:[#allocation3 + $0x360] ss:$16 sps:$4 sm:$0xff]   ;;  %v6734_v39 = vld [vmem:[#allocation3 + $0x368] ss:$16 sps:$4 sm:$0xff]  }
 0x281   : > { %v3050_v24 = vmax.f32 %v5823_v58, 0.0  ;;  %v3052_v38 = vmax.f32 %v5887_v7, 0.0  ;;  %4199 = vmatprep.subr.bf16.mxu0 %v6721_v59  ;;  %4585 = vmatprep.subr.bf16.mxu1 %v6724_v31  ;;  %v6739_v18 = vld [vmem:[#allocation3 + $0x384] ss:$16 sps:$4 sm:$0xff]   ;;  %v6742_v5 = vld [vmem:[#allocation3 + $0x38c] ss:$16 sps:$4 sm:$0xff]  }
 0x282   : > { %v3051_v28 = vmax.f32 %v5824_v50, 0.0  ;;  %v3053_v57 = vmax.f32 %v5888_v23, 0.0 }
 0x283   : > { %v3154_v4 = vpack.c.bf16 %v3050_v24, %v3046_v19  ;;  %v8459_v9 = vpack.c.bf16 %v3052_v38, %v3048_v3 }
 0x284   : > { %v3155_v27 = vpack.c.bf16 %v3051_v28, %v3047_v49  ;;  %v8461_v11 = vpack.c.bf16 %v3053_v57, %v3049_v56  ;;  %v2521_v37 = vpop.f32.mrb[24].mxu0  ;;  %v2907_v60 = vpop.f32.mrb[24].mxu1  ;;  %4200 = vmatpush1.bf16.msra.mxu0 %v6719_v45  ;;  %4586 = vmatpush1.bf16.msra.mxu1 %v6722_v1  ;;  %v6737_v49 = vld [vmem:[#allocation3 + $0x380] ss:$16 sps:$4 sm:$0xff]   ;;  %v6740_v56 = vld [vmem:[#allocation3 + $0x388] ss:$16 sps:$4 sm:$0xff]  }
 0x285   : > { %v5825_v63 = vadd.f32 %v2521_v37, %v8380_v16  ;;  %v5889_v14 = vadd.f32 %v2907_v60, %v8383_v17  ;;  %v2523_v8 = vpop.f32.mrb[25].mxu0  ;;  %v2909_v43 = vpop.f32.mrb[25].mxu1  ;;  %4201 = vmatprep.subr.bf16.mxu0 %v6727_v36  ;;  %4587 = vmatprep.subr.bf16.mxu1 %v6730_v32  ;;  %v6745_v37 = vld [vmem:[#allocation3 + $0x3a4] ss:$16 sps:$4 sm:$0xff]   ;;  %v6748_v60 = vld [vmem:[#allocation3 + $0x3ac] ss:$16 sps:$4 sm:$0xff]  }
 0x286   : > { %v5826_v35 = vadd.f32 %v2523_v8, %v8386_v0  ;;  %v5890_v20 = vadd.f32 %v2909_v43, %v8389_v53  ;;  %v2525_v13 = vpop.f32.mrb[26].mxu0  ;;  %v2911_v2 = vpop.f32.mrb[26].mxu1  ;;  %4070 = vmatprep.mubr.bf16.mxu0 %v3155_v27  ;;  %4456 = vmatprep.mubr.bf16.mxu1 %v3155_v27 }
 0x287   : > { %v5827_v48 = vadd.f32 %v2525_v13, %v8380_v16  ;;  %v5891_v41 = vadd.f32 %v2911_v2, %v8383_v17  ;;  %v2527_v54 = vpop.f32.mrb[27].mxu0  ;;  %v2913_v46 = vpop.f32.mrb[27].mxu1  ;;  %4071 = vmatmul.mubr.bf16.gmra.mrb[84].mxu0 %v3154_v4  ;;  %4457 = vmatmul.mubr.bf16.gmra.mrb[84].mxu1 %v3154_v4  ;;  %v3054_v15 = vmax.f32 %v5825_v63, 0.0  ;;  %v3056_v58 = vmax.f32 %v5889_v14, 0.0  ;;  %v6743_v13 = vld [vmem:[#allocation3 + $0x3a0] ss:$16 sps:$4 sm:$0xff]  }
 0x288   : > { %v5828_v59 = vadd.f32 %v2527_v54, %v8386_v0  ;;  %v5892_v31 = vadd.f32 %v2913_v46, %v8389_v53  ;;  %4202 = vmatpush1.bf16.msra.mxu0 %v6725_v29  ;;  %4588 = vmatpush1.bf16.msra.mxu1 %v6728_v61  ;;  %v3055_v50 = vmax.f32 %v5826_v35, 0.0  ;;  %v3057_v23 = vmax.f32 %v5890_v20, 0.0  ;;  %v6746_v2 = vld [vmem:[#allocation3 + $0x3a8] ss:$16 sps:$4 sm:$0xff]  }
 0x289   : > { %v3058_v7 = vmax.f32 %v5827_v48, 0.0  ;;  %v3060_v34 = vmax.f32 %v5891_v41, 0.0  ;;  %4203 = vmatprep.subr.bf16.mxu0 %v6733_v44  ;;  %4589 = vmatprep.subr.bf16.mxu1 %v6736_v30  ;;  %v6751_v48 = vld [vmem:[#allocation3 + $0x3c4] ss:$16 sps:$4 sm:$0xff]  }
 0x28a   : > { %v3059_v45 = vmax.f32 %v5828_v59, 0.0  ;;  %v3061_v1 = vmax.f32 %v5892_v31, 0.0  ;;  %v6754_v31 = vld [vmem:[#allocation3 + $0x3cc] ss:$16 sps:$4 sm:$0xff]  }
 0x28b   : > { %v3158_v36 = vpack.c.bf16 %v3058_v7, %v3054_v15  ;;  %v8471_v19 = vpack.c.bf16 %v3060_v34, %v3056_v58 }
 0x28c   : > { %v3159_v3 = vpack.c.bf16 %v3059_v45, %v3055_v50  ;;  %v8473_v24 = vpack.c.bf16 %v3061_v1, %v3057_v23  ;;  %v2531_v38 = vpop.f32.mrb[28].mxu0  ;;  %v2917_v32 = vpop.f32.mrb[28].mxu1  ;;  %4204 = vmatpush1.bf16.msra.mxu0 %v6731_v21  ;;  %4590 = vmatpush1.bf16.msra.mxu1 %v6734_v39  ;;  %v6749_v45 = vld [vmem:[#allocation3 + $0x3c0] ss:$16 sps:$4 sm:$0xff]   ;;  %v6752_v1 = vld [vmem:[#allocation3 + $0x3c8] ss:$16 sps:$4 sm:$0xff]  }
 0x28d   : > { %v5829_v28 = vadd.f32 %v2531_v38, %v8380_v16  ;;  %v5893_v57 = vadd.f32 %v2917_v32, %v8383_v17  ;;  %v2533_v4 = vpop.f32.mrb[29].mxu0  ;;  %v2919_v27 = vpop.f32.mrb[29].mxu1  ;;  %4205 = vmatprep.subr.bf16.mxu0 %v6739_v18  ;;  %4591 = vmatprep.subr.bf16.mxu1 %v6742_v5 }
 0x28e   : > { %v5830_v29 = vadd.f32 %v2533_v4, %v8386_v0  ;;  %v5894_v61 = vadd.f32 %v2919_v27, %v8389_v53  ;;  %v2535_v63 = vpop.f32.mrb[30].mxu0  ;;  %v2921_v14 = vpop.f32.mrb[30].mxu1  ;;  %4080 = vmatprep.mubr.bf16.mxu0 %v3159_v3  ;;  %4466 = vmatprep.mubr.bf16.mxu1 %v3159_v3 }
 0x28f   : > { %v5831_v8 = vadd.f32 %v2535_v63, %v8380_v16  ;;  %v5895_v43 = vadd.f32 %v2921_v14, %v8383_v17  ;;  %v2537_v44 = vpop.f32.mrb[31].mxu0  ;;  %v2923_v30 = vpop.f32.mrb[31].mxu1  ;;  %4081 = vmatmul.mubr.bf16.gmra.mrb[88].mxu0 %v3158_v36  ;;  %4467 = vmatmul.mubr.bf16.gmra.mrb[88].mxu1 %v3158_v36  ;;  %v3062_v41 = vmax.f32 %v5829_v28, 0.0  ;;  %v3064_v54 = vmax.f32 %v5893_v57, 0.0 }
 0x290   : > { %v5832_v35 = vadd.f32 %v2537_v44, %v8386_v0  ;;  %v5896_v20 = vadd.f32 %v2923_v30, %v8389_v53  ;;  %4206 = vmatpush1.bf16.msra.mxu0 %v6737_v49  ;;  %4592 = vmatpush1.bf16.msra.mxu1 %v6740_v56  ;;  %v3063_v21 = vmax.f32 %v5830_v29, 0.0  ;;  %v3065_v39 = vmax.f32 %v5894_v61, 0.0  ;;  %v6757_v49 = vld [vmem:[#allocation3 + $0x3e4] ss:$16 sps:$4 sm:$0xff]   ;;  %v6760_v56 = vld [vmem:[#allocation3 + $0x3ec] ss:$16 sps:$4 sm:$0xff]  }
 0x291   : > { %v3066_v46 = vmax.f32 %v5831_v8, 0.0  ;;  %v3068_v59 = vmax.f32 %v5895_v43, 0.0  ;;  %4207 = vmatprep.subr.bf16.mxu0 %v6745_v37  ;;  %4593 = vmatprep.subr.bf16.mxu1 %v6748_v60  ;;  %v6755_v8 = vld [vmem:[#allocation3 + $0x3e0] ss:$16 sps:$4 sm:$0xff]   ;;  %v6758_v43 = vld [vmem:[#allocation3 + $0x3e8] ss:$16 sps:$4 sm:$0xff]  }
 0x292   : > { %v3067_v18 = vmax.f32 %v5832_v35, 0.0  ;;  %v3069_v15 = vmax.f32 %v5896_v20, 0.0 }
 0x293   : > { %v3162_v58 = vpack.c.bf16 %v3066_v46, %v3062_v41  ;;  %v8483_v7 = vpack.c.bf16 %v3068_v59, %v3064_v54 }
 0x294   : > { %v3163_v34 = vpack.c.bf16 %v3067_v18, %v3063_v21  ;;  %v8485_v5 = vpack.c.bf16 %v3069_v15, %v3065_v39  ;;  %v2541_v50 = vpop.f32.mrb[32].mxu0  ;;  %v2927_v23 = vpop.f32.mrb[32].mxu1  ;;  %4208 = vmatpush1.bf16.msra.mxu0 %v6743_v13  ;;  %4594 = vmatpush1.bf16.msra.mxu1 %v6746_v2 }
 0x295   : > { %v5833_v36 = vadd.f32 %v2541_v50, %v8380_v16  ;;  %v5897_v3 = vadd.f32 %v2927_v23, %v8383_v17  ;;  %v2543_v38 = vpop.f32.mrb[33].mxu0  ;;  %v2929_v32 = vpop.f32.mrb[33].mxu1  ;;  %4209 = vmatprep.subr.bf16.mxu0 %v6751_v48  ;;  %4595 = vmatprep.subr.bf16.mxu1 %v6754_v31 }
 0x296   : > { %v5834_v28 = vadd.f32 %v2543_v38, %v8386_v0  ;;  %v5898_v57 = vadd.f32 %v2929_v32, %v8389_v53  ;;  %v2545_v4 = vpop.f32.mrb[34].mxu0  ;;  %v2931_v27 = vpop.f32.mrb[34].mxu1  ;;  %4090 = vmatprep.mubr.bf16.mxu0 %v3163_v34  ;;  %4476 = vmatprep.mubr.bf16.mxu1 %v3163_v34 }
 0x297   : > { %v5835_v37 = vadd.f32 %v2545_v4, %v8380_v16  ;;  %v5899_v60 = vadd.f32 %v2931_v27, %v8383_v17  ;;  %v2547_v29 = vpop.f32.mrb[35].mxu0  ;;  %v2933_v61 = vpop.f32.mrb[35].mxu1  ;;  %4091 = vmatmul.mubr.bf16.gmra.mrb[92].mxu0 %v3162_v58  ;;  %4477 = vmatmul.mubr.bf16.gmra.mrb[92].mxu1 %v3162_v58  ;;  %v3070_v44 = vmax.f32 %v5833_v36, 0.0  ;;  %v3072_v30 = vmax.f32 %v5897_v3, 0.0 }
 0x298   : > { %v5836_v63 = vadd.f32 %v2547_v29, %v8386_v0  ;;  %v5900_v14 = vadd.f32 %v2933_v61, %v8389_v53  ;;  %4210 = vmatpush1.bf16.msra.mxu0 %v6749_v45  ;;  %4596 = vmatpush1.bf16.msra.mxu1 %v6752_v1  ;;  %v3071_v13 = vmax.f32 %v5834_v28, 0.0  ;;  %v3073_v2 = vmax.f32 %v5898_v57, 0.0 }
 0x299   : > { %v3074_v35 = vmax.f32 %v5835_v37, 0.0  ;;  %v3076_v20 = vmax.f32 %v5899_v60, 0.0  ;;  %4211 = vmatprep.subr.bf16.mxu0 %v6757_v49  ;;  %4597 = vmatprep.subr.bf16.mxu1 %v6760_v56 }
 0x29a   : > { %v3075_v48 = vmax.f32 %v5836_v63, 0.0  ;;  %v3077_v41 = vmax.f32 %v5900_v14, 0.0 }
 0x29b   : > { %v3166_v54 = vpack.c.bf16 %v3074_v35, %v3070_v44  ;;  %v8495_v46 = vpack.c.bf16 %v3076_v20, %v3072_v30 }
 0x29c   : > { %v3167_v59 = vpack.c.bf16 %v3075_v48, %v3071_v13  ;;  %v8497_v31 = vpack.c.bf16 %v3077_v41, %v3073_v2  ;;  %v2551_v21 = vpop.f32.mrb[36].mxu0  ;;  %v2937_v39 = vpop.f32.mrb[36].mxu1  ;;  %4212 = vmatpush1.bf16.msra.mxu0 %v6755_v8  ;;  %4598 = vmatpush1.bf16.msra.mxu1 %v6758_v43 }
 0x29d   : > { %v5837_v18 = vadd.f32 %v2551_v21, %v8380_v16  ;;  %v5901_v15 = vadd.f32 %v2937_v39, %v8383_v17  ;;  %v2553_v58 = vpop.f32.mrb[37].mxu0  ;;  %v2939_v34 = vpop.f32.mrb[37].mxu1 }
 0x29e   : > { %v5838_v50 = vadd.f32 %v2553_v58, %v8386_v0  ;;  %v5902_v23 = vadd.f32 %v2939_v34, %v8389_v53  ;;  %v2555_v45 = vpop.f32.mrb[38].mxu0  ;;  %v2941_v1 = vpop.f32.mrb[38].mxu1  ;;  %4100 = vmatprep.mubr.bf16.mxu0 %v3167_v59  ;;  %4486 = vmatprep.mubr.bf16.mxu1 %v3167_v59 }
 0x29f   : > { %v5839_v36 = vadd.f32 %v2555_v45, %v8380_v16  ;;  %v5903_v3 = vadd.f32 %v2941_v1, %v8383_v17  ;;  %v2557_v38 = vpop.f32.mrb[39].mxu0  ;;  %v2943_v32 = vpop.f32.mrb[39].mxu1  ;;  %4101 = vmatmul.mubr.bf16.gmra.mrb[96].mxu0 %v3166_v54  ;;  %4487 = vmatmul.mubr.bf16.gmra.mrb[96].mxu1 %v3166_v54  ;;  %v3078_v28 = vmax.f32 %v5837_v18, 0.0  ;;  %v3080_v57 = vmax.f32 %v5901_v15, 0.0 }
 0x2a0   : > { %v5840_v49 = vadd.f32 %v2557_v38, %v8386_v0  ;;  %v5904_v56 = vadd.f32 %v2943_v32, %v8389_v53  ;;  %v3079_v37 = vmax.f32 %v5838_v50, 0.0  ;;  %v3081_v60 = vmax.f32 %v5902_v23, 0.0 }
 0x2a1   : > { %v3082_v4 = vmax.f32 %v5839_v36, 0.0  ;;  %v3084_v27 = vmax.f32 %v5903_v3, 0.0 }
 0x2a2   : > { %v3083_v29 = vmax.f32 %v5840_v49, 0.0  ;;  %v3085_v61 = vmax.f32 %v5904_v56, 0.0 }
 0x2a3   : > { %v3170_v63 = vpack.c.bf16 %v3082_v4, %v3078_v28  ;;  %v8507_v14 = vpack.c.bf16 %v3084_v27, %v3080_v57 }
 0x2a4   : > { %v3171_v8 = vpack.c.bf16 %v3083_v29, %v3079_v37  ;;  %v8509_v43 = vpack.c.bf16 %v3085_v61, %v3081_v60  ;;  %v2561_v44 = vpop.f32.mrb[40].mxu0  ;;  %v2947_v30 = vpop.f32.mrb[40].mxu1 }
 0x2a5   : > { %v5841_v35 = vadd.f32 %v2561_v44, %v8380_v16  ;;  %v5905_v20 = vadd.f32 %v2947_v30, %v8383_v17  ;;  %v2563_v13 = vpop.f32.mrb[41].mxu0  ;;  %v2949_v2 = vpop.f32.mrb[41].mxu1 }
 0x2a6   : > { %v5842_v48 = vadd.f32 %v2563_v13, %v8386_v0  ;;  %v5906_v41 = vadd.f32 %v2949_v2, %v8389_v53  ;;  %v2565_v54 = vpop.f32.mrb[42].mxu0  ;;  %v2951_v59 = vpop.f32.mrb[42].mxu1  ;;  %4110 = vmatprep.mubr.bf16.mxu0 %v3171_v8  ;;  %4496 = vmatprep.mubr.bf16.mxu1 %v3171_v8 }
 0x2a7   : > { %v5843_v21 = vadd.f32 %v2565_v54, %v8380_v16  ;;  %v5907_v39 = vadd.f32 %v2951_v59, %v8383_v17  ;;  %v2567_v18 = vpop.f32.mrb[43].mxu0  ;;  %v2953_v15 = vpop.f32.mrb[43].mxu1  ;;  %4111 = vmatmul.mubr.bf16.gmra.mrb[100].mxu0 %v3170_v63  ;;  %4497 = vmatmul.mubr.bf16.gmra.mrb[100].mxu1 %v3170_v63  ;;  %v3086_v50 = vmax.f32 %v5841_v35, 0.0  ;;  %v3088_v23 = vmax.f32 %v5905_v20, 0.0 }
 0x2a8   : > { %v5844_v58 = vadd.f32 %v2567_v18, %v8386_v0  ;;  %v5908_v34 = vadd.f32 %v2953_v15, %v8389_v53  ;;  %v3087_v36 = vmax.f32 %v5842_v48, 0.0  ;;  %v3089_v3 = vmax.f32 %v5906_v41, 0.0 }
 0x2a9   : > { %v3090_v45 = vmax.f32 %v5843_v21, 0.0  ;;  %v3092_v1 = vmax.f32 %v5907_v39, 0.0 }
 0x2aa   : > { %v3091_v38 = vmax.f32 %v5844_v58, 0.0  ;;  %v3093_v32 = vmax.f32 %v5908_v34, 0.0 }
 0x2ab   : > { %v3174_v49 = vpack.c.bf16 %v3090_v45, %v3086_v50  ;;  %v8519_v56 = vpack.c.bf16 %v3092_v1, %v3088_v23 }
 0x2ac   : > { %v3175_v28 = vpack.c.bf16 %v3091_v38, %v3087_v36  ;;  %v8521_v57 = vpack.c.bf16 %v3093_v32, %v3089_v3  ;;  %v2571_v4 = vpop.f32.mrb[44].mxu0  ;;  %v2957_v27 = vpop.f32.mrb[44].mxu1 }
 0x2ad   : > { %v5845_v37 = vadd.f32 %v2571_v4, %v8380_v16  ;;  %v5909_v60 = vadd.f32 %v2957_v27, %v8383_v17  ;;  %v2573_v29 = vpop.f32.mrb[45].mxu0  ;;  %v2959_v61 = vpop.f32.mrb[45].mxu1 }
 0x2ae   : > { %v5846_v63 = vadd.f32 %v2573_v29, %v8386_v0  ;;  %v5910_v8 = vadd.f32 %v2959_v61, %v8389_v53  ;;  %v2575_v44 = vpop.f32.mrb[46].mxu0  ;;  %v2961_v30 = vpop.f32.mrb[46].mxu1  ;;  %4120 = vmatprep.mubr.bf16.mxu0 %v3175_v28  ;;  %4506 = vmatprep.mubr.bf16.mxu1 %v3175_v28 }
 0x2af   : > { %v5847_v35 = vadd.f32 %v2575_v44, %v8380_v16  ;;  %v5911_v20 = vadd.f32 %v2961_v30, %v8383_v17  ;;  %v2577_v13 = vpop.f32.mrb[47].mxu0  ;;  %v2963_v2 = vpop.f32.mrb[47].mxu1  ;;  %4121 = vmatmul.mubr.bf16.gmra.mrb[104].mxu0 %v3174_v49  ;;  %4507 = vmatmul.mubr.bf16.gmra.mrb[104].mxu1 %v3174_v49  ;;  %v3094_v54 = vmax.f32 %v5845_v37, 0.0  ;;  %v3096_v59 = vmax.f32 %v5909_v60, 0.0 }
 0x2b0   : > { %v5848_v48 = vadd.f32 %v2577_v13, %v8386_v0  ;;  %v5912_v41 = vadd.f32 %v2963_v2, %v8389_v53  ;;  %v3095_v18 = vmax.f32 %v5846_v63, 0.0  ;;  %v3097_v15 = vmax.f32 %v5910_v8, 0.0 }
 0x2b1   : > { %v3098_v21 = vmax.f32 %v5847_v35, 0.0  ;;  %v3100_v39 = vmax.f32 %v5911_v20, 0.0 }
 0x2b2   : > { %v3099_v58 = vmax.f32 %v5848_v48, 0.0  ;;  %v3101_v34 = vmax.f32 %v5912_v41, 0.0 }
 0x2b3   : > { %v3178_v50 = vpack.c.bf16 %v3098_v21, %v3094_v54  ;;  %v8531_v23 = vpack.c.bf16 %v3100_v39, %v3096_v59 }
 0x2b4   : > { %v3179_v45 = vpack.c.bf16 %v3099_v58, %v3095_v18  ;;  %v8533_v1 = vpack.c.bf16 %v3101_v34, %v3097_v15  ;;  %v2581_v36 = vpop.f32.mrb[48].mxu0  ;;  %v2967_v3 = vpop.f32.mrb[48].mxu1 }
 0x2b5   : > { %v5849_v38 = vadd.f32 %v2581_v36, %v8380_v16  ;;  %v5913_v32 = vadd.f32 %v2967_v3, %v8383_v17  ;;  %v2583_v49 = vpop.f32.mrb[49].mxu0  ;;  %v2969_v28 = vpop.f32.mrb[49].mxu1 }
 0x2b6   : > { %v5850_v4 = vadd.f32 %v2583_v49, %v8386_v0  ;;  %v5914_v27 = vadd.f32 %v2969_v28, %v8389_v53  ;;  %v2585_v37 = vpop.f32.mrb[50].mxu0  ;;  %v2971_v60 = vpop.f32.mrb[50].mxu1  ;;  %4130 = vmatprep.mubr.bf16.mxu0 %v3179_v45  ;;  %4516 = vmatprep.mubr.bf16.mxu1 %v3179_v45 }
 0x2b7   : > { %v5851_v29 = vadd.f32 %v2585_v37, %v8380_v16  ;;  %v5915_v61 = vadd.f32 %v2971_v60, %v8383_v17  ;;  %v2587_v63 = vpop.f32.mrb[51].mxu0  ;;  %v2973_v8 = vpop.f32.mrb[51].mxu1  ;;  %4131 = vmatmul.mubr.bf16.gmra.mrb[108].mxu0 %v3178_v50  ;;  %4517 = vmatmul.mubr.bf16.gmra.mrb[108].mxu1 %v3178_v50  ;;  %v3102_v35 = vmax.f32 %v5849_v38, 0.0  ;;  %v3104_v20 = vmax.f32 %v5913_v32, 0.0 }
 0x2b8   : > { %v5852_v44 = vadd.f32 %v2587_v63, %v8386_v0  ;;  %v5916_v30 = vadd.f32 %v2973_v8, %v8389_v53  ;;  %v3103_v48 = vmax.f32 %v5850_v4, 0.0  ;;  %v3105_v41 = vmax.f32 %v5914_v27, 0.0 }
 0x2b9   : > { %v3106_v13 = vmax.f32 %v5851_v29, 0.0  ;;  %v3108_v2 = vmax.f32 %v5915_v61, 0.0 }
 0x2ba   : > { %v3107_v54 = vmax.f32 %v5852_v44, 0.0  ;;  %v3109_v59 = vmax.f32 %v5916_v30, 0.0 }
 0x2bb   : > { %v3182_v21 = vpack.c.bf16 %v3106_v13, %v3102_v35  ;;  %v8543_v39 = vpack.c.bf16 %v3108_v2, %v3104_v20 }
 0x2bc   : > { %v3183_v18 = vpack.c.bf16 %v3107_v54, %v3103_v48  ;;  %v8545_v15 = vpack.c.bf16 %v3109_v59, %v3105_v41  ;;  %v2591_v58 = vpop.f32.mrb[52].mxu0  ;;  %v2977_v34 = vpop.f32.mrb[52].mxu1 }
 0x2bd   : > { %v5853_v50 = vadd.f32 %v2591_v58, %v8380_v16  ;;  %v5917_v45 = vadd.f32 %v2977_v34, %v8383_v17  ;;  %v2593_v36 = vpop.f32.mrb[53].mxu0  ;;  %v2979_v3 = vpop.f32.mrb[53].mxu1 }
 0x2be   : > { %v5854_v38 = vadd.f32 %v2593_v36, %v8386_v0  ;;  %v5918_v32 = vadd.f32 %v2979_v3, %v8389_v53  ;;  %v2595_v49 = vpop.f32.mrb[54].mxu0  ;;  %v2981_v28 = vpop.f32.mrb[54].mxu1  ;;  %4140 = vmatprep.mubr.bf16.mxu0 %v3183_v18  ;;  %4526 = vmatprep.mubr.bf16.mxu1 %v3183_v18 }
 0x2bf   : > { %v5855_v4 = vadd.f32 %v2595_v49, %v8380_v16  ;;  %v5919_v27 = vadd.f32 %v2981_v28, %v8383_v17  ;;  %v2597_v37 = vpop.f32.mrb[55].mxu0  ;;  %v2983_v60 = vpop.f32.mrb[55].mxu1  ;;  %4141 = vmatmul.mubr.bf16.gmra.mrb[112].mxu0 %v3182_v21  ;;  %4527 = vmatmul.mubr.bf16.gmra.mrb[112].mxu1 %v3182_v21  ;;  %v3110_v63 = vmax.f32 %v5853_v50, 0.0  ;;  %v3112_v8 = vmax.f32 %v5917_v45, 0.0 }
 0x2c0   : > { %v5856_v29 = vadd.f32 %v2597_v37, %v8386_v0  ;;  %v5920_v61 = vadd.f32 %v2983_v60, %v8389_v53  ;;  %v3111_v35 = vmax.f32 %v5854_v38, 0.0  ;;  %v3113_v20 = vmax.f32 %v5918_v32, 0.0 }
 0x2c1   : > { %v3114_v44 = vmax.f32 %v5855_v4, 0.0  ;;  %v3116_v30 = vmax.f32 %v5919_v27, 0.0 }
 0x2c2   : > { %v3115_v13 = vmax.f32 %v5856_v29, 0.0  ;;  %v3117_v2 = vmax.f32 %v5920_v61, 0.0 }
 0x2c3   : > { %v3186_v48 = vpack.c.bf16 %v3114_v44, %v3110_v63  ;;  %v8555_v41 = vpack.c.bf16 %v3116_v30, %v3112_v8 }
 0x2c4   : > { %v3187_v54 = vpack.c.bf16 %v3115_v13, %v3111_v35  ;;  %v8557_v59 = vpack.c.bf16 %v3117_v2, %v3113_v20  ;;  %v2601_v18 = vpop.f32.mrb[56].mxu0  ;;  %v2987_v21 = vpop.f32.mrb[56].mxu1 }
 0x2c5   : > { %v5857_v58 = vadd.f32 %v2601_v18, %v8380_v16  ;;  %v5921_v34 = vadd.f32 %v2987_v21, %v8383_v17  ;;  %v2603_v50 = vpop.f32.mrb[57].mxu0  ;;  %v2989_v45 = vpop.f32.mrb[57].mxu1 }
 0x2c6   : > { %v5858_v36 = vadd.f32 %v2603_v50, %v8386_v0  ;;  %v5922_v3 = vadd.f32 %v2989_v45, %v8389_v53  ;;  %v2605_v38 = vpop.f32.mrb[58].mxu0  ;;  %v2991_v32 = vpop.f32.mrb[58].mxu1  ;;  %4150 = vmatprep.mubr.bf16.mxu0 %v3187_v54  ;;  %4536 = vmatprep.mubr.bf16.mxu1 %v3187_v54 }
 0x2c7   : > { %v5859_v49 = vadd.f32 %v2605_v38, %v8380_v16  ;;  %v5923_v28 = vadd.f32 %v2991_v32, %v8383_v17  ;;  %v2607_v4 = vpop.f32.mrb[59].mxu0  ;;  %v2993_v27 = vpop.f32.mrb[59].mxu1  ;;  %4151 = vmatmul.mubr.bf16.gmra.mrb[116].mxu0 %v3186_v48  ;;  %4537 = vmatmul.mubr.bf16.gmra.mrb[116].mxu1 %v3186_v48  ;;  %v3118_v29 = vmax.f32 %v5857_v58, 0.0  ;;  %v3120_v61 = vmax.f32 %v5921_v34, 0.0 }
 0x2c8   : > { %v5860_v37 = vadd.f32 %v2607_v4, %v8386_v0  ;;  %v5924_v60 = vadd.f32 %v2993_v27, %v8389_v53  ;;  %v3119_v44 = vmax.f32 %v5858_v36, 0.0  ;;  %v3121_v30 = vmax.f32 %v5922_v3, 0.0 }
 0x2c9   : > { %v3122_v63 = vmax.f32 %v5859_v49, 0.0  ;;  %v3124_v8 = vmax.f32 %v5923_v28, 0.0 }
 0x2ca   : > { %v3123_v35 = vmax.f32 %v5860_v37, 0.0  ;;  %v3125_v20 = vmax.f32 %v5924_v60, 0.0 }
 0x2cb   : > { %v3190_v13 = vpack.c.bf16 %v3122_v63, %v3118_v29  ;;  %v8567_v2 = vpack.c.bf16 %v3124_v8, %v3120_v61 }
 0x2cc   : > { %v3191_v54 = vpack.c.bf16 %v3123_v35, %v3119_v44  ;;  %v8569_v18 = vpack.c.bf16 %v3125_v20, %v3121_v30  ;;  %v2611_v21 = vpop.f32.mrb[60].mxu0  ;;  %v2997_v48 = vpop.f32.mrb[60].mxu1 }
 0x2cd   : > { %v5861_v50 = vadd.f32 %v2611_v21, %v8380_v16  ;;  %v5925_v45 = vadd.f32 %v2997_v48, %v8383_v17  ;;  %v2613_v58 = vpop.f32.mrb[61].mxu0  ;;  %v2999_v34 = vpop.f32.mrb[61].mxu1 }
 0x2ce   : > { %v5862_v38 = vadd.f32 %v2613_v58, %v8386_v0  ;;  %v5926_v36 = vadd.f32 %v2999_v34, %v8389_v53  ;;  %v2615_v3 = vpop.f32.mrb[62].mxu0  ;;  %v3001_v32 = vpop.f32.mrb[62].mxu1  ;;  %4160 = vmatprep.mubr.bf16.mxu0 %v3191_v54  ;;  %4546 = vmatprep.mubr.bf16.mxu1 %v3191_v54 }
 0x2cf   : > { %v5863_v49 = vadd.f32 %v2615_v3, %v8380_v16  ;;  %v5927_v28 = vadd.f32 %v3001_v32, %v8383_v17  ;;  %v2617_v4 = vpop.f32.mrb[63].mxu0  ;;  %v3003_v27 = vpop.f32.mrb[63].mxu1  ;;  %4161 = vmatmul.mubr.bf16.gmra.mrb[120].mxu0 %v3190_v13  ;;  %4547 = vmatmul.mubr.bf16.gmra.mrb[120].mxu1 %v3190_v13  ;;  %v3126_v29 = vmax.f32 %v5861_v50, 0.0  ;;  %v3128_v61 = vmax.f32 %v5925_v45, 0.0 }
 0x2d0   : > { %v5864_v37 = vadd.f32 %v2617_v4, %v8386_v0  ;;  %v5928_v60 = vadd.f32 %v3003_v27, %v8389_v53  ;;  %v3127_v44 = vmax.f32 %v5862_v38, 0.0  ;;  %v3129_v30 = vmax.f32 %v5926_v36, 0.0  ;;  %v3326_v0 = vld [vmem:[%s9047_s6] sm:$0xf] }
 0x2d1   : > { %v3130_v63 = vmax.f32 %v5863_v49, 0.0  ;;  %v3132_v8 = vmax.f32 %v5927_v28, 0.0  ;;  %v8651_v53 = vrot.slane %v3326_v0, %v9149_v6 }
 0x2d2   : > { %v3131_v35 = vmax.f32 %v5864_v37, 0.0  ;;  %v3133_v20 = vmax.f32 %v5928_v60, 0.0 }
 0x2d3   : > { %v3194_v54 = vpack.c.bf16 %v3130_v63, %v3126_v29  ;;  %v8579_v16 = vpack.c.bf16 %v3132_v8, %v3128_v61 }
 0x2d4   : > { %v3195_v17 = vpack.c.bf16 %v3131_v35, %v3127_v44  ;;  %v8581_v21 = vpack.c.bf16 %v3133_v20, %v3129_v30 }
 0x2d6   : > { %4170 = vmatprep.mubr.bf16.mxu0 %v3195_v17  ;;  %4556 = vmatprep.mubr.bf16.mxu1 %v3195_v17 }
 0x2d7   : > { %4171 = vmatmul.mubr.bf16.gmra.mrb[124].mxu0 %v3194_v54  ;;  %4557 = vmatmul.mubr.bf16.gmra.mrb[124].mxu1 %v3194_v54 }
 0x2d8   : > { %4213 = vmatprep.mubr.bf16.mxu0 %v8401_v42  ;;  %4599 = vmatprep.mubr.bf16.mxu1 %v8401_v42  ;;  %v4888_v42 = vld [vmem:[%s9048_s7] sm:$0xf] }
 0x2df   : > { %4214 = vmatmul.mubr.bf16.vlgmr.msra.gmra.mrb[64].mxu0 %v8399_v25  ;;  %4600 = vmatmul.mubr.bf16.vlgmr.msra.gmra.mrb[64].mxu1 %v8399_v25  ;;  %v8654_v25 = vrot.slane %v3326_v0, %v9150_v51 }
 0x2e0   : > { %4223 = vmatprep.mubr.bf16.mxu0 %v8413_v12  ;;  %4609 = vmatprep.mubr.bf16.mxu1 %v8413_v12 }
 0x2e7   : > { %4224 = vmatmul.mubr.bf16.gmra.mrb[68].mxu0 %v8411_v52  ;;  %4610 = vmatmul.mubr.bf16.gmra.mrb[68].mxu1 %v8411_v52  ;;  %v8660_v52 = vrot.slane %v3326_v0, %v9151_v55 }
 0x2e8   : > { %4233 = vmatprep.mubr.bf16.mxu0 %v8425_v10  ;;  %4619 = vmatprep.mubr.bf16.mxu1 %v8425_v10  ;;  %v8663_v10 = vrot.slane %v3326_v0, %v9152_v33 }
 0x2ef   : > { %4234 = vmatmul.mubr.bf16.gmra.mrb[72].mxu0 %v8423_v40  ;;  %4620 = vmatmul.mubr.bf16.gmra.mrb[72].mxu1 %v8423_v40 }
 0x2f0   : > { %4243 = vmatprep.mubr.bf16.mxu0 %v8437_v22  ;;  %4629 = vmatprep.mubr.bf16.mxu1 %v8437_v22  ;;  %v8667_v22 = vrot.slane %v4888_v42, %v9149_v6 }
 0x2f7   : > { %4244 = vmatmul.mubr.bf16.gmra.mrb[76].mxu0 %v8435_v62  ;;  %4630 = vmatmul.mubr.bf16.gmra.mrb[76].mxu1 %v8435_v62 }
 0x2f8   : > { %4253 = vmatprep.mubr.bf16.mxu0 %v8449_v47  ;;  %4639 = vmatprep.mubr.bf16.mxu1 %v8449_v47 }
 0x2ff   : > { %4254 = vmatmul.mubr.bf16.gmra.mrb[80].mxu0 %v8447_v26  ;;  %4640 = vmatmul.mubr.bf16.gmra.mrb[80].mxu1 %v8447_v26 }
 0x300   : > { %4263 = vmatprep.mubr.bf16.mxu0 %v8461_v11  ;;  %4649 = vmatprep.mubr.bf16.mxu1 %v8461_v11 }
 0x307   : > { %4264 = vmatmul.mubr.bf16.gmra.mrb[84].mxu0 %v8459_v9  ;;  %4650 = vmatmul.mubr.bf16.gmra.mrb[84].mxu1 %v8459_v9 }
 0x308   : > { %4273 = vmatprep.mubr.bf16.mxu0 %v8473_v24  ;;  %4659 = vmatprep.mubr.bf16.mxu1 %v8473_v24 }
 0x30f   : > { %4274 = vmatmul.mubr.bf16.gmra.mrb[88].mxu0 %v8471_v19  ;;  %4660 = vmatmul.mubr.bf16.gmra.mrb[88].mxu1 %v8471_v19  ;;  %v8672_v19 = vrot.slane %v4888_v42, %v9151_v55 }
 0x310   : > { %4283 = vmatprep.mubr.bf16.mxu0 %v8485_v5  ;;  %4669 = vmatprep.mubr.bf16.mxu1 %v8485_v5 }
 0x317   : > { %4284 = vmatmul.mubr.bf16.gmra.mrb[92].mxu0 %v8483_v7  ;;  %4670 = vmatmul.mubr.bf16.gmra.mrb[92].mxu1 %v8483_v7 }
 0x318   : > { %4293 = vmatprep.mubr.bf16.mxu0 %v8497_v31  ;;  %4679 = vmatprep.mubr.bf16.mxu1 %v8497_v31 }
 0x31f   : > { %4294 = vmatmul.mubr.bf16.gmra.mrb[96].mxu0 %v8495_v46  ;;  %4680 = vmatmul.mubr.bf16.gmra.mrb[96].mxu1 %v8495_v46  ;;  %v8675_v46 = vrot.slane %v4888_v42, %v9150_v51 }
 0x320   : > { %4303 = vmatprep.mubr.bf16.mxu0 %v8509_v43  ;;  %4689 = vmatprep.mubr.bf16.mxu1 %v8509_v43 }
 0x327   : > { %4304 = vmatmul.mubr.bf16.gmra.mrb[100].mxu0 %v8507_v14  ;;  %4690 = vmatmul.mubr.bf16.gmra.mrb[100].mxu1 %v8507_v14 }
 0x328   : > { %4313 = vmatprep.mubr.bf16.mxu0 %v8521_v57  ;;  %4699 = vmatprep.mubr.bf16.mxu1 %v8521_v57 }
 0x32f   : > { %4314 = vmatmul.mubr.bf16.gmra.mrb[104].mxu0 %v8519_v56  ;;  %4700 = vmatmul.mubr.bf16.gmra.mrb[104].mxu1 %v8519_v56 }
 0x330   : > { %4323 = vmatprep.mubr.bf16.mxu0 %v8533_v1  ;;  %4709 = vmatprep.mubr.bf16.mxu1 %v8533_v1 }
 0x337   : > { %4324 = vmatmul.mubr.bf16.gmra.mrb[108].mxu0 %v8531_v23  ;;  %4710 = vmatmul.mubr.bf16.gmra.mrb[108].mxu1 %v8531_v23 }
 0x338   : > { %4333 = vmatprep.mubr.bf16.mxu0 %v8545_v15  ;;  %4719 = vmatprep.mubr.bf16.mxu1 %v8545_v15 }
 0x33f   : > { %4334 = vmatmul.mubr.bf16.gmra.mrb[112].mxu0 %v8543_v39  ;;  %4720 = vmatmul.mubr.bf16.gmra.mrb[112].mxu1 %v8543_v39 }
 0x340   : > { %4343 = vmatprep.mubr.bf16.mxu0 %v8557_v59  ;;  %4729 = vmatprep.mubr.bf16.mxu1 %v8557_v59  ;;  %v8685_v59 = vrot.slane %v4888_v42, %v9152_v33 }
 0x347   : > { %4344 = vmatmul.mubr.bf16.gmra.mrb[116].mxu0 %v8555_v41  ;;  %4730 = vmatmul.mubr.bf16.gmra.mrb[116].mxu1 %v8555_v41 }
 0x348   : > { %4353 = vmatprep.mubr.bf16.mxu0 %v8569_v18  ;;  %4739 = vmatprep.mubr.bf16.mxu1 %v8569_v18 }
 0x34f   : > { %4354 = vmatmul.mubr.bf16.gmra.mrb[120].mxu0 %v8567_v2  ;;  %4740 = vmatmul.mubr.bf16.gmra.mrb[120].mxu1 %v8567_v2 }
 0x350   : > { %4363 = vmatprep.mubr.bf16.mxu0 %v8581_v21  ;;  %4749 = vmatprep.mubr.bf16.mxu1 %v8581_v21 }
 0x357   : > { %4364 = vmatmul.mubr.bf16.gmra.mrb[124].mxu0 %v8579_v16  ;;  %4750 = vmatmul.mubr.bf16.gmra.mrb[124].mxu1 %v8579_v16 }
 0x3b2   : > { %v4215_v12 = vpop.f32.mrb[64].mxu0  ;;  %v4601_v40 = vpop.f32.mrb[64].mxu1 }
 0x3b3   : > { %v5929_v62 = vadd.f32 %v4215_v12, %v8651_v53  ;;  %v5993_v26 = vadd.f32 %v4601_v40, %v8654_v25  ;;  %v4217_v47 = vpop.f32.mrb[65].mxu0  ;;  %v4603_v9 = vpop.f32.mrb[65].mxu1 }
 0x3b4   : > { %v5930_v11 = vadd.f32 %v4217_v47, %v8660_v52  ;;  %v4219_v24 = vpop.f32.mrb[66].mxu0  ;;  %v4605_v7 = vpop.f32.mrb[66].mxu1  ;;  %v5994_v57 = vadd.f32 %v4603_v9, %v8663_v10 }
 0x3b5   : > { %v4760_v5 = vmax.f32 %v5929_v62, 0.0  ;;  %v5931_v31 = vadd.f32 %v4219_v24, %v8651_v53  ;;  %v4221_v14 = vpop.f32.mrb[67].mxu0  ;;  %v4607_v6 = vpop.f32.mrb[67].mxu1  ;;  %v4762_v43 = vmax.f32 %v5993_v26, 0.0  ;;  %v5995_v39 = vadd.f32 %v4605_v7, %v8654_v25 }
 0x3b6   : > { %v4761_v56 = vmax.f32 %v5930_v11, 0.0  ;;  %v5932_v23 = vadd.f32 %v4221_v14, %v8660_v52  ;;  %v5996_v51 = vadd.f32 %v4607_v6, %v8663_v10  ;;  %v4763_v48 = vmax.f32 %v5994_v57, 0.0 }
 0x3b7   : > { %v4910_v1 = vmul.f32 %v8667_v22, %v4760_v5  ;;  %v4764_v55 = vmax.f32 %v5931_v31, 0.0  ;;  %v4912_v2 = vmul.f32 %v8675_v46, %v4762_v43  ;;  %v4766_v34 = vmax.f32 %v5995_v39, 0.0 }
 0x3b8   : > { %v4911_v15 = vmul.f32 %v8672_v19, %v4761_v56  ;;  %v4765_v41 = vmax.f32 %v5932_v23, 0.0  ;;  %v4767_v33 = vmax.f32 %v5996_v51, 0.0  ;;  %v4913_v44 = vmul.f32 %v8685_v59, %v4763_v48 }
 0x3b9   : > { %v4914_v13 = vmul.f32 %v8667_v22, %v4764_v55  ;;  %v4916_v54 = vmul.f32 %v8675_v46, %v4766_v34 }
 0x3ba   : > { %v5038_v18 = vadd.f32 %v4911_v15, %v4910_v1  ;;  %v4915_v50 = vmul.f32 %v8672_v19, %v4765_v41  ;;  %v4225_v45 = vpop.f32.mrb[68].mxu0  ;;  %v4611_v58 = vpop.f32.mrb[68].mxu1  ;;  %v4917_v0 = vmul.f32 %v8685_v59, %v4767_v33 }
 0x3bb   : > { %v5933_v38 = vadd.f32 %v4225_v45, %v8651_v53  ;;  %v5997_v36 = vadd.f32 %v4611_v58, %v8654_v25  ;;  %v4227_v3 = vpop.f32.mrb[69].mxu0  ;;  %v4613_v32 = vpop.f32.mrb[69].mxu1 }
 0x3bc   : > { %v5043_v49 = vadd.f32 %v4915_v50, %v4914_v13  ;;  %v5934_v28 = vadd.f32 %v4227_v3, %v8660_v52  ;;  %v4229_v4 = vpop.f32.mrb[70].mxu0  ;;  %v4615_v27 = vpop.f32.mrb[70].mxu1  ;;  %v5039_v37 = vadd.f32 %v5038_v18, %v4912_v2  ;;  %v5998_v29 = vadd.f32 %v4613_v32, %v8663_v10 }
 0x3bd   : > { %v4768_v60 = vmax.f32 %v5933_v38, 0.0  ;;  %v5935_v61 = vadd.f32 %v4229_v4, %v8651_v53  ;;  %v4231_v63 = vpop.f32.mrb[71].mxu0  ;;  %v4617_v8 = vpop.f32.mrb[71].mxu1  ;;  %v4770_v30 = vmax.f32 %v5997_v36, 0.0  ;;  %v5999_v21 = vadd.f32 %v4615_v27, %v8654_v25 }
 0x3be   : > { %v4769_v35 = vmax.f32 %v5934_v28, 0.0  ;;  %v5936_v20 = vadd.f32 %v4231_v63, %v8660_v52  ;;  %v6000_v40 = vadd.f32 %v4617_v8, %v8663_v10  ;;  %v4771_v62 = vmax.f32 %v5998_v29, 0.0 }
 0x3bf   : > { %v4918_v16 = vmul.f32 %v8667_v22, %v4768_v60  ;;  %v4772_v17 = vmax.f32 %v5935_v61, 0.0  ;;  %v5040_v47 = vadd.f32 %v5039_v37, %v4913_v44  ;;  %v5044_v9 = vadd.f32 %v5043_v49, %v4916_v54 }
 0x3c0   : > { %v4919_v42 = vmul.f32 %v8672_v19, %v4769_v35  ;;  %v4773_v12 = vmax.f32 %v5936_v20, 0.0  ;;  %v4920_v11 = vmul.f32 %v8675_v46, %v4770_v30  ;;  %v4774_v14 = vmax.f32 %v5999_v21, 0.0 }
 0x3c1   : > { %v4922_v26 = vmul.f32 %v8667_v22, %v4772_v17  ;;  %5041 = vadd.xlane.f32.xlu1 %v5040_v47  ;;  %v5045_v56 = vadd.f32 %v5044_v9, %v4917_v0  ;;  %v4775_v55 = vmax.f32 %v6000_v40, 0.0  ;;  %v4921_v13 = vmul.f32 %v8685_v59, %v4771_v62 }
 0x3c2   : > { %v5048_v24 = vadd.f32 %v4919_v42, %v4918_v16  ;;  %v4923_v7 = vmul.f32 %v8672_v19, %v4773_v12  ;;  %v4235_v5 = vpop.f32.mrb[72].mxu0  ;;  %v4621_v31 = vpop.f32.mrb[72].mxu1  ;;  %v4924_v3 = vmul.f32 %v8675_v46, %v4774_v14 }
 0x3c3   : > { %v5937_v6 = vadd.f32 %v4235_v5, %v8651_v53  ;;  %v6001_v43 = vadd.f32 %v4621_v31, %v8654_v25  ;;  %v4237_v57 = vpop.f32.mrb[73].mxu0  ;;  %v4623_v23 = vpop.f32.mrb[73].mxu1  ;;  %5046 = vadd.xlane.f32.xlu0 %v5045_v56  ;;  %v4925_v28 = vmul.f32 %v8685_v59, %v4775_v55 }
 0x3c4   : > { %v5053_v1 = vadd.f32 %v4923_v7, %v4922_v26  ;;  %v5938_v39 = vadd.f32 %v4237_v57, %v8660_v52  ;;  %v4239_v15 = vpop.f32.mrb[74].mxu0  ;;  %v4625_v41 = vpop.f32.mrb[74].mxu1  ;;  %v5049_v51 = vadd.f32 %v5048_v24, %v4920_v11  ;;  %v6002_v18 = vadd.f32 %v4623_v23, %v8663_v10 }
 0x3c5   : > { %v4776_v2 = vmax.f32 %v5937_v6, 0.0  ;;  %v5939_v48 = vadd.f32 %v4239_v15, %v8651_v53  ;;  %v4241_v50 = vpop.f32.mrb[75].mxu0  ;;  %v4627_v45 = vpop.f32.mrb[75].mxu1  ;;  %v4778_v58 = vmax.f32 %v6001_v43, 0.0  ;;  %v6003_v38 = vadd.f32 %v4625_v41, %v8654_v25 }
 0x3c6   : > { %v4777_v34 = vmax.f32 %v5938_v39, 0.0  ;;  %v5940_v36 = vadd.f32 %v4241_v50, %v8660_v52  ;;  %v6004_v33 = vadd.f32 %v4627_v45, %v8663_v10  ;;  %v4779_v37 = vmax.f32 %v6002_v18, 0.0 }
 0x3c7   : > { %v4926_v32 = vmul.f32 %v8667_v22, %v4776_v2  ;;  %v4780_v49 = vmax.f32 %v5939_v48, 0.0  ;;  %v5050_v29 = vadd.f32 %v5049_v51, %v4921_v13  ;;  %v5054_v61 = vadd.f32 %v5053_v1, %v4924_v3 }
 0x3c8   : > { %v4927_v4 = vmul.f32 %v8672_v19, %v4777_v34  ;;  %v4781_v27 = vmax.f32 %v5940_v36, 0.0  ;;  %v4928_v63 = vmul.f32 %v8675_v46, %v4778_v58  ;;  %v4782_v44 = vmax.f32 %v6003_v38, 0.0 }
 0x3c9   : > { %v4930_v60 = vmul.f32 %v8667_v22, %v4780_v49  ;;  %v4783_v54 = vmax.f32 %v6004_v33, 0.0  ;;  %5051 = vadd.xlane.f32.xlu0 %v5050_v29  ;;  %v5055_v21 = vadd.f32 %v5054_v61, %v4925_v28  ;;  %v4929_v31 = vmul.f32 %v8685_v59, %v4779_v37 }
 0x3ca   : > { %v5058_v8 = vadd.f32 %v4927_v4, %v4926_v32  ;;  %v4931_v30 = vmul.f32 %v8672_v19, %v4781_v27  ;;  %v4245_v35 = vpop.f32.mrb[76].mxu0  ;;  %v4631_v20 = vpop.f32.mrb[76].mxu1  ;;  %v4932_v56 = vmul.f32 %v8675_v46, %v4782_v44 }
 0x3cb   : > { %v5941_v16 = vadd.f32 %v4245_v35, %v8651_v53  ;;  %v6005_v17 = vadd.f32 %v4631_v20, %v8654_v25  ;;  %v4247_v0 = vpop.f32.mrb[77].mxu0  ;;  %v4633_v42 = vpop.f32.mrb[77].mxu1  ;;  %5056 = vadd.xlane.f32.xlu1 %v5055_v21  ;;  %v4933_v55 = vmul.f32 %v8685_v59, %v4783_v54 }
 0x3cc   : > { %v5063_v12 = vadd.f32 %v4931_v30, %v4930_v60  ;;  %v5942_v40 = vadd.f32 %v4247_v0, %v8660_v52  ;;  %v6006_v62 = vadd.f32 %v4633_v42, %v8663_v10  ;;  %v4249_v26 = vpop.f32.mrb[78].mxu0  ;;  %v4635_v47 = vpop.f32.mrb[78].mxu1  ;;  %v5059_v9 = vadd.f32 %v5058_v8, %v4928_v63 }
 0x3cd   : > { %v4784_v11 = vmax.f32 %v5941_v16, 0.0  ;;  %v5943_v24 = vadd.f32 %v4249_v26, %v8651_v53  ;;  %v4251_v7 = vpop.f32.mrb[79].mxu0  ;;  %v4637_v5 = vpop.f32.mrb[79].mxu1  ;;  %v4786_v14 = vmax.f32 %v6005_v17, 0.0  ;;  %v6007_v1 = vadd.f32 %v4635_v47, %v8654_v25 }
 0x3ce   : > { %v4785_v6 = vmax.f32 %v5942_v40, 0.0  ;;  %v5944_v43 = vadd.f32 %v4251_v7, %v8660_v52  ;;  %v4787_v15 = vmax.f32 %v6006_v62, 0.0  ;;  %v6008_v13 = vadd.f32 %v4637_v5, %v8663_v10 }
 0x3cf   : > { %v4934_v57 = vmul.f32 %v8667_v22, %v4784_v11  ;;  %v4788_v23 = vmax.f32 %v5943_v24, 0.0  ;;  %v5060_v2 = vadd.f32 %v5059_v9, %v4929_v31  ;;  %v5064_v18 = vadd.f32 %v5063_v12, %v4932_v56 }
 0x3d0   : > { %v4935_v39 = vmul.f32 %v8672_v19, %v4785_v6  ;;  %v4789_v41 = vmax.f32 %v5944_v43, 0.0  ;;  %v4936_v48 = vmul.f32 %v8675_v46, %v4786_v14  ;;  %v4790_v38 = vmax.f32 %v6007_v1, 0.0 }
 0x3d1   : > { %v4938_v51 = vmul.f32 %v8667_v22, %v4788_v23  ;;  %5061 = vadd.xlane.f32.xlu0 %v5060_v2  ;;  %v5065_v32 = vadd.f32 %v5064_v18, %v4933_v55  ;;  %v4937_v29 = vmul.f32 %v8685_v59, %v4787_v15  ;;  %v4791_v61 = vmax.f32 %v6008_v13, 0.0 }
 0x3d2   : > { %v5068_v50 = vadd.f32 %v4935_v39, %v4934_v57  ;;  %v4939_v45 = vmul.f32 %v8672_v19, %v4789_v41  ;;  %v4255_v58 = vpop.f32.mrb[80].mxu0  ;;  %v4641_v34 = vpop.f32.mrb[80].mxu1  ;;  %v4940_v17 = vmul.f32 %v8675_v46, %v4790_v38 }
 0x3d3   : > { %v5945_v36 = vadd.f32 %v4255_v58, %v8651_v53  ;;  %v6009_v3 = vadd.f32 %v4641_v34, %v8654_v25  ;;  %v4257_v49 = vpop.f32.mrb[81].mxu0  ;;  %v4643_v33 = vpop.f32.mrb[81].mxu1  ;;  %5066 = vadd.xlane.f32.xlu1 %v5065_v32  ;;  %v4941_v26 = vmul.f32 %v8685_v59, %v4791_v61 }
 0x3d4   : > { %v5073_v28 = vadd.f32 %v4939_v45, %v4938_v51  ;;  %v5946_v4 = vadd.f32 %v4257_v49, %v8660_v52  ;;  %v4259_v27 = vpop.f32.mrb[82].mxu0  ;;  %v4645_v37 = vpop.f32.mrb[82].mxu1  ;;  %v5069_v60 = vadd.f32 %v5068_v50, %v4936_v48  ;;  %v6010_v54 = vadd.f32 %v4643_v33, %v8663_v10 }
 0x3d5   : > { %v4792_v63 = vmax.f32 %v5945_v36, 0.0  ;;  %v5947_v8 = vadd.f32 %v4259_v27, %v8651_v53  ;;  %v4261_v44 = vpop.f32.mrb[83].mxu0  ;;  %v4647_v30 = vpop.f32.mrb[83].mxu1  ;;  %v4794_v35 = vmax.f32 %v6009_v3, 0.0  ;;  %v6011_v42 = vadd.f32 %v4645_v37, %v8654_v25 }
 0x3d6   : > { %v4793_v20 = vmax.f32 %v5946_v4, 0.0  ;;  %v5948_v16 = vadd.f32 %v4261_v44, %v8660_v52  ;;  %v6012_v62 = vadd.f32 %v4647_v30, %v8663_v10  ;;  %v5070_v9 = vadd.f32 %v5069_v60, %v4937_v29 }
 0x3d7   : > { %v4942_v21 = vmul.f32 %v8667_v22, %v4792_v63  ;;  %v4796_v0 = vmax.f32 %v5947_v8, 0.0  ;;  %v5074_v11 = vadd.f32 %v5073_v28, %v4940_v17  ;;  %v4944_v24 = vmul.f32 %v8675_v46, %v4794_v35 }
 0x3d8   : > { %v4943_v12 = vmul.f32 %v8672_v19, %v4793_v20  ;;  %v4797_v40 = vmax.f32 %v5948_v16, 0.0  ;;  %v4795_v5 = vmax.f32 %v6010_v54, 0.0  ;;  %v4798_v43 = vmax.f32 %v6011_v42, 0.0  ;;  %5071 = vadd.xlane.f32.xlu0 %v5070_v9 }
 0x3d9   : > { %v4946_v47 = vmul.f32 %v8667_v22, %v4796_v0  ;;  %v5075_v23 = vadd.f32 %v5074_v11, %v4941_v26  ;;  %v4799_v15 = vmax.f32 %v6012_v62, 0.0 }
 0x3da   : > { %v5078_v7 = vadd.f32 %v4943_v12, %v4942_v21  ;;  %v4947_v31 = vmul.f32 %v8672_v19, %v4797_v40  ;;  %v4265_v14 = vpop.f32.mrb[84].mxu0  ;;  %v4651_v6 = vpop.f32.mrb[84].mxu1  ;;  %v4945_v34 = vmul.f32 %v8685_v59, %v4795_v5  ;;  %v4948_v32 = vmul.f32 %v8675_v46, %v4798_v43 }
 0x3db   : > { %v5949_v56 = vadd.f32 %v4265_v14, %v8651_v53  ;;  %v6013_v57 = vadd.f32 %v4651_v6, %v8654_v25  ;;  %v4267_v1 = vpop.f32.mrb[85].mxu0  ;;  %v4653_v55 = vpop.f32.mrb[85].mxu1  ;;  %5076 = vadd.xlane.f32.xlu1 %v5075_v23  ;;  %v4949_v4 = vmul.f32 %v8685_v59, %v4799_v15 }
 0x3dc   : > { %v5083_v39 = vadd.f32 %v4947_v31, %v4946_v47  ;;  %v5950_v41 = vadd.f32 %v4267_v1, %v8660_v52  ;;  %v4269_v51 = vpop.f32.mrb[86].mxu0  ;;  %v4655_v13 = vpop.f32.mrb[86].mxu1  ;;  %v5079_v2 = vadd.f32 %v5078_v7, %v4944_v24  ;;  %v6014_v48 = vadd.f32 %v4653_v55, %v8663_v10 }
 0x3dd   : > { %v4800_v18 = vmax.f32 %v5949_v56, 0.0  ;;  %v5951_v50 = vadd.f32 %v4269_v51, %v8651_v53  ;;  %v4271_v45 = vpop.f32.mrb[87].mxu0  ;;  %v4657_v58 = vpop.f32.mrb[87].mxu1  ;;  %v4802_v38 = vmax.f32 %v6013_v57, 0.0  ;;  %v6015_v28 = vadd.f32 %v4655_v13, %v8654_v25 }
 0x3de   : > { %v4801_v36 = vmax.f32 %v5950_v41, 0.0  ;;  %v5952_v3 = vadd.f32 %v4271_v45, %v8660_v52  ;;  %v6016_v60 = vadd.f32 %v4657_v58, %v8663_v10  ;;  %v4803_v29 = vmax.f32 %v6014_v48, 0.0 }
 0x3df   : > { %v4950_v49 = vmul.f32 %v8667_v22, %v4800_v18  ;;  %v4804_v33 = vmax.f32 %v5951_v50, 0.0  ;;  %v5080_v63 = vadd.f32 %v5079_v2, %v4945_v34  ;;  %v5084_v8 = vadd.f32 %v5083_v39, %v4948_v32 }
 0x3e0   : > { %v4951_v27 = vmul.f32 %v8672_v19, %v4801_v36  ;;  %v4805_v37 = vmax.f32 %v5952_v3, 0.0  ;;  %v4952_v44 = vmul.f32 %v8675_v46, %v4802_v38  ;;  %v4806_v16 = vmax.f32 %v6015_v28, 0.0 }
 0x3e1   : > { %v4954_v61 = vmul.f32 %v8667_v22, %v4804_v33  ;;  %5081 = vadd.xlane.f32.xlu0 %v5080_v63  ;;  %v5085_v0 = vadd.f32 %v5084_v8, %v4949_v4  ;;  %v4807_v62 = vmax.f32 %v6016_v60, 0.0  ;;  %v4953_v24 = vmul.f32 %v8685_v59, %v4803_v29 }
 0x3e2   : > { %v5088_v30 = vadd.f32 %v4951_v27, %v4950_v49  ;;  %v4955_v35 = vmul.f32 %v8672_v19, %v4805_v37  ;;  %v4275_v20 = vpop.f32.mrb[88].mxu0  ;;  %v4661_v54 = vpop.f32.mrb[88].mxu1  ;;  %v4956_v1 = vmul.f32 %v8675_v46, %v4806_v16 }
 0x3e3   : > { %v5953_v17 = vadd.f32 %v4275_v20, %v8651_v53  ;;  %v6017_v21 = vadd.f32 %v4661_v54, %v8654_v25  ;;  %v4277_v42 = vpop.f32.mrb[89].mxu0  ;;  %v4663_v12 = vpop.f32.mrb[89].mxu1  ;;  %5086 = vadd.xlane.f32.xlu1 %v5085_v0  ;;  %v4957_v41 = vmul.f32 %v8685_v59, %v4807_v62 }
 0x3e4   : > { %v5093_v40 = vadd.f32 %v4955_v35, %v4954_v61  ;;  %v5954_v26 = vadd.f32 %v4277_v42, %v8660_v52  ;;  %v4279_v47 = vpop.f32.mrb[90].mxu0  ;;  %v4665_v9 = vpop.f32.mrb[90].mxu1  ;;  %v5089_v11 = vadd.f32 %v5088_v30, %v4952_v44  ;;  %v6018_v5 = vadd.f32 %v4663_v12, %v8663_v10 }
 0x3e5   : > { %v4808_v7 = vmax.f32 %v5953_v17, 0.0  ;;  %v5955_v31 = vadd.f32 %v4279_v47, %v8651_v53  ;;  %v4281_v14 = vpop.f32.mrb[91].mxu0  ;;  %v4667_v6 = vpop.f32.mrb[91].mxu1  ;;  %v4810_v43 = vmax.f32 %v6017_v21, 0.0  ;;  %v6019_v57 = vadd.f32 %v4665_v9, %v8654_v25 }
 0x3e6   : > { %v4809_v56 = vmax.f32 %v5954_v26, 0.0  ;;  %v5956_v23 = vadd.f32 %v4281_v14, %v8660_v52  ;;  %v6020_v15 = vadd.f32 %v4667_v6, %v8663_v10  ;;  %v4811_v2 = vmax.f32 %v6018_v5, 0.0 }
 0x3e7   : > { %v4958_v55 = vmul.f32 %v8667_v22, %v4808_v7  ;;  %v4812_v39 = vmax.f32 %v5955_v31, 0.0  ;;  %v5090_v48 = vadd.f32 %v5089_v11, %v4953_v24  ;;  %v5094_v50 = vadd.f32 %v5093_v40, %v4956_v1 }
 0x3e8   : > { %v4959_v51 = vmul.f32 %v8672_v19, %v4809_v56  ;;  %v4813_v13 = vmax.f32 %v5956_v23, 0.0  ;;  %v4960_v45 = vmul.f32 %v8675_v46, %v4810_v43  ;;  %v4814_v34 = vmax.f32 %v6019_v57, 0.0 }
 0x3e9   : > { %v4962_v18 = vmul.f32 %v8667_v22, %v4812_v39  ;;  %v4815_v32 = vmax.f32 %v6020_v15, 0.0  ;;  %5091 = vadd.xlane.f32.xlu0 %v5090_v48  ;;  %v5095_v28 = vadd.f32 %v5094_v50, %v4957_v41  ;;  %v4961_v54 = vmul.f32 %v8685_v59, %v4811_v2 }
 0x3ea   : > { %v5098_v58 = vadd.f32 %v4959_v51, %v4958_v55  ;;  %v4963_v38 = vmul.f32 %v8672_v19, %v4813_v13  ;;  %v4285_v36 = vpop.f32.mrb[92].mxu0  ;;  %v4671_v3 = vpop.f32.mrb[92].mxu1  ;;  %v4964_v0 = vmul.f32 %v8675_v46, %v4814_v34 }
 0x3eb   : > { %v5957_v49 = vadd.f32 %v4285_v36, %v8651_v53  ;;  %v6021_v33 = vadd.f32 %v4671_v3, %v8654_v25  ;;  %v4287_v4 = vpop.f32.mrb[93].mxu0  ;;  %v4673_v27 = vpop.f32.mrb[93].mxu1  ;;  %5096 = vadd.xlane.f32.xlu1 %v5095_v28  ;;  %v4965_v62 = vmul.f32 %v8685_v59, %v4815_v32 }
 0x3ec   : > { %v5103_v37 = vadd.f32 %v4963_v38, %v4962_v18  ;;  %v5958_v60 = vadd.f32 %v4287_v4, %v8660_v52  ;;  %v6022_v29 = vadd.f32 %v4673_v27, %v8663_v10  ;;  %v4289_v61 = vpop.f32.mrb[94].mxu0  ;;  %v4675_v63 = vpop.f32.mrb[94].mxu1  ;;  %v5099_v8 = vadd.f32 %v5098_v58, %v4960_v45 }
 0x3ed   : > { %v4816_v44 = vmax.f32 %v5957_v49, 0.0  ;;  %v5959_v30 = vadd.f32 %v4289_v61, %v8651_v53  ;;  %v4291_v35 = vpop.f32.mrb[95].mxu0  ;;  %v4677_v20 = vpop.f32.mrb[95].mxu1  ;;  %v4818_v16 = vmax.f32 %v6021_v33, 0.0  ;;  %v6023_v40 = vadd.f32 %v4675_v63, %v8654_v25 }
 0x3ee   : > { %v4817_v17 = vmax.f32 %v5958_v60, 0.0  ;;  %v5960_v21 = vadd.f32 %v4291_v35, %v8660_v52  ;;  %v4819_v47 = vmax.f32 %v6022_v29, 0.0  ;;  %v6024_v24 = vadd.f32 %v4677_v20, %v8663_v10 }
 0x3ef   : > { %v4966_v42 = vmul.f32 %v8667_v22, %v4816_v44  ;;  %v4820_v12 = vmax.f32 %v5959_v30, 0.0  ;;  %v5100_v7 = vadd.f32 %v5099_v8, %v4961_v54  ;;  %v5104_v5 = vadd.f32 %v5103_v37, %v4964_v0 }
 0x3f0   : > { %v4967_v26 = vmul.f32 %v8672_v19, %v4817_v17  ;;  %v4821_v9 = vmax.f32 %v5960_v21, 0.0  ;;  %v4968_v31 = vmul.f32 %v8675_v46, %v4818_v16  ;;  %v4822_v57 = vmax.f32 %v6023_v40, 0.0 }
 0x3f1   : > { %v4970_v11 = vmul.f32 %v8667_v22, %v4820_v12  ;;  %5101 = vadd.xlane.f32.xlu0 %v5100_v7  ;;  %v5105_v55 = vadd.f32 %v5104_v5, %v4965_v62  ;;  %v4969_v48 = vmul.f32 %v8685_v59, %v4819_v47  ;;  %v4823_v50 = vmax.f32 %v6024_v24, 0.0 }
 0x3f2   : > { %v5108_v14 = vadd.f32 %v4967_v26, %v4966_v42  ;;  %v4971_v6 = vmul.f32 %v8672_v19, %v4821_v9  ;;  %v4295_v43 = vpop.f32.mrb[96].mxu0  ;;  %v4681_v56 = vpop.f32.mrb[96].mxu1  ;;  %v4972_v33 = vmul.f32 %v8675_v46, %v4822_v57 }
 0x3f3   : > { %v5961_v23 = vadd.f32 %v4295_v43, %v8651_v53  ;;  %v6025_v1 = vadd.f32 %v4681_v56, %v8654_v25  ;;  %v4297_v39 = vpop.f32.mrb[97].mxu0  ;;  %v4683_v15 = vpop.f32.mrb[97].mxu1  ;;  %5106 = vadd.xlane.f32.xlu1 %v5105_v55  ;;  %v4973_v61 = vmul.f32 %v8685_v59, %v4823_v50 }
 0x3f4   : > { %v5113_v41 = vadd.f32 %v4971_v6, %v4970_v11  ;;  %v5962_v51 = vadd.f32 %v4297_v39, %v8660_v52  ;;  %v4299_v13 = vpop.f32.mrb[98].mxu0  ;;  %v4685_v2 = vpop.f32.mrb[98].mxu1  ;;  %v5109_v18 = vadd.f32 %v5108_v14, %v4968_v31  ;;  %v6026_v32 = vadd.f32 %v4683_v15, %v8663_v10 }
 0x3f5   : > { %v4824_v45 = vmax.f32 %v5961_v23, 0.0  ;;  %v5963_v58 = vadd.f32 %v4299_v13, %v8651_v53  ;;  %v4301_v34 = vpop.f32.mrb[99].mxu0  ;;  %v4687_v38 = vpop.f32.mrb[99].mxu1  ;;  %v4826_v36 = vmax.f32 %v6025_v1, 0.0  ;;  %v6027_v27 = vadd.f32 %v4685_v2, %v8654_v25 }
 0x3f6   : > { %v4825_v3 = vmax.f32 %v5962_v51, 0.0  ;;  %v5964_v49 = vadd.f32 %v4301_v34, %v8660_v52  ;;  %v6028_v29 = vadd.f32 %v4687_v38, %v8663_v10  ;;  %v5110_v8 = vadd.f32 %v5109_v18, %v4969_v48 }
 0x3f7   : > { %v4974_v28 = vmul.f32 %v8667_v22, %v4824_v45  ;;  %v4828_v4 = vmax.f32 %v5963_v58, 0.0  ;;  %v5114_v44 = vadd.f32 %v5113_v41, %v4972_v33  ;;  %v4976_v30 = vmul.f32 %v8675_v46, %v4826_v36 }
 0x3f8   : > { %v4975_v37 = vmul.f32 %v8672_v19, %v4825_v3  ;;  %v4829_v60 = vmax.f32 %v5964_v49, 0.0  ;;  %v4827_v20 = vmax.f32 %v6026_v32, 0.0  ;;  %v4830_v21 = vmax.f32 %v6027_v27, 0.0  ;;  %5111 = vadd.xlane.f32.xlu0 %v5110_v8 }
 0x3f9   : > { %v4978_v63 = vmul.f32 %v8667_v22, %v4828_v4  ;;  %v5115_v12 = vadd.f32 %v5114_v44, %v4973_v61  ;;  %v4831_v47 = vmax.f32 %v6028_v29, 0.0 }
 0x3fa   : > { %v5118_v35 = vadd.f32 %v4975_v37, %v4974_v28  ;;  %v4979_v54 = vmul.f32 %v8672_v19, %v4829_v60  ;;  %v4305_v16 = vpop.f32.mrb[100].mxu0  ;;  %v4691_v17 = vpop.f32.mrb[100].mxu1  ;;  %v4977_v56 = vmul.f32 %v8685_v59, %v4827_v20  ;;  %v4980_v55 = vmul.f32 %v8675_v46, %v4830_v21 }
 0x3fb   : > { %v5965_v0 = vadd.f32 %v4305_v16, %v8651_v53  ;;  %v6029_v42 = vadd.f32 %v4691_v17, %v8654_v25  ;;  %v4307_v40 = vpop.f32.mrb[101].mxu0  ;;  %v4693_v62 = vpop.f32.mrb[101].mxu1  ;;  %5116 = vadd.xlane.f32.xlu1 %v5115_v12  ;;  %v4981_v51 = vmul.f32 %v8685_v59, %v4831_v47 }
 0x3fc   : > { %v5123_v26 = vadd.f32 %v4979_v54, %v4978_v63  ;;  %v5966_v9 = vadd.f32 %v4307_v40, %v8660_v52  ;;  %v4309_v11 = vpop.f32.mrb[102].mxu0  ;;  %v4695_v24 = vpop.f32.mrb[102].mxu1  ;;  %v5119_v7 = vadd.f32 %v5118_v35, %v4976_v30  ;;  %v6030_v31 = vadd.f32 %v4693_v62, %v8663_v10 }
 0x3fd   : > { %v4832_v5 = vmax.f32 %v5965_v0, 0.0  ;;  %v5967_v14 = vadd.f32 %v4309_v11, %v8651_v53  ;;  %v4311_v6 = vpop.f32.mrb[103].mxu0  ;;  %v4697_v43 = vpop.f32.mrb[103].mxu1  ;;  %v4834_v57 = vmax.f32 %v6029_v42, 0.0  ;;  %v6031_v41 = vadd.f32 %v4695_v24, %v8654_v25 }
 0x3fe   : > { %v4833_v23 = vmax.f32 %v5966_v9, 0.0  ;;  %v5968_v1 = vadd.f32 %v4311_v6, %v8660_v52  ;;  %v6032_v18 = vadd.f32 %v4697_v43, %v8663_v10  ;;  %v4835_v48 = vmax.f32 %v6030_v31, 0.0 }
 0x3ff   : > { %v4982_v39 = vmul.f32 %v8667_v22, %v4832_v5  ;;  %v4836_v15 = vmax.f32 %v5967_v14, 0.0  ;;  %v5120_v45 = vadd.f32 %v5119_v7, %v4977_v56  ;;  %v5124_v58 = vadd.f32 %v5123_v26, %v4980_v55 }
 0x400   : > { %v4983_v13 = vmul.f32 %v8672_v19, %v4833_v23  ;;  %v4837_v2 = vmax.f32 %v5968_v1, 0.0  ;;  %v4984_v34 = vmul.f32 %v8675_v46, %v4834_v57  ;;  %v4838_v49 = vmax.f32 %v6031_v41, 0.0 }
 0x401   : > { %v4986_v50 = vmul.f32 %v8667_v22, %v4836_v15  ;;  %5121 = vadd.xlane.f32.xlu0 %v5120_v45  ;;  %v5125_v4 = vadd.f32 %v5124_v58, %v4981_v51  ;;  %v4839_v29 = vmax.f32 %v6032_v18, 0.0  ;;  %v4985_v30 = vmul.f32 %v8685_v59, %v4835_v48 }
 0x402   : > { %v5128_v38 = vadd.f32 %v4983_v13, %v4982_v39  ;;  %v4987_v36 = vmul.f32 %v8672_v19, %v4837_v2  ;;  %v4315_v3 = vpop.f32.mrb[104].mxu0  ;;  %v4701_v32 = vpop.f32.mrb[104].mxu1  ;;  %v4988_v40 = vmul.f32 %v8675_v46, %v4838_v49 }
 0x403   : > { %v5969_v33 = vadd.f32 %v4315_v3, %v8651_v53  ;;  %v6033_v28 = vadd.f32 %v4701_v32, %v8654_v25  ;;  %v4317_v27 = vpop.f32.mrb[105].mxu0  ;;  %v4703_v37 = vpop.f32.mrb[105].mxu1  ;;  %5126 = vadd.xlane.f32.xlu1 %v5125_v4  ;;  %v4989_v9 = vmul.f32 %v8685_v59, %v4839_v29 }
 0x404   : > { %v5133_v60 = vadd.f32 %v4987_v36, %v4986_v50  ;;  %v5970_v61 = vadd.f32 %v4317_v27, %v8660_v52  ;;  %v4319_v63 = vpop.f32.mrb[106].mxu0  ;;  %v4705_v8 = vpop.f32.mrb[106].mxu1  ;;  %v5129_v44 = vadd.f32 %v5128_v38, %v4984_v34  ;;  %v6034_v20 = vadd.f32 %v4703_v37, %v8663_v10 }
 0x405   : > { %v4840_v35 = vmax.f32 %v5969_v33, 0.0  ;;  %v5971_v54 = vadd.f32 %v4319_v63, %v8651_v53  ;;  %v4321_v16 = vpop.f32.mrb[107].mxu0  ;;  %v4707_v17 = vpop.f32.mrb[107].mxu1  ;;  %v4842_v21 = vmax.f32 %v6033_v28, 0.0  ;;  %v6035_v42 = vadd.f32 %v4705_v8, %v8654_v25 }
 0x406   : > { %v4841_v0 = vmax.f32 %v5970_v61, 0.0  ;;  %v5972_v12 = vadd.f32 %v4321_v16, %v8660_v52  ;;  %v6036_v47 = vadd.f32 %v4707_v17, %v8663_v10  ;;  %v4843_v7 = vmax.f32 %v6034_v20, 0.0 }
 0x407   : > { %v4990_v62 = vmul.f32 %v8667_v22, %v4840_v35  ;;  %v4844_v26 = vmax.f32 %v5971_v54, 0.0  ;;  %v5130_v31 = vadd.f32 %v5129_v44, %v4985_v30  ;;  %v5134_v14 = vadd.f32 %v5133_v60, %v4988_v40 }
 0x408   : > { %v4991_v11 = vmul.f32 %v8672_v19, %v4841_v0  ;;  %v4845_v24 = vmax.f32 %v5972_v12, 0.0  ;;  %v4992_v6 = vmul.f32 %v8675_v46, %v4842_v21  ;;  %v4846_v56 = vmax.f32 %v6035_v42, 0.0 }
 0x409   : > { %v4994_v5 = vmul.f32 %v8667_v22, %v4844_v26  ;;  %v4847_v55 = vmax.f32 %v6036_v47, 0.0  ;;  %5131 = vadd.xlane.f32.xlu0 %v5130_v31  ;;  %v5135_v41 = vadd.f32 %v5134_v14, %v4989_v9  ;;  %v4993_v32 = vmul.f32 %v8685_v59, %v4843_v7 }
 0x40a   : > { %v5138_v43 = vadd.f32 %v4991_v11, %v4990_v62  ;;  %v4995_v57 = vmul.f32 %v8672_v19, %v4845_v24  ;;  %v4325_v23 = vpop.f32.mrb[108].mxu0  ;;  %v4711_v1 = vpop.f32.mrb[108].mxu1  ;;  %v4996_v4 = vmul.f32 %v8675_v46, %v4846_v56 }
 0x40b   : > { %v5973_v39 = vadd.f32 %v4325_v23, %v8651_v53  ;;  %v6037_v15 = vadd.f32 %v4711_v1, %v8654_v25  ;;  %v4327_v51 = vpop.f32.mrb[109].mxu0  ;;  %v4713_v13 = vpop.f32.mrb[109].mxu1  ;;  %5136 = vadd.xlane.f32.xlu1 %v5135_v41  ;;  %v4997_v29 = vmul.f32 %v8685_v59, %v4847_v55 }
 0x40c   : > { %v5143_v2 = vadd.f32 %v4995_v57, %v4994_v5  ;;  %v5974_v18 = vadd.f32 %v4327_v51, %v8660_v52  ;;  %v6038_v48 = vadd.f32 %v4713_v13, %v8663_v10  ;;  %v4329_v50 = vpop.f32.mrb[110].mxu0  ;;  %v4715_v45 = vpop.f32.mrb[110].mxu1  ;;  %v5139_v58 = vadd.f32 %v5138_v43, %v4992_v6 }
 0x40d   : > { %v4848_v34 = vmax.f32 %v5973_v39, 0.0  ;;  %v5975_v38 = vadd.f32 %v4329_v50, %v8651_v53  ;;  %v4331_v36 = vpop.f32.mrb[111].mxu0  ;;  %v4717_v3 = vpop.f32.mrb[111].mxu1  ;;  %v4850_v49 = vmax.f32 %v6037_v15, 0.0  ;;  %v6039_v60 = vadd.f32 %v4715_v45, %v8654_v25 }
 0x40e   : > { %v4849_v33 = vmax.f32 %v5974_v18, 0.0  ;;  %v5976_v28 = vadd.f32 %v4331_v36, %v8660_v52  ;;  %v4851_v63 = vmax.f32 %v6038_v48, 0.0  ;;  %v6040_v30 = vadd.f32 %v4717_v3, %v8663_v10 }
 0x40f   : > { %v4998_v27 = vmul.f32 %v8667_v22, %v4848_v34  ;;  %v4852_v37 = vmax.f32 %v5975_v38, 0.0  ;;  %v5140_v35 = vadd.f32 %v5139_v58, %v4993_v32  ;;  %v5144_v20 = vadd.f32 %v5143_v2, %v4996_v4 }
 0x410   : > { %v4999_v61 = vmul.f32 %v8672_v19, %v4849_v33  ;;  %v4853_v8 = vmax.f32 %v5976_v28, 0.0  ;;  %v5000_v54 = vmul.f32 %v8675_v46, %v4850_v49  ;;  %v4854_v42 = vmax.f32 %v6039_v60, 0.0 }
 0x411   : > { %v5002_v44 = vmul.f32 %v8667_v22, %v4852_v37  ;;  %5141 = vadd.xlane.f32.xlu0 %v5140_v35  ;;  %v5145_v62 = vadd.f32 %v5144_v20, %v4997_v29  ;;  %v5001_v31 = vmul.f32 %v8685_v59, %v4851_v63  ;;  %v4855_v14 = vmax.f32 %v6040_v30, 0.0 }
 0x412   : > { %v5148_v16 = vadd.f32 %v4999_v61, %v4998_v27  ;;  %v5003_v17 = vmul.f32 %v8672_v19, %v4853_v8  ;;  %v4335_v21 = vpop.f32.mrb[112].mxu0  ;;  %v4721_v0 = vpop.f32.mrb[112].mxu1  ;;  %v5004_v15 = vmul.f32 %v8675_v46, %v4854_v42 }
 0x413   : > { %v5977_v12 = vadd.f32 %v4335_v21, %v8651_v53  ;;  %v6041_v40 = vadd.f32 %v4721_v0, %v8654_v25  ;;  %v4337_v26 = vpop.f32.mrb[113].mxu0  ;;  %v4723_v47 = vpop.f32.mrb[113].mxu1  ;;  %5146 = vadd.xlane.f32.xlu1 %v5145_v62  ;;  %v5005_v50 = vmul.f32 %v8685_v59, %v4855_v14 }
 0x414   : > { %v5153_v9 = vadd.f32 %v5003_v17, %v5002_v44  ;;  %v5978_v11 = vadd.f32 %v4337_v26, %v8660_v52  ;;  %v4339_v24 = vpop.f32.mrb[114].mxu0  ;;  %v4725_v7 = vpop.f32.mrb[114].mxu1  ;;  %v5149_v5 = vadd.f32 %v5148_v16, %v5000_v54  ;;  %v6042_v55 = vadd.f32 %v4723_v47, %v8663_v10 }
 0x415   : > { %v4856_v6 = vmax.f32 %v5977_v12, 0.0  ;;  %v5979_v43 = vadd.f32 %v4339_v24, %v8651_v53  ;;  %v4341_v56 = vpop.f32.mrb[115].mxu0  ;;  %v4727_v57 = vpop.f32.mrb[115].mxu1  ;;  %v4858_v23 = vmax.f32 %v6041_v40, 0.0  ;;  %v6043_v13 = vadd.f32 %v4725_v7, %v8654_v25 }
 0x416   : > { %v4857_v1 = vmax.f32 %v5978_v11, 0.0  ;;  %v5980_v39 = vadd.f32 %v4341_v56, %v8660_v52  ;;  %v6044_v48 = vadd.f32 %v4727_v57, %v8663_v10  ;;  %v5150_v58 = vadd.f32 %v5149_v5, %v5001_v31 }
 0x417   : > { %v5006_v41 = vmul.f32 %v8667_v22, %v4856_v6  ;;  %v4860_v51 = vmax.f32 %v5979_v43, 0.0  ;;  %v5154_v34 = vadd.f32 %v5153_v9, %v5004_v15  ;;  %v5008_v38 = vmul.f32 %v8675_v46, %v4858_v23 }
 0x418   : > { %v5007_v2 = vmul.f32 %v8672_v19, %v4857_v1  ;;  %v4861_v18 = vmax.f32 %v5980_v39, 0.0  ;;  %v4859_v3 = vmax.f32 %v6042_v55, 0.0  ;;  %v4862_v28 = vmax.f32 %v6043_v13, 0.0  ;;  %5151 = vadd.xlane.f32.xlu0 %v5150_v58 }
 0x419   : > { %v5010_v45 = vmul.f32 %v8667_v22, %v4860_v51  ;;  %v5155_v37 = vadd.f32 %v5154_v34, %v5005_v50  ;;  %v4863_v63 = vmax.f32 %v6044_v48, 0.0 }
 0x41a   : > { %v5158_v36 = vadd.f32 %v5007_v2, %v5006_v41  ;;  %v5011_v32 = vmul.f32 %v8672_v19, %v4861_v18  ;;  %v4345_v49 = vpop.f32.mrb[116].mxu0  ;;  %v4731_v33 = vpop.f32.mrb[116].mxu1  ;;  %v5009_v0 = vmul.f32 %v8685_v59, %v4859_v3  ;;  %v5012_v62 = vmul.f32 %v8675_v46, %v4862_v28 }
 0x41b   : > { %v5981_v4 = vadd.f32 %v4345_v49, %v8651_v53  ;;  %v6045_v27 = vadd.f32 %v4731_v33, %v8654_v25  ;;  %v4347_v60 = vpop.f32.mrb[117].mxu0  ;;  %v4733_v29 = vpop.f32.mrb[117].mxu1  ;;  %5156 = vadd.xlane.f32.xlu1 %v5155_v37  ;;  %v5013_v11 = vmul.f32 %v8685_v59, %v4863_v63 }
 0x41c   : > { %v5163_v61 = vadd.f32 %v5011_v32, %v5010_v45  ;;  %v5982_v8 = vadd.f32 %v4347_v60, %v8660_v52  ;;  %v4349_v44 = vpop.f32.mrb[118].mxu0  ;;  %v4735_v30 = vpop.f32.mrb[118].mxu1  ;;  %v5159_v35 = vadd.f32 %v5158_v36, %v5008_v38  ;;  %v6046_v54 = vadd.f32 %v4733_v29, %v8663_v10 }
 0x41d   : > { %v4864_v20 = vmax.f32 %v5981_v4, 0.0  ;;  %v5983_v16 = vadd.f32 %v4349_v44, %v8651_v53  ;;  %v4351_v17 = vpop.f32.mrb[119].mxu0  ;;  %v4737_v21 = vpop.f32.mrb[119].mxu1  ;;  %v4866_v42 = vmax.f32 %v6045_v27, 0.0  ;;  %v6047_v9 = vadd.f32 %v4735_v30, %v8654_v25 }
 0x41e   : > { %v4865_v12 = vmax.f32 %v5982_v8, 0.0  ;;  %v5984_v40 = vadd.f32 %v4351_v17, %v8660_v52  ;;  %v6048_v5 = vadd.f32 %v4737_v21, %v8663_v10  ;;  %v4867_v31 = vmax.f32 %v6046_v54, 0.0 }
 0x41f   : > { %v5014_v26 = vmul.f32 %v8667_v22, %v4864_v20  ;;  %v4868_v47 = vmax.f32 %v5983_v16, 0.0  ;;  %v5160_v6 = vadd.f32 %v5159_v35, %v5009_v0  ;;  %v5164_v43 = vadd.f32 %v5163_v61, %v5012_v62 }
 0x420   : > { %v5015_v24 = vmul.f32 %v8672_v19, %v4865_v12  ;;  %v4869_v7 = vmax.f32 %v5984_v40, 0.0  ;;  %v5016_v56 = vmul.f32 %v8675_v46, %v4866_v42  ;;  %v4870_v39 = vmax.f32 %v6047_v9, 0.0 }
 0x421   : > { %v5018_v14 = vmul.f32 %v8667_v22, %v4868_v47  ;;  %5161 = vadd.xlane.f32.xlu0 %v5160_v6  ;;  %v5165_v51 = vadd.f32 %v5164_v43, %v5013_v11  ;;  %v4871_v48 = vmax.f32 %v6048_v5, 0.0  ;;  %v5017_v38 = vmul.f32 %v8685_v59, %v4867_v31 }
 0x422   : > { %v5168_v57 = vadd.f32 %v5015_v24, %v5014_v26  ;;  %v5019_v23 = vmul.f32 %v8672_v19, %v4869_v7  ;;  %v4355_v1 = vpop.f32.mrb[120].mxu0  ;;  %v4741_v55 = vpop.f32.mrb[120].mxu1  ;;  %v5020_v37 = vmul.f32 %v8675_v46, %v4870_v39 }
 0x423   : > { %v5985_v15 = vadd.f32 %v4355_v1, %v8651_v53  ;;  %v6049_v41 = vadd.f32 %v4741_v55, %v8654_v25  ;;  %v4357_v13 = vpop.f32.mrb[121].mxu0  ;;  %v4743_v2 = vpop.f32.mrb[121].mxu1  ;;  %5166 = vadd.xlane.f32.xlu1 %v5165_v51  ;;  %v5021_v63 = vmul.f32 %v8685_v59, %v4871_v48 }
 0x424   : > { %v5173_v18 = vadd.f32 %v5019_v23, %v5018_v14  ;;  %v5986_v50 = vadd.f32 %v4357_v13, %v8660_v52  ;;  %v4359_v45 = vpop.f32.mrb[122].mxu0  ;;  %v4745_v58 = vpop.f32.mrb[122].mxu1  ;;  %v5169_v34 = vadd.f32 %v5168_v57, %v5016_v56  ;;  %v6050_v4 = vadd.f32 %v4743_v2, %v8663_v10 }
 0x425   : > { %v4872_v36 = vmax.f32 %v5985_v15, 0.0  ;;  %v5987_v3 = vadd.f32 %v4359_v45, %v8651_v53  ;;  %v4361_v32 = vpop.f32.mrb[123].mxu0  ;;  %v4747_v49 = vpop.f32.mrb[123].mxu1  ;;  %v4874_v33 = vmax.f32 %v6049_v41, 0.0  ;;  %v6051_v61 = vadd.f32 %v4745_v58, %v8654_v25 }
 0x426   : > { %v4873_v28 = vmax.f32 %v5986_v50, 0.0  ;;  %v5988_v27 = vadd.f32 %v4361_v32, %v8660_v52  ;;  %v6052_v35 = vadd.f32 %v4747_v49, %v8663_v10  ;;  %v5170_v20 = vadd.f32 %v5169_v34, %v5017_v38 }
 0x427   : > { %v5022_v60 = vmul.f32 %v8667_v22, %v4872_v36  ;;  %v4876_v29 = vmax.f32 %v5987_v3, 0.0  ;;  %v5174_v54 = vadd.f32 %v5173_v18, %v5020_v37  ;;  %v5024_v16 = vmul.f32 %v8675_v46, %v4874_v33 }
 0x428   : > { %v5023_v8 = vmul.f32 %v8672_v19, %v4873_v28  ;;  %v4877_v44 = vmax.f32 %v5988_v27, 0.0  ;;  %v4875_v21 = vmax.f32 %v6050_v4, 0.0  ;;  %v4878_v40 = vmax.f32 %v6051_v61, 0.0  ;;  %5171 = vadd.xlane.f32.xlu0 %v5170_v20  ;;  %v8933_v61 = vld [vmem:[#allocation2] ss:$0 sm:$0xff] }
 0x429   : > { %v5026_v30 = vmul.f32 %v8667_v22, %v4876_v29  ;;  %v5175_v47 = vadd.f32 %v5174_v54, %v5021_v63  ;;  %v4879_v43 = vmax.f32 %v6052_v35, 0.0 }
 0x42a   : > { %v5178_v17 = vadd.f32 %v5023_v8, %v5022_v60  ;;  %v5027_v0 = vmul.f32 %v8672_v19, %v4877_v44  ;;  %v4365_v42 = vpop.f32.mrb[124].mxu0  ;;  %v4751_v12 = vpop.f32.mrb[124].mxu1  ;;  %v5025_v13 = vmul.f32 %v8685_v59, %v4875_v21  ;;  %v5028_v2 = vmul.f32 %v8675_v46, %v4878_v40 }
 0x42b   : > { %v5989_v62 = vadd.f32 %v4365_v42, %v8651_v53  ;;  %v6053_v26 = vadd.f32 %v4751_v12, %v8654_v25  ;;  %v4367_v9 = vpop.f32.mrb[125].mxu0  ;;  %v4753_v11 = vpop.f32.mrb[125].mxu1  ;;  %5176 = vadd.xlane.f32.xlu1 %v5175_v47  ;;  %v5029_v58 = vmul.f32 %v8685_v59, %v4879_v43 }
 0x42c   : > { %v5183_v24 = vadd.f32 %v5027_v0, %v5026_v30  ;;  %v5990_v7 = vadd.f32 %v4367_v9, %v8660_v52  ;;  %v6054_v5 = vadd.f32 %v4753_v11, %v8663_v10  ;;  %v4369_v31 = vpop.f32.mrb[126].mxu0  ;;  %v4755_v14 = vpop.f32.mrb[126].mxu1  ;;  %v5179_v6 = vadd.f32 %v5178_v17, %v5024_v16 }
 0x42d   : > { %v4880_v56 = vmax.f32 %v5989_v62, 0.0  ;;  %v5991_v57 = vadd.f32 %v4369_v31, %v8651_v53  ;;  %v6055_v23 = vadd.f32 %v4755_v14, %v8654_v25  ;;  %v4371_v1 = vpop.f32.mrb[127].mxu0  ;;  %v4757_v55 = vpop.f32.mrb[127].mxu1  ;;  %v4882_v39 = vmax.f32 %v6053_v26, 0.0 }
 0x42e   : > { %v4881_v15 = vmax.f32 %v5990_v7, 0.0  ;;  %v5992_v41 = vadd.f32 %v4371_v1, %v8660_v52  ;;  %v6056_v51 = vadd.f32 %v4757_v55, %v8663_v10  ;;  %v4883_v53 = vmax.f32 %v6054_v5, 0.0 }
 0x42f   : > { %v5030_v18 = vmul.f32 %v8667_v22, %v4880_v56  ;;  %v4884_v48 = vmax.f32 %v5991_v57, 0.0  ;;  %v4886_v45 = vmax.f32 %v6055_v23, 0.0  ;;  %v5180_v38 = vadd.f32 %v5179_v6, %v5025_v13 }
 0x430   : > { %v5031_v50 = vmul.f32 %v8672_v19, %v4881_v15  ;;  %v4885_v25 = vmax.f32 %v5992_v41, 0.0  ;;  %v5184_v52 = vadd.f32 %v5183_v24, %v5028_v2  ;;  %v5032_v10 = vmul.f32 %v8675_v46, %v4882_v39 }
 0x431   : > { %v5034_v34 = vmul.f32 %v8667_v22, %v4884_v48  ;;  %v4887_v32 = vmax.f32 %v6056_v51, 0.0  ;;  %5181 = vadd.xlane.f32.xlu0 %v5180_v38  ;;  %v5033_v33 = vmul.f32 %v8685_v59, %v4883_v53  ;;  %v5036_v28 = vmul.f32 %v8675_v46, %v4886_v45 }
 0x432   : > { %v5188_v36 = vadd.f32 %v5031_v50, %v5030_v18  ;;  %v5035_v3 = vmul.f32 %v8672_v19, %v4885_v25  ;;  %v5185_v49 = vadd.f32 %v5184_v52, %v5029_v58 }
 0x433   : > { %v5037_v37 = vmul.f32 %v8685_v59, %v4887_v32 }
 0x434   : > { %v5193_v4 = vadd.f32 %v5035_v3, %v5034_v34  ;;  %v5189_v27 = vadd.f32 %v5188_v36, %v5032_v10  ;;  %5186 = vadd.xlane.f32.xlu1 %v5185_v49 }
 0x436   : > { %v5190_v22 = vadd.f32 %v5189_v27, %v5033_v33  ;;  %v5194_v60 = vadd.f32 %v5193_v4, %v5036_v28 }
 0x438   : > { %5191 = vadd.xlane.f32.xlu0 %v5190_v22  ;;  %v5195_v29 = vadd.f32 %v5194_v60, %v5037_v37 }
 0x43a   : > { %5196 = vadd.xlane.f32.xlu1 %v5195_v29 }
 0x44e   : > { %v5042_v19 = vpop.xlane.xlu1 %5041 }
 0x44f   : > { %v5205_v63 = vadd.f32 %v8933_v61, %v5042_v19 }
 0x450   : > { %v5047_v8 = vpop.xlane.xlu0 %5046 }
 0x451   : > { %v5237_v44 = vsub.f32 0.0, %v5205_v63  ;;  %v5206_v30 = vadd.f32 %v8933_v61, %v5047_v8 }
 0x453   : > { %v5269_v46 = vmul.f32 1.442695, %v5237_v44  ;;  %v5238_v35 = vsub.f32 0.0, %v5206_v30 }
 0x455   : > { %6761 = vpow2.f32 %v5269_v46  ;;  %v5271_v20 = vmul.f32 1.442695, %v5238_v35 }
 0x456   : > { %v5052_v54 = vpop.xlane.xlu0 %5051 }
 0x457   : > { %6763 = vpow2.f32 %v5271_v20  ;;  %v5207_v59 = vadd.f32 %v8933_v61, %v5052_v54 }
 0x458   : > { %v5057_v16 = vpop.xlane.xlu1 %5056 }
 0x459   : > { %v5239_v17 = vsub.f32 0.0, %v5207_v59  ;;  %v5208_v21 = vadd.f32 %v8933_v61, %v5057_v16 }
 0x45b   : > { %v5273_v0 = vmul.f32 1.442695, %v5239_v17  ;;  %v5240_v42 = vsub.f32 0.0, %v5208_v21 }
 0x45d   : > { %6765 = vpow2.f32 %v5273_v0  ;;  %v5275_v12 = vmul.f32 1.442695, %v5240_v42 }
 0x45e   : > { %v5062_v40 = vpop.xlane.xlu0 %5061 }
 0x45f   : > { %v6762_v62 = vpop.eup %6761  ;;  %6767 = vpow2.f32 %v5275_v12  ;;  %v5209_v26 = vadd.f32 %v8933_v61, %v5062_v40 }
 0x460   : > { %v5333_v47 = vadd.f32 1.0, %v6762_v62  ;;  %v5067_v9 = vpop.xlane.xlu1 %5066 }
 0x461   : > { %v6764_v11 = vpop.eup %6763  ;;  %v5241_v24 = vsub.f32 0.0, %v5209_v26  ;;  %v5210_v7 = vadd.f32 %v8933_v61, %v5067_v9 }
 0x462   : > { %6769 = vrcp.f32 %v5333_v47  ;;  %v5334_v5 = vadd.f32 1.0, %v6764_v11 }
 0x463   : > { %v5277_v31 = vmul.f32 1.442695, %v5241_v24  ;;  %v5242_v14 = vsub.f32 0.0, %v5210_v7 }
 0x464   : > { %6771 = vrcp.f32 %v5334_v5 }
 0x465   : > { %6773 = vpow2.f32 %v5277_v31  ;;  %v5279_v6 = vmul.f32 1.442695, %v5242_v14  ;;  %v5072_v43 = vpop.xlane.xlu0 %5071 }
 0x466   : > { %v5211_v57 = vadd.f32 %v8933_v61, %v5072_v43 }
 0x467   : > { %v6766_v56 = vpop.eup %6765  ;;  %6775 = vpow2.f32 %v5279_v6 }
 0x468   : > { %v5335_v23 = vadd.f32 1.0, %v6766_v56  ;;  %v5077_v1 = vpop.xlane.xlu1 %5076  ;;  %v5243_v39 = vsub.f32 0.0, %v5211_v57 }
 0x469   : > { %v6768_v55 = vpop.eup %6767  ;;  %v5212_v15 = vadd.f32 %v8933_v61, %v5077_v1 }
 0x46a   : > { %6777 = vrcp.f32 %v5335_v23  ;;  %v5336_v41 = vadd.f32 1.0, %v6768_v55  ;;  %v5281_v51 = vmul.f32 1.442695, %v5243_v39 }
 0x46b   : > { %v5244_v13 = vsub.f32 0.0, %v5212_v15 }
 0x46c   : > { %v6770_v2 = vpop.eup %6769  ;;  %6779 = vrcp.f32 %v5336_v41 }
 0x46d   : > { %5430 = vst.msk [vmem:[%s8948_s26] sm:$0xff] %vm5429_vm0, %v6770_v2  ;;  %6781 = vpow2.f32 %v5281_v51  ;;  %v5283_v18 = vmul.f32 1.442695, %v5244_v13 }
 0x46e   : > { %v6772_v48 = vpop.eup %6771  ;;  %v5082_v50 = vpop.xlane.xlu0 %5081 }
 0x46f   : > { %v6774_v53 = vpop.eup %6773  ;;  %5431 = vst.msk [vmem:[%s8948_s26 + $0x8] sm:$0xff] %vm5429_vm0, %v6772_v48  ;;  %6783 = vpow2.f32 %v5283_v18  ;;  %v5213_v45 = vadd.f32 %v8933_v61, %v5082_v50 }
 0x470   : > { %v5337_v25 = vadd.f32 1.0, %v6774_v53  ;;  %v5087_v58 = vpop.xlane.xlu1 %5086 }
 0x471   : > { %v6776_v34 = vpop.eup %6775  ;;  %v5245_v38 = vsub.f32 0.0, %v5213_v45  ;;  %v5214_v52 = vadd.f32 %v8933_v61, %v5087_v58 }
 0x472   : > { %6785 = vrcp.f32 %v5337_v25  ;;  %v5338_v10 = vadd.f32 1.0, %v6776_v34 }
 0x473   : > { %v5285_v36 = vmul.f32 1.442695, %v5245_v38  ;;  %v5246_v3 = vsub.f32 0.0, %v5214_v52 }
 0x474   : > { %v6778_v32 = vpop.eup %6777  ;;  %6787 = vrcp.f32 %v5338_v10 }
 0x475   : > { %5432 = vst.msk [vmem:[%s8948_s26 + $0x10] sm:$0xff] %vm5429_vm0, %v6778_v32  ;;  %6789 = vpow2.f32 %v5285_v36  ;;  %v5287_v49 = vmul.f32 1.442695, %v5246_v3 }
 0x476   : > { %v6780_v33 = vpop.eup %6779  ;;  %v5092_v28 = vpop.xlane.xlu0 %5091 }
 0x477   : > { %v6782_v4 = vpop.eup %6781  ;;  %5433 = vst.msk [vmem:[%s8948_s26 + $0x18] sm:$0xff] %vm5429_vm0, %v6780_v33  ;;  %6791 = vpow2.f32 %v5287_v49  ;;  %v5215_v27 = vadd.f32 %v8933_v61, %v5092_v28 }
 0x478   : > { %v5339_v37 = vadd.f32 1.0, %v6782_v4  ;;  %v5097_v22 = vpop.xlane.xlu1 %5096 }
 0x479   : > { %v6784_v60 = vpop.eup %6783  ;;  %v5247_v29 = vsub.f32 0.0, %v5215_v27  ;;  %v5216_v19 = vadd.f32 %v8933_v61, %v5097_v22 }
 0x47a   : > { %6793 = vrcp.f32 %v5339_v37  ;;  %v5340_v63 = vadd.f32 1.0, %v6784_v60 }
 0x47b   : > { %v5289_v8 = vmul.f32 1.442695, %v5247_v29  ;;  %v5248_v44 = vsub.f32 0.0, %v5216_v19 }
 0x47c   : > { %v6786_v30 = vpop.eup %6785  ;;  %6795 = vrcp.f32 %v5340_v63 }
 0x47d   : > { %5434 = vst.msk [vmem:[%s8948_s26 + $0x20] sm:$0xff] %vm5429_vm0, %v6786_v30  ;;  %6797 = vpow2.f32 %v5289_v8  ;;  %v5291_v46 = vmul.f32 1.442695, %v5248_v44 }
 0x47e   : > { %v6788_v35 = vpop.eup %6787  ;;  %v5102_v20 = vpop.xlane.xlu0 %5101 }
 0x47f   : > { %v6790_v54 = vpop.eup %6789  ;;  %5435 = vst.msk [vmem:[%s8948_s26 + $0x28] sm:$0xff] %vm5429_vm0, %v6788_v35  ;;  %6799 = vpow2.f32 %v5291_v46  ;;  %v5217_v59 = vadd.f32 %v8933_v61, %v5102_v20 }
 0x480   : > { %v5341_v16 = vadd.f32 1.0, %v6790_v54  ;;  %v5107_v17 = vpop.xlane.xlu1 %5106 }
 0x481   : > { %v6792_v21 = vpop.eup %6791  ;;  %v5249_v0 = vsub.f32 0.0, %v5217_v59  ;;  %v5218_v42 = vadd.f32 %v8933_v61, %v5107_v17 }
 0x482   : > { %6801 = vrcp.f32 %v5341_v16  ;;  %v5342_v12 = vadd.f32 1.0, %v6792_v21 }
 0x483   : > { %v5293_v40 = vmul.f32 1.442695, %v5249_v0  ;;  %v5250_v62 = vsub.f32 0.0, %v5218_v42 }
 0x484   : > { %v6794_v26 = vpop.eup %6793  ;;  %6803 = vrcp.f32 %v5342_v12 }
 0x485   : > { %5436 = vst.msk [vmem:[%s8948_s26 + $0x30] sm:$0xff] %vm5429_vm0, %v6794_v26  ;;  %6805 = vpow2.f32 %v5293_v40  ;;  %v5295_v47 = vmul.f32 1.442695, %v5250_v62  ;;  %v5112_v11 = vpop.xlane.xlu0 %5111 }
 0x486   : > { %v6796_v9 = vpop.eup %6795  ;;  %v5219_v7 = vadd.f32 %v8933_v61, %v5112_v11 }
 0x487   : > { %v6798_v24 = vpop.eup %6797  ;;  %5437 = vst.msk [vmem:[%s8948_s26 + $0x38] sm:$0xff] %vm5429_vm0, %v6796_v9  ;;  %6807 = vpow2.f32 %v5295_v47 }
 0x488   : > { %v5343_v5 = vadd.f32 1.0, %v6798_v24  ;;  %v5117_v31 = vpop.xlane.xlu1 %5116  ;;  %v5251_v6 = vsub.f32 0.0, %v5219_v7 }
 0x489   : > { %v6800_v14 = vpop.eup %6799  ;;  %v5220_v43 = vadd.f32 %v8933_v61, %v5117_v31 }
 0x48a   : > { %6809 = vrcp.f32 %v5343_v5  ;;  %v5344_v56 = vadd.f32 1.0, %v6800_v14  ;;  %v5297_v57 = vmul.f32 1.442695, %v5251_v6 }
 0x48b   : > { %v5252_v23 = vsub.f32 0.0, %v5220_v43 }
 0x48c   : > { %v6802_v1 = vpop.eup %6801  ;;  %6811 = vrcp.f32 %v5344_v56 }
 0x48d   : > { %5438 = vst.msk [vmem:[%s8948_s26 + $0x40] sm:$0xff] %vm5429_vm0, %v6802_v1  ;;  %6813 = vpow2.f32 %v5297_v57  ;;  %v5299_v55 = vmul.f32 1.442695, %v5252_v23 }
 0x48e   : > { %v6804_v39 = vpop.eup %6803  ;;  %v5122_v15 = vpop.xlane.xlu0 %5121 }
 0x48f   : > { %v6806_v41 = vpop.eup %6805  ;;  %5439 = vst.msk [vmem:[%s8948_s26 + $0x48] sm:$0xff] %vm5429_vm0, %v6804_v39  ;;  %6815 = vpow2.f32 %v5299_v55  ;;  %v5221_v51 = vadd.f32 %v8933_v61, %v5122_v15 }
 0x490   : > { %v5345_v13 = vadd.f32 1.0, %v6806_v41  ;;  %v5127_v2 = vpop.xlane.xlu1 %5126 }
 0x491   : > { %v6808_v18 = vpop.eup %6807  ;;  %v5253_v48 = vsub.f32 0.0, %v5221_v51  ;;  %v5222_v50 = vadd.f32 %v8933_v61, %v5127_v2 }
 0x492   : > { %6817 = vrcp.f32 %v5345_v13  ;;  %v5346_v53 = vadd.f32 1.0, %v6808_v18 }
 0x493   : > { %v5301_v45 = vmul.f32 1.442695, %v5253_v48  ;;  %v5254_v25 = vsub.f32 0.0, %v5222_v50 }
 0x494   : > { %v6810_v58 = vpop.eup %6809  ;;  %6819 = vrcp.f32 %v5346_v53 }
 0x495   : > { %5440 = vst.msk [vmem:[%s8948_s26 + $0x50] sm:$0xff] %vm5429_vm0, %v6810_v58  ;;  %6821 = vpow2.f32 %v5301_v45  ;;  %v5303_v34 = vmul.f32 1.442695, %v5254_v25 }
 0x496   : > { %v6812_v38 = vpop.eup %6811  ;;  %v5132_v52 = vpop.xlane.xlu0 %5131 }
 0x497   : > { %v6814_v10 = vpop.eup %6813  ;;  %5441 = vst.msk [vmem:[%s8948_s26 + $0x58] sm:$0xff] %vm5429_vm0, %v6812_v38  ;;  %6823 = vpow2.f32 %v5303_v34  ;;  %v5223_v36 = vadd.f32 %v8933_v61, %v5132_v52 }
 0x498   : > { %v5347_v3 = vadd.f32 1.0, %v6814_v10  ;;  %v5137_v32 = vpop.xlane.xlu1 %5136 }
 0x499   : > { %v6816_v49 = vpop.eup %6815  ;;  %v5255_v33 = vsub.f32 0.0, %v5223_v36  ;;  %v5224_v28 = vadd.f32 %v8933_v61, %v5137_v32 }
 0x49a   : > { %6825 = vrcp.f32 %v5347_v3  ;;  %v5348_v4 = vadd.f32 1.0, %v6816_v49 }
 0x49b   : > { %v5305_v27 = vmul.f32 1.442695, %v5255_v33  ;;  %v5256_v37 = vsub.f32 0.0, %v5224_v28 }
 0x49c   : > { %v6818_v22 = vpop.eup %6817  ;;  %6827 = vrcp.f32 %v5348_v4 }
 0x49d   : > { %5442 = vst.msk [vmem:[%s8948_s26 + $0x60] sm:$0xff] %vm5429_vm0, %v6818_v22  ;;  %6829 = vpow2.f32 %v5305_v27  ;;  %v5307_v60 = vmul.f32 1.442695, %v5256_v37 }
 0x49e   : > { %v6820_v29 = vpop.eup %6819  ;;  %v5142_v19 = vpop.xlane.xlu0 %5141 }
 0x49f   : > { %v6822_v63 = vpop.eup %6821  ;;  %5443 = vst.msk [vmem:[%s8948_s26 + $0x68] sm:$0xff] %vm5429_vm0, %v6820_v29  ;;  %6831 = vpow2.f32 %v5307_v60  ;;  %v5225_v8 = vadd.f32 %v8933_v61, %v5142_v19 }
 0x4a0   : > { %v5349_v44 = vadd.f32 1.0, %v6822_v63  ;;  %v5147_v30 = vpop.xlane.xlu1 %5146 }
 0x4a1   : > { %v6824_v46 = vpop.eup %6823  ;;  %v5257_v35 = vsub.f32 0.0, %v5225_v8  ;;  %v5226_v20 = vadd.f32 %v8933_v61, %v5147_v30 }
 0x4a2   : > { %6833 = vrcp.f32 %v5349_v44  ;;  %v5350_v54 = vadd.f32 1.0, %v6824_v46 }
 0x4a3   : > { %v5309_v59 = vmul.f32 1.442695, %v5257_v35  ;;  %v5258_v16 = vsub.f32 0.0, %v5226_v20 }
 0x4a4   : > { %v6826_v17 = vpop.eup %6825  ;;  %6835 = vrcp.f32 %v5350_v54 }
 0x4a5   : > { %5444 = vst.msk [vmem:[%s8948_s26 + $0x70] sm:$0xff] %vm5429_vm0, %v6826_v17  ;;  %6837 = vpow2.f32 %v5309_v59  ;;  %v5311_v21 = vmul.f32 1.442695, %v5258_v16  ;;  %v5152_v42 = vpop.xlane.xlu0 %5151 }
 0x4a6   : > { %v6828_v0 = vpop.eup %6827  ;;  %v5227_v40 = vadd.f32 %v8933_v61, %v5152_v42 }
 0x4a7   : > { %v6830_v12 = vpop.eup %6829  ;;  %5445 = vst.msk [vmem:[%s8948_s26 + $0x78] sm:$0xff] %vm5429_vm0, %v6828_v0  ;;  %6839 = vpow2.f32 %v5311_v21 }
 0x4a8   : > { %v5351_v62 = vadd.f32 1.0, %v6830_v12  ;;  %v5157_v26 = vpop.xlane.xlu1 %5156  ;;  %v5259_v9 = vsub.f32 0.0, %v5227_v40 }
 0x4a9   : > { %v6832_v47 = vpop.eup %6831  ;;  %v5228_v11 = vadd.f32 %v8933_v61, %v5157_v26 }
 0x4aa   : > { %6841 = vrcp.f32 %v5351_v62  ;;  %v5352_v24 = vadd.f32 1.0, %v6832_v47  ;;  %v5313_v7 = vmul.f32 1.442695, %v5259_v9 }
 0x4ab   : > { %v5260_v5 = vsub.f32 0.0, %v5228_v11 }
 0x4ac   : > { %v6834_v31 = vpop.eup %6833  ;;  %6843 = vrcp.f32 %v5352_v24 }
 0x4ad   : > { %5446 = vst.msk [vmem:[%s8948_s26 + $0x80] sm:$0xff] %vm5429_vm0, %v6834_v31  ;;  %6845 = vpow2.f32 %v5313_v7  ;;  %v5315_v14 = vmul.f32 1.442695, %v5260_v5 }
 0x4ae   : > { %v6836_v6 = vpop.eup %6835  ;;  %v5162_v43 = vpop.xlane.xlu0 %5161 }
 0x4af   : > { %v6838_v56 = vpop.eup %6837  ;;  %5447 = vst.msk [vmem:[%s8948_s26 + $0x88] sm:$0xff] %vm5429_vm0, %v6836_v6  ;;  %6847 = vpow2.f32 %v5315_v14  ;;  %v5229_v57 = vadd.f32 %v8933_v61, %v5162_v43 }
 0x4b0   : > { %v5353_v23 = vadd.f32 1.0, %v6838_v56  ;;  %v5167_v1 = vpop.xlane.xlu1 %5166 }
 0x4b1   : > { %v6840_v55 = vpop.eup %6839  ;;  %v5261_v39 = vsub.f32 0.0, %v5229_v57  ;;  %v5230_v15 = vadd.f32 %v8933_v61, %v5167_v1 }
 0x4b2   : > { %6849 = vrcp.f32 %v5353_v23  ;;  %v5354_v41 = vadd.f32 1.0, %v6840_v55 }
 0x4b3   : > { %v5317_v51 = vmul.f32 1.442695, %v5261_v39  ;;  %v5262_v13 = vsub.f32 0.0, %v5230_v15 }
 0x4b4   : > { %v6842_v2 = vpop.eup %6841  ;;  %6851 = vrcp.f32 %v5354_v41 }
 0x4b5   : > { %5448 = vst.msk [vmem:[%s8948_s26 + $0x90] sm:$0xff] %vm5429_vm0, %v6842_v2  ;;  %6853 = vpow2.f32 %v5317_v51  ;;  %v5319_v18 = vmul.f32 1.442695, %v5262_v13  ;;  %v5172_v50 = vpop.xlane.xlu0 %5171 }
 0x4b6   : > { %v6844_v48 = vpop.eup %6843  ;;  %v5231_v45 = vadd.f32 %v8933_v61, %v5172_v50 }
 0x4b7   : > { %v6846_v53 = vpop.eup %6845  ;;  %5449 = vst.msk [vmem:[%s8948_s26 + $0x98] sm:$0xff] %vm5429_vm0, %v6844_v48  ;;  %6855 = vpow2.f32 %v5319_v18 }
 0x4b8   : > { %v5355_v25 = vadd.f32 1.0, %v6846_v53  ;;  %v5177_v58 = vpop.xlane.xlu1 %5176  ;;  %v5263_v38 = vsub.f32 0.0, %v5231_v45 }
 0x4b9   : > { %v6848_v34 = vpop.eup %6847  ;;  %v5232_v52 = vadd.f32 %v8933_v61, %v5177_v58 }
 0x4ba   : > { %6857 = vrcp.f32 %v5355_v25  ;;  %v5356_v10 = vadd.f32 1.0, %v6848_v34  ;;  %v5321_v36 = vmul.f32 1.442695, %v5263_v38 }
 0x4bb   : > { %v5264_v3 = vsub.f32 0.0, %v5232_v52 }
 0x4bc   : > { %v6850_v32 = vpop.eup %6849  ;;  %6859 = vrcp.f32 %v5356_v10 }
 0x4bd   : > { %5450 = vst.msk [vmem:[%s8948_s26 + $0xa0] sm:$0xff] %vm5429_vm0, %v6850_v32  ;;  %6861 = vpow2.f32 %v5321_v36  ;;  %v5323_v49 = vmul.f32 1.442695, %v5264_v3 }
 0x4be   : > { %v6852_v33 = vpop.eup %6851  ;;  %v5182_v28 = vpop.xlane.xlu0 %5181 }
 0x4bf   : > { %v6854_v4 = vpop.eup %6853  ;;  %5451 = vst.msk [vmem:[%s8948_s26 + $0xa8] sm:$0xff] %vm5429_vm0, %v6852_v33  ;;  %6863 = vpow2.f32 %v5323_v49  ;;  %v5233_v27 = vadd.f32 %v8933_v61, %v5182_v28 }
 0x4c0   : > { %v5357_v37 = vadd.f32 1.0, %v6854_v4 }
 0x4c1   : > { %v5187_v22 = vpop.xlane.xlu1 %5186  ;;  %v6856_v60 = vpop.eup %6855  ;;  %v5265_v29 = vsub.f32 0.0, %v5233_v27 }
 0x4c2   : > { %v5234_v19 = vadd.f32 %v8933_v61, %v5187_v22  ;;  %6865 = vrcp.f32 %v5357_v37  ;;  %v5358_v63 = vadd.f32 1.0, %v6856_v60 }
 0x4c3   : > { %v5325_v8 = vmul.f32 1.442695, %v5265_v29 }
 0x4c4   : > { %v5266_v44 = vsub.f32 0.0, %v5234_v19  ;;  %v6858_v46 = vpop.eup %6857  ;;  %6867 = vrcp.f32 %v5358_v63 }
 0x4c5   : > { %v5192_v30 = vpop.xlane.xlu0 %5191  ;;  %5452 = vst.msk [vmem:[%s8948_s26 + $0xb0] sm:$0xff] %vm5429_vm0, %v6858_v46  ;;  %6869 = vpow2.f32 %v5325_v8 }
 0x4c6   : > { %v5235_v35 = vadd.f32 %v8933_v61, %v5192_v30  ;;  %v5327_v20 = vmul.f32 1.442695, %v5266_v44  ;;  %v6860_v59 = vpop.eup %6859 }
 0x4c7   : > { %v5197_v54 = vpop.xlane.xlu1 %5196  ;;  %v6862_v21 = vpop.eup %6861  ;;  %5453 = vst.msk [vmem:[%s8948_s26 + $0xb8] sm:$0xff] %vm5429_vm0, %v6860_v59 }
 0x4c8   : > { %v5267_v16 = vsub.f32 0.0, %v5235_v35  ;;  %v5236_v17 = vadd.f32 %v8933_v61, %v5197_v54  ;;  %6871 = vpow2.f32 %v5327_v20  ;;  %v5359_v0 = vadd.f32 1.0, %v6862_v21 }
 0x4c9   : > { %v6864_v40 = vpop.eup %6863 }
 0x4ca   : > { %v5329_v42 = vmul.f32 1.442695, %v5267_v16  ;;  %v5268_v12 = vsub.f32 0.0, %v5236_v17  ;;  %6873 = vrcp.f32 %v5359_v0  ;;  %v5360_v62 = vadd.f32 1.0, %v6864_v40 }
 0x4cc   : > { %v5331_v26 = vmul.f32 1.442695, %v5268_v12  ;;  %6875 = vpow2.f32 %v5329_v42  ;;  %v6866_v47 = vpop.eup %6865 }
 0x4cd   : > { %6877 = vrcp.f32 %v5360_v62  ;;  %5454 = vst.msk [vmem:[%s8948_s26 + $0xc0] sm:$0xff] %vm5429_vm0, %v6866_v47 }
 0x4ce   : > { %6879 = vpow2.f32 %v5331_v26  ;;  %v6868_v61 = vpop.eup %6867 }
 0x4cf   : > { %v6870_v9 = vpop.eup %6869  ;;  %5455 = vst.msk [vmem:[%s8948_s26 + $0xc8] sm:$0xff] %vm5429_vm0, %v6868_v61 }
 0x4d0   : > { %v5361_v11 = vadd.f32 1.0, %v6870_v9 }
 0x4d2   : > { %v6872_v24 = vpop.eup %6871  ;;  %6881 = vrcp.f32 %v5361_v11 }
 0x4d3   : > { %v5362_v7 = vadd.f32 1.0, %v6872_v24 }
 0x4d4   : > { %v6874_v5 = vpop.eup %6873 }
 0x4d5   : > { %6883 = vrcp.f32 %v5362_v7  ;;  %5456 = vst.msk [vmem:[%s8948_s26 + $0xd0] sm:$0xff] %vm5429_vm0, %v6874_v5 }
 0x4d6   : > { %v6876_v31 = vpop.eup %6875 }
 0x4d7   : > { %v6878_v14 = vpop.eup %6877  ;;  %v5363_v6 = vadd.f32 1.0, %v6876_v31 }
 0x4d8   : > { %v6880_v43 = vpop.eup %6879  ;;  %5457 = vst.msk [vmem:[%s8948_s26 + $0xd8] sm:$0xff] %vm5429_vm0, %v6878_v14 }
 0x4d9   : > { %6885 = vrcp.f32 %v5363_v6  ;;  %v5364_v56 = vadd.f32 1.0, %v6880_v43 }
 0x4db   : > { %6887 = vrcp.f32 %v5364_v56 }
 0x4dc   : > { %v6882_v57 = vpop.eup %6881 }
 0x4dd   : > { %5458 = vst.msk [vmem:[%s8948_s26 + $0xe0] sm:$0xff] %vm5429_vm0, %v6882_v57 }
 0x4df   : > { %v6884_v23 = vpop.eup %6883 }
 0x4e0   : > { %5459 = vst.msk [vmem:[%s8948_s26 + $0xe8] sm:$0xff] %vm5429_vm0, %v6884_v23 }
 0x4e3   : > { %v6886_v1 = vpop.eup %6885 }
 0x4e4   : > { %5460 = vst.msk [vmem:[%s8948_s26 + $0xf0] sm:$0xff] %vm5429_vm0, %v6886_v1 }
 0x4e5   : > { %v6888_v55 = vpop.eup %6887 }
 0x4e6   : > { %5461 = vst.msk [vmem:[%s8948_s26 + $0xf8] sm:$0xff] %vm5429_vm0, %v6888_v55 }
 0x4e7 PF: > { %s22_s11 = sadd.s32 1, %s6927_s11  }
 0x4e8   : > { %p19_p3 = scmp.ge.s32.totalorder %s22_s11, 4  }
 0x4ea   :  { %21 = sbr.rel (!%p19_p3) target bundleno = 4 (0x4), region = 92 }
 0x4f1   :  { %5484 = vsyncpa [#allocation4], 1 }
 0x4f2   :  { %5486 = vsyncpa [#allocation4 + $0x1], 1 }

</bundles_post_ra>
